<compile_context>
chip_gen: v7x
topology: tpu7x:2x2x1
jax: 0.10.0
libtpu: 0.0.40
codegen_flags: <defaults>
</compile_context>

<pallas_src>
import numpy as np
import jax
import jax.numpy as jnp
from jax.experimental import pallas as pl
from jax.experimental.pallas import tpu as pltpu


_VMEM_LIMIT = 32 * 1024 * 1024  # explicit scoped-VMEM limit; tiles are tiny


def _pick_tile_n(n):
    """Largest multiple-of-128 tile <= 512 that divides n, else full n."""
    if n % 128 != 0:
        return n
    t = 128
    while t * 2 <= min(n, 512) and n % (t * 2) == 0:
        t *= 2
    return t


# ---------------------------------------------------------------------------
# Fused (matmul + per-channel affine + optional elementwise multipliers)
# ---------------------------------------------------------------------------
def _matmul_affine(w2, scale, bias, patches, mults=()):
    """out[b] = (w2 @ patches[b]) * scale + bias, then * each mult[b]."""
    B, K, N = patches.shape
    Cout = w2.shape[0]
    tn = _pick_tile_n(N)
    n_tiles = N // tn
    n_mult = len(mults)

    def kernel(w_ref, s_ref, b_ref, p_ref, *rest):
        o_ref = rest[-1]
        m_refs = rest[:-1]
        acc = jnp.dot(w_ref[...], p_ref[0], preferred_element_type=jnp.float32)
        out = acc * s_ref[...] + b_ref[...]
        for m_ref in m_refs:
            out = out * m_ref[0]
        o_ref[0] = out.astype(o_ref.dtype)

    in_specs = [
        pl.BlockSpec((Cout, K), lambda b, n: (0, 0)),   # weights (resident)
        pl.BlockSpec((Cout, 1), lambda b, n: (0, 0)),   # scale
        pl.BlockSpec((Cout, 1), lambda b, n: (0, 0)),   # bias
        pl.BlockSpec((1, K, tn), lambda b, n: (b, 0, n)),
    ] + [pl.BlockSpec((1, Cout, tn), lambda b, n: (b, 0, n)) for _ in range(n_mult)]

    flops = 2 * B * Cout * K * N + 2 * B * Cout * N * (1 + n_mult)
    bytes_accessed = 4 * (Cout * K + 2 * Cout + B * K * N
                          + (1 + n_mult) * B * Cout * N)

    out = pl.pallas_call(
        kernel,
        out_shape=jax.ShapeDtypeStruct((B, Cout, N), jnp.float32),
        grid_spec=pltpu.PrefetchScalarGridSpec(
            num_scalar_prefetch=0,
            grid=(B, n_tiles),
            in_specs=in_specs,
            out_specs=pl.BlockSpec((1, Cout, tn), lambda b, n: (b, 0, n)),
        ),
        compiler_params=pltpu.CompilerParams(
            dimension_semantics=("parallel", "parallel"),
            vmem_limit_bytes=_VMEM_LIMIT,
        ),
        cost_estimate=pl.CostEstimate(
            flops=flops, transcendentals=0, bytes_accessed=bytes_accessed),
    )(w2, scale.reshape(Cout, 1), bias.reshape(Cout, 1), patches, *mults)
    return out


def _im2col_3x3(x):
    """(B, C, H, W) -> (B, 9*C, H*W) patches for a 3x3, pad=1 convolution."""
    B, C, H, W = x.shape
    xp = jnp.pad(x, ((0, 0), (0, 0), (1, 1), (1, 1)))
    taps = []
    for dy in range(3):
        for dx in range(3):
            taps.append(xp[:, :, dy:dy + H, dx:dx + W].reshape(B, C, H * W))
    return jnp.concatenate(taps, axis=1)


def conv3x3_bn(x, w, gamma, beta, mean, var, mults=(), eps=1e-5):
    """BasicConv2d (conv 3x3 pad=1, no bias + BN eval-mode), optionally fused
    with elementwise multipliers applied left-to-right."""
    B, Cin, H, W = x.shape
    Cout = w.shape[0]
    N = H * W
    patches = _im2col_3x3(x)                                    # (B, 9Cin, N)
    # columns ordered (dy, dx, cin) to match patch stacking above
    w2 = jnp.transpose(w, (0, 2, 3, 1)).reshape(Cout, 9 * Cin)
    scale = gamma / jnp.sqrt(var + eps)
    bias = beta - mean * scale
    mflat = tuple(m.reshape(B, Cout, N) for m in mults)
    out = _matmul_affine(w2, scale, bias, patches, mflat)
    return out.reshape(B, Cout, H, W)


def conv1x1_bias(x, w, b):
    """Final Conv2d(3C, 1, kernel_size=1) with bias."""
    B, Cin, H, W = x.shape
    Cout = w.shape[0]
    N = H * W
    out = _matmul_affine(w.reshape(Cout, Cin),
                         jnp.ones((Cout,), jnp.float32), b,
                         x.reshape(B, Cin, N))
    return out.reshape(B, Cout, H, W)


# ---------------------------------------------------------------------------
# Bilinear x2 upsample (align_corners=True) as two MXU matmuls per plane
# ---------------------------------------------------------------------------
def _interp_matrix(n_out, n_in):
    m = np.zeros((n_out, n_in), np.float32)
    if n_in == 1:
        m[:, 0] = 1.0
        return jnp.asarray(m)
    scale = (n_in - 1) / (n_out - 1)
    for o in range(n_out):
        src = o * scale
        i0 = min(int(np.floor(src)), n_in - 2)
        f = src - i0
        m[o, i0] += 1.0 - f
        m[o, i0 + 1] += f
    return jnp.asarray(m)


def _upsample_kernel(ry_ref, rxt_ref, x_ref, o_ref):
    x = x_ref[0]                                                   # (H, W)
    t = jnp.dot(ry_ref[...], x, preferred_element_type=jnp.float32)   # (2H, W)
    o = jnp.dot(t, rxt_ref[...], preferred_element_type=jnp.float32)  # (2H, 2W)
    o_ref[0] = o.astype(o_ref.dtype)


def bilinear_upsample_x2(x):
    B, C, H, W = x.shape
    Ho, Wo = 2 * H, 2 * W
    ry = _interp_matrix(Ho, H)        # (2H, H)
    rxt = _interp_matrix(Wo, W).T     # (W, 2W)
    xp = x.reshape(B * C, H, W)
    out = pl.pallas_call(
        _upsample_kernel,
        out_shape=jax.ShapeDtypeStruct((B * C, Ho, Wo), jnp.float32),
        grid_spec=pltpu.PrefetchScalarGridSpec(
            num_scalar_prefetch=0,
            grid=(B * C,),
            in_specs=[
                pl.BlockSpec((Ho, H), lambda i: (0, 0)),
                pl.BlockSpec((W, Wo), lambda i: (0, 0)),
                pl.BlockSpec((1, H, W), lambda i: (i, 0, 0)),
            ],
            out_specs=pl.BlockSpec((1, Ho, Wo), lambda i: (i, 0, 0)),
        ),
        compiler_params=pltpu.CompilerParams(
            dimension_semantics=("parallel",),
            vmem_limit_bytes=_VMEM_LIMIT,
        ),
    )(ry, rxt, xp)
    return out.reshape(B, C, Ho, Wo)


# ---------------------------------------------------------------------------
# aggregation.forward
# ---------------------------------------------------------------------------
def aggregation_forward(x1, x2, x3, params):
    def cb(name, x, mults=()):
        w, g, b, m, v = params[name]
        return conv3x3_bn(x, w, g, b, m, v, mults=mults)

    up = bilinear_upsample_x2
    x1_1 = x1
    u_x1 = up(x1)
    # x2_1 = conv_upsample1(up(x1)) * x2          (multiplier fused in-kernel)
    x2_1 = cb('conv_upsample1', u_x1, mults=(x2,))
    # x3_1 = conv_upsample2(up(up(x1))) * conv_upsample3(up(x2)) * x3
    c3 = cb('conv_upsample3', up(x2))
    x3_1 = cb('conv_upsample2', up(u_x1), mults=(c3, x3))
    # x2_2 = conv_concat2(cat(x2_1, conv_upsample4(up(x1_1))))
    x2_2 = jnp.concatenate([x2_1, cb('conv_upsample4', u_x1)], axis=1)
    x2_2 = cb('conv_concat2', x2_2)
    # x3_2 = conv_concat3(cat(x3_1, conv_upsample5(up(x2_2))))
    x3_2 = jnp.concatenate([x3_1, cb('conv_upsample5', up(x2_2))], axis=1)
    x3_2 = cb('conv_concat3', x3_2)
    x = cb('conv4', x3_2)
    w5, b5 = params['conv5']
    return conv1x1_bias(x, w5, b5)


# ---------------------------------------------------------------------------
# Pure-JAX reference mirroring the PyTorch forward (eval-mode BN)
# ---------------------------------------------------------------------------
def _conv_bn_ref(x, w, gamma, beta, mean, var, eps=1e-5):
    y = jax.lax.conv_general_dilated(
        x, w, window_strides=(1, 1), padding=((1, 1), (1, 1)),
        dimension_numbers=('NCHW', 'OIHW', 'NCHW'),
        precision=jax.lax.Precision.HIGHEST)
    s = (gamma / jnp.sqrt(var + eps))[None, :, None, None]
    return (y - mean[None, :, None, None]) * s + beta[None, :, None, None]


def _upsample_ref(x):
    B, C, H, W = x.shape
    ry = _interp_matrix(2 * H, H)
    rx = _interp_matrix(2 * W, W)
    return jnp.einsum('oh,bchw,pw->bcop', ry, x, rx,
                      precision=jax.lax.Precision.HIGHEST)


def _reference(x1, x2, x3, params):
    cb = lambda n, x: _conv_bn_ref(x, *params[n])
    up = _upsample_ref
    x1_1 = x1
    x2_1 = cb('conv_upsample1', up(x1)) * x2
    x3_1 = cb('conv_upsample2', up(up(x1))) * cb('conv_upsample3', up(x2)) * x3
    x2_2 = jnp.concatenate([x2_1, cb('conv_upsample4', up(x1_1))], axis=1)
    x2_2 = cb('conv_concat2', x2_2)
    x3_2 = jnp.concatenate([x3_1, cb('conv_upsample5', up(x2_2))], axis=1)
    x3_2 = cb('conv_concat3', x3_2)
    x = cb('conv4', x3_2)
    w5, b5 = params['conv5']
    y = jax.lax.conv_general_dilated(
        x, w5, (1, 1), 'VALID', dimension_numbers=('NCHW', 'OIHW', 'NCHW'),
        precision=jax.lax.Precision.HIGHEST)
    return y + b5[None, :, None, None]


def _init_params(key, channel):
    layers = [
        ('conv_upsample1', channel, channel),
        ('conv_upsample2', channel, channel),
        ('conv_upsample3', channel, channel),
        ('conv_upsample4', channel, channel),
        ('conv_upsample5', 2 * channel, 2 * channel),
        ('conv_concat2', 2 * channel, 2 * channel),
        ('conv_concat3', 3 * channel, 3 * channel),
        ('conv4', 3 * channel, 3 * channel),
    ]
    params = {}
    for name, cin, cout in layers:
        key, k1, k2, k3, k4, k5 = jax.random.split(key, 6)
        w = jax.random.normal(k1, (cout, cin, 3, 3), jnp.float32) / np.sqrt(9 * cin)
        g = jax.random.uniform(k2, (cout,), jnp.float32, 0.8, 1.2)
        b = 0.1 * jax.random.normal(k3, (cout,), jnp.float32)
        m = 0.1 * jax.random.normal(k4, (cout,), jnp.float32)
        v = jax.random.uniform(k5, (cout,), jnp.float32, 0.5, 1.5)
        params[name] = (w, g, b, m, v)
    key, k1, k2 = jax.random.split(key, 3)
    w5 = jax.random.normal(k1, (1, 3 * channel, 1, 1), jnp.float32) / np.sqrt(3 * channel)
    b5 = 0.1 * jax.random.normal(k2, (1,), jnp.float32)
    params['conv5'] = (w5, b5)
    return params


if __name__ == "__main__":
    key = jax.random.PRNGKey(0)
    channel, B = 4, 2
    k0, k1, k2, k3 = jax.random.split(key, 4)
    # x1 coarsest, x2 = 2x, x3 = 4x spatial resolution (required by forward).
    x1 = jax.random.normal(k1, (B, channel, 8, 8), jnp.float32)
    x2 = jax.random.normal(k2, (B, channel, 16, 16), jnp.float32)
    x3 = jax.random.normal(k3, (B, channel, 32, 32), jnp.float32)
    params = _init_params(k0, channel)

    fwd = jax.jit(aggregation_forward)
    out = jax.block_until_ready(fwd(x1, x2, x3, params))
    ref = _reference(x1, x2, x3, params)

    assert out.shape == (B, 1, 32, 32), out.shape
    assert jnp.allclose(out, ref, atol=5e-3, rtol=5e-3), (
        "max abs diff %e" % float(jnp.max(jnp.abs(out - ref))))
    print("KERNEL_OK")
</pallas_src>

<mosaic_0001>
module attributes {stable_mosaic.version = 11 : i64} {
  func.func @_upsample_kernel(%arg0: i32, %arg1: memref<16x8xf32, #tpu.memory_space<vmem>>, %arg2: memref<8x16xf32, #tpu.memory_space<vmem>>, %arg3: memref<1x8x8xf32, #tpu.memory_space<vmem>>, %arg4: memref<1x16x16xf32, #tpu.memory_space<vmem>>) attributes {dimension_semantics = [#tpu.dimension_semantics<parallel>], iteration_bounds = array<i64: 8>, scalar_prefetch = 0 : i64, scratch_operands = 0 : i64, tpu.core_type = #tpu.core_type<tc>, window_params = [{pipeline_mode = #tpu.pipeline_mode<synchronous>, transform_indices = @transform_0, window_bounds = array<i64: 16, 8>}, {pipeline_mode = #tpu.pipeline_mode<synchronous>, transform_indices = @transform_1, window_bounds = array<i64: 8, 16>}, {transform_indices = @transform_2, window_bounds = array<i64: 1, 8, 8>}, {transform_indices = @transform_3, window_bounds = array<i64: 1, 16, 16>}]} {
    %c0 = arith.constant 0 : index
    %c0_0 = arith.constant 0 : index
    %c0_1 = arith.constant 0 : index
    %0 = vector.load %arg3[%c0, %c0_0, %c0_1] : memref<1x8x8xf32, #tpu.memory_space<vmem>>, vector<1x8x8xf32>
    %1 = vector.shape_cast %0 : vector<1x8x8xf32> to vector<8x8xf32>
    %c0_2 = arith.constant 0 : index
    %c0_3 = arith.constant 0 : index
    %2 = vector.load %arg1[%c0_2, %c0_3] : memref<16x8xf32, #tpu.memory_space<vmem>>, vector<16x8xf32>
    %cst = arith.constant dense<0.000000e+00> : vector<16x8xf32>
    %3 = tpu.matmul %2, %1, %cst {dimension_numbers = #tpu.dot_dimension_numbers<[1], [0], [0], [1], [0, 0, 1, 1], [], []>} : vector<16x8xf32>, vector<8x8xf32>, vector<16x8xf32> -> vector<16x8xf32>
    %c0_4 = arith.constant 0 : index
    %c0_5 = arith.constant 0 : index
    %4 = vector.load %arg2[%c0_4, %c0_5] : memref<8x16xf32, #tpu.memory_space<vmem>>, vector<8x16xf32>
    %cst_6 = arith.constant dense<0.000000e+00> : vector<16x16xf32>
    %5 = tpu.matmul %3, %4, %cst_6 {dimension_numbers = #tpu.dot_dimension_numbers<[1], [0], [0], [1], [0, 0, 1, 1], [], []>} : vector<16x8xf32>, vector<8x16xf32>, vector<16x16xf32> -> vector<16x16xf32>
    %c0_7 = arith.constant 0 : index
    %c0_8 = arith.constant 0 : index
    %c0_9 = arith.constant 0 : index
    %6 = vector.load %arg4[%c0_7, %c0_8, %c0_9] : memref<1x16x16xf32, #tpu.memory_space<vmem>>, vector<1x16x16xf32>
    %7 = vector.shape_cast %6 : vector<1x16x16xf32> to vector<16x16xf32>
    %8 = vector.shape_cast %5 : vector<16x16xf32> to vector<1x16x16xf32>
    tpu.vector_store %arg4[%c0_7, %c0_8, %c0_9], %8 {strides = array<i32>} : memref<1x16x16xf32, #tpu.memory_space<vmem>>, vector<1x16x16xf32>,
    return
  }
  func.func @transform_0(%arg0: i32) -> (i32, i32) {
    %c0_i32 = arith.constant 0 : i32
    %c0_i32_0 = arith.constant 0 : i32
    %c0_i32_1 = arith.constant 0 : i32
    return %c0_i32, %c0_i32_0 : i32, i32
  }
  func.func @transform_1(%arg0: i32) -> (i32, i32) {
    %c0_i32 = arith.constant 0 : i32
    %c0_i32_0 = arith.constant 0 : i32
    %c0_i32_1 = arith.constant 0 : i32
    return %c0_i32, %c0_i32_0 : i32, i32
  }
  func.func @transform_2(%arg0: i32) -> (i32, i32, i32) {
    %c0_i32 = arith.constant 0 : i32
    %c0_i32_0 = arith.constant 0 : i32
    %c0_i32_1 = arith.constant 0 : i32
    return %arg0, %c0_i32, %c0_i32_0 : i32, i32, i32
  }
  func.func @transform_3(%arg0: i32) -> (i32, i32, i32) {
    %c0_i32 = arith.constant 0 : i32
    %c0_i32_0 = arith.constant 0 : i32
    %c0_i32_1 = arith.constant 0 : i32
    return %arg0, %c0_i32, %c0_i32_0 : i32, i32, i32
  }
}

module attributes {stable_mosaic.version = 11 : i64} {
  func.func @kernel(%arg0: i32, %arg1: i32, %arg2: memref<4x36xf32, #tpu.memory_space<vmem>>, %arg3: memref<4x1xf32, #tpu.memory_space<vmem>>, %arg4: memref<4x1xf32, #tpu.memory_space<vmem>>, %arg5: memref<1x36x256xf32, #tpu.memory_space<vmem>>, %arg6: memref<1x4x256xf32, #tpu.memory_space<vmem>>, %arg7: memref<1x4x256xf32, #tpu.memory_space<vmem>>) attributes {dimension_semantics = [#tpu.dimension_semantics<parallel>, #tpu.dimension_semantics<parallel>], iteration_bounds = array<i64: 2, 1>, scalar_prefetch = 0 : i64, scratch_operands = 0 : i64, tpu.core_type = #tpu.core_type<tc>, window_params = [{pipeline_mode = #tpu.pipeline_mode<synchronous>, transform_indices = @transform_0, window_bounds = array<i64: 4, 36>}, {pipeline_mode = #tpu.pipeline_mode<synchronous>, transform_indices = @transform_1, window_bounds = array<i64: 4, 1>}, {pipeline_mode = #tpu.pipeline_mode<synchronous>, transform_indices = @transform_2, window_bounds = array<i64: 4, 1>}, {transform_indices = @transform_3, window_bounds = array<i64: 1, 36, 256>}, {transform_indices = @transform_4, window_bounds = array<i64: 1, 4, 256>}, {transform_indices = @transform_5, window_bounds = array<i64: 1, 4, 256>}]} {
    %c0 = arith.constant 0 : index
    %c0_0 = arith.constant 0 : index
    %0 = vector.load %arg2[%c0, %c0_0] : memref<4x36xf32, #tpu.memory_space<vmem>>, vector<4x36xf32>
    %c0_1 = arith.constant 0 : index
    %c0_2 = arith.constant 0 : index
    %c0_3 = arith.constant 0 : index
    %1 = vector.load %arg5[%c0_1, %c0_2, %c0_3] : memref<1x36x256xf32, #tpu.memory_space<vmem>>, vector<1x36x256xf32>
    %2 = vector.shape_cast %1 : vector<1x36x256xf32> to vector<36x256xf32>
    %cst = arith.constant dense<0.000000e+00> : vector<4x256xf32>
    %3 = tpu.matmul %0, %2, %cst {dimension_numbers = #tpu.dot_dimension_numbers<[1], [0], [0], [1], [0, 0, 1, 1], [], []>} : vector<4x36xf32>, vector<36x256xf32>, vector<4x256xf32> -> vector<4x256xf32>
    %c0_4 = arith.constant 0 : index
    %c0_5 = arith.constant 0 : index
    %4 = vector.load %arg3[%c0_4, %c0_5] : memref<4x1xf32, #tpu.memory_space<vmem>>, vector<4x1xf32>
    %5 = vector.broadcast %4 : vector<4x1xf32> to vector<4x256xf32>
    %6 = arith.mulf %3, %5 : vector<4x256xf32>
    %c0_6 = arith.constant 0 : index
    %c0_7 = arith.constant 0 : index
    %7 = vector.load %arg4[%c0_6, %c0_7] : memref<4x1xf32, #tpu.memory_space<vmem>>, vector<4x1xf32>
    %8 = vector.broadcast %7 : vector<4x1xf32> to vector<4x256xf32>
    %9 = arith.addf %6, %8 : vector<4x256xf32>
    %c0_8 = arith.constant 0 : index
    %c0_9 = arith.constant 0 : index
    %c0_10 = arith.constant 0 : index
    %10 = vector.load %arg6[%c0_8, %c0_9, %c0_10] : memref<1x4x256xf32, #tpu.memory_space<vmem>>, vector<1x4x256xf32>
    %11 = vector.shape_cast %10 : vector<1x4x256xf32> to vector<4x256xf32>
    %12 = arith.mulf %9, %11 : vector<4x256xf32>
    %c0_11 = arith.constant 0 : index
    %c0_12 = arith.constant 0 : index
    %c0_13 = arith.constant 0 : index
    %13 = vector.load %arg7[%c0_11, %c0_12, %c0_13] : memref<1x4x256xf32, #tpu.memory_space<vmem>>, vector<1x4x256xf32>
    %14 = vector.shape_cast %13 : vector<1x4x256xf32> to vector<4x256xf32>
    %15 = vector.shape_cast %12 : vector<4x256xf32> to vector<1x4x256xf32>
    tpu.vector_store %arg7[%c0_11, %c0_12, %c0_13], %15 {strides = array<i32>} : memref<1x4x256xf32, #tpu.memory_space<vmem>>, vector<1x4x256xf32>,
    return
  }
  func.func @transform_0(%arg0: i32, %arg1: i32) -> (i32, i32) {
    %c0_i32 = arith.constant 0 : i32
    %c0_i32_0 = arith.constant 0 : i32
    %c0_i32_1 = arith.constant 0 : i32
    return %c0_i32, %c0_i32_0 : i32, i32
  }
  func.func @transform_1(%arg0: i32, %arg1: i32) -> (i32, i32) {
    %c0_i32 = arith.constant 0 : i32
    %c0_i32_0 = arith.constant 0 : i32
    %c0_i32_1 = arith.constant 0 : i32
    return %c0_i32, %c0_i32_0 : i32, i32
  }
  func.func @transform_2(%arg0: i32, %arg1: i32) -> (i32, i32) {
    %c0_i32 = arith.constant 0 : i32
    %c0_i32_0 = arith.constant 0 : i32
    %c0_i32_1 = arith.constant 0 : i32
    return %c0_i32, %c0_i32_0 : i32, i32
  }
  func.func @transform_3(%arg0: i32, %arg1: i32) -> (i32, i32, i32) {
    %c0_i32 = arith.constant 0 : i32
    %c0_i32_0 = arith.constant 0 : i32
    return %arg0, %c0_i32, %arg1 : i32, i32, i32
  }
  func.func @transform_4(%arg0: i32, %arg1: i32) -> (i32, i32, i32) {
    %c0_i32 = arith.constant 0 : i32
    %c0_i32_0 = arith.constant 0 : i32
    return %arg0, %c0_i32, %arg1 : i32, i32, i32
  }
  func.func @transform_5(%arg0: i32, %arg1: i32) -> (i32, i32, i32) {
    %c0_i32 = arith.constant 0 : i32
    %c0_i32_0 = arith.constant 0 : i32
    return %arg0, %c0_i32, %arg1 : i32, i32, i32
  }
}

module attributes {stable_mosaic.version = 11 : i64} {
  func.func @kernel(%arg0: i32, %arg1: i32, %arg2: memref<4x36xf32, #tpu.memory_space<vmem>>, %arg3: memref<4x1xf32, #tpu.memory_space<vmem>>, %arg4: memref<4x1xf32, #tpu.memory_space<vmem>>, %arg5: memref<1x36x256xf32, #tpu.memory_space<vmem>>, %arg6: memref<1x4x256xf32, #tpu.memory_space<vmem>>) attributes {dimension_semantics = [#tpu.dimension_semantics<parallel>, #tpu.dimension_semantics<parallel>], iteration_bounds = array<i64: 2, 1>, scalar_prefetch = 0 : i64, scratch_operands = 0 : i64, tpu.core_type = #tpu.core_type<tc>, window_params = [{pipeline_mode = #tpu.pipeline_mode<synchronous>, transform_indices = @transform_0, window_bounds = array<i64: 4, 36>}, {pipeline_mode = #tpu.pipeline_mode<synchronous>, transform_indices = @transform_1, window_bounds = array<i64: 4, 1>}, {pipeline_mode = #tpu.pipeline_mode<synchronous>, transform_indices = @transform_2, window_bounds = array<i64: 4, 1>}, {transform_indices = @transform_3, window_bounds = array<i64: 1, 36, 256>}, {transform_indices = @transform_4, window_bounds = array<i64: 1, 4, 256>}]} {
    %c0 = arith.constant 0 : index
    %c0_0 = arith.constant 0 : index
    %0 = vector.load %arg2[%c0, %c0_0] : memref<4x36xf32, #tpu.memory_space<vmem>>, vector<4x36xf32>
    %c0_1 = arith.constant 0 : index
    %c0_2 = arith.constant 0 : index
    %c0_3 = arith.constant 0 : index
    %1 = vector.load %arg5[%c0_1, %c0_2, %c0_3] : memref<1x36x256xf32, #tpu.memory_space<vmem>>, vector<1x36x256xf32>
    %2 = vector.shape_cast %1 : vector<1x36x256xf32> to vector<36x256xf32>
    %cst = arith.constant dense<0.000000e+00> : vector<4x256xf32>
    %3 = tpu.matmul %0, %2, %cst {dimension_numbers = #tpu.dot_dimension_numbers<[1], [0], [0], [1], [0, 0, 1, 1], [], []>} : vector<4x36xf32>, vector<36x256xf32>, vector<4x256xf32> -> vector<4x256xf32>
    %c0_4 = arith.constant 0 : index
    %c0_5 = arith.constant 0 : index
    %4 = vector.load %arg3[%c0_4, %c0_5] : memref<4x1xf32, #tpu.memory_space<vmem>>, vector<4x1xf32>
    %5 = vector.broadcast %4 : vector<4x1xf32> to vector<4x256xf32>
    %6 = arith.mulf %3, %5 : vector<4x256xf32>
    %c0_6 = arith.constant 0 : index
    %c0_7 = arith.constant 0 : index
    %7 = vector.load %arg4[%c0_6, %c0_7] : memref<4x1xf32, #tpu.memory_space<vmem>>, vector<4x1xf32>
    %8 = vector.broadcast %7 : vector<4x1xf32> to vector<4x256xf32>
    %9 = arith.addf %6, %8 : vector<4x256xf32>
    %c0_8 = arith.constant 0 : index
    %c0_9 = arith.constant 0 : index
    %c0_10 = arith.constant 0 : index
    %10 = vector.load %arg6[%c0_8, %c0_9, %c0_10] : memref<1x4x256xf32, #tpu.memory_space<vmem>>, vector<1x4x256xf32>
    %11 = vector.shape_cast %10 : vector<1x4x256xf32> to vector<4x256xf32>
    %12 = vector.shape_cast %9 : vector<4x256xf32> to vector<1x4x256xf32>
    tpu.vector_store %arg6[%c0_8, %c0_9, %c0_10], %12 {strides = array<i32>} : memref<1x4x256xf32, #tpu.memory_space<vmem>>, vector<1x4x256xf32>,
    return
  }
  func.func @transform_0(%arg0: i32, %arg1: i32) -> (i32, i32) {
    %c0_i32 = arith.constant 0 : i32
    %c0_i32_0 = arith.constant 0 : i32
    %c0_i32_1 = arith.constant 0 : i32
    return %c0_i32, %c0_i32_0 : i32, i32
  }
  func.func @transform_1(%arg0: i32, %arg1: i32) -> (i32, i32) {
    %c0_i32 = arith.constant 0 : i32
    %c0_i32_0 = arith.constant 0 : i32
    %c0_i32_1 = arith.constant 0 : i32
    return %c0_i32, %c0_i32_0 : i32, i32
  }
  func.func @transform_2(%arg0: i32, %arg1: i32) -> (i32, i32) {
    %c0_i32 = arith.constant 0 : i32
    %c0_i32_0 = arith.constant 0 : i32
    %c0_i32_1 = arith.constant 0 : i32
    return %c0_i32, %c0_i32_0 : i32, i32
  }
  func.func @transform_3(%arg0: i32, %arg1: i32) -> (i32, i32, i32) {
    %c0_i32 = arith.constant 0 : i32
    %c0_i32_0 = arith.constant 0 : i32
    return %arg0, %c0_i32, %arg1 : i32, i32, i32
  }
  func.func @transform_4(%arg0: i32, %arg1: i32) -> (i32, i32, i32) {
    %c0_i32 = arith.constant 0 : i32
    %c0_i32_0 = arith.constant 0 : i32
    return %arg0, %c0_i32, %arg1 : i32, i32, i32
  }
}

module attributes {stable_mosaic.version = 11 : i64} {
  func.func @kernel(%arg0: i32, %arg1: i32, %arg2: memref<8x72xf32, #tpu.memory_space<vmem>>, %arg3: memref<8x1xf32, #tpu.memory_space<vmem>>, %arg4: memref<8x1xf32, #tpu.memory_space<vmem>>, %arg5: memref<1x72x256xf32, #tpu.memory_space<vmem>>, %arg6: memref<1x8x256xf32, #tpu.memory_space<vmem>>) attributes {dimension_semantics = [#tpu.dimension_semantics<parallel>, #tpu.dimension_semantics<parallel>], iteration_bounds = array<i64: 2, 1>, scalar_prefetch = 0 : i64, scratch_operands = 0 : i64, tpu.core_type = #tpu.core_type<tc>, window_params = [{pipeline_mode = #tpu.pipeline_mode<synchronous>, transform_indices = @transform_0, window_bounds = array<i64: 8, 72>}, {pipeline_mode = #tpu.pipeline_mode<synchronous>, transform_indices = @transform_1, window_bounds = array<i64: 8, 1>}, {pipeline_mode = #tpu.pipeline_mode<synchronous>, transform_indices = @transform_2, window_bounds = array<i64: 8, 1>}, {transform_indices = @transform_3, window_bounds = array<i64: 1, 72, 256>}, {transform_indices = @transform_4, window_bounds = array<i64: 1, 8, 256>}]} {
    %c0 = arith.constant 0 : index
    %c0_0 = arith.constant 0 : index
    %0 = vector.load %arg2[%c0, %c0_0] : memref<8x72xf32, #tpu.memory_space<vmem>>, vector<8x72xf32>
    %c0_1 = arith.constant 0 : index
    %c0_2 = arith.constant 0 : index
    %c0_3 = arith.constant 0 : index
    %1 = vector.load %arg5[%c0_1, %c0_2, %c0_3] : memref<1x72x256xf32, #tpu.memory_space<vmem>>, vector<1x72x256xf32>
    %2 = vector.shape_cast %1 : vector<1x72x256xf32> to vector<72x256xf32>
    %cst = arith.constant dense<0.000000e+00> : vector<8x256xf32>
    %3 = tpu.matmul %0, %2, %cst {dimension_numbers = #tpu.dot_dimension_numbers<[1], [0], [0], [1], [0, 0, 1, 1], [], []>} : vector<8x72xf32>, vector<72x256xf32>, vector<8x256xf32> -> vector<8x256xf32>
    %c0_4 = arith.constant 0 : index
    %c0_5 = arith.constant 0 : index
    %4 = vector.load %arg3[%c0_4, %c0_5] : memref<8x1xf32, #tpu.memory_space<vmem>>, vector<8x1xf32>
    %5 = vector.broadcast %4 : vector<8x1xf32> to vector<8x256xf32>
    %6 = arith.mulf %3, %5 : vector<8x256xf32>
    %c0_6 = arith.constant 0 : index
    %c0_7 = arith.constant 0 : index
    %7 = vector.load %arg4[%c0_6, %c0_7] : memref<8x1xf32, #tpu.memory_space<vmem>>, vector<8x1xf32>
    %8 = vector.broadcast %7 : vector<8x1xf32> to vector<8x256xf32>
    %9 = arith.addf %6, %8 : vector<8x256xf32>
    %c0_8 = arith.constant 0 : index
    %c0_9 = arith.constant 0 : index
    %c0_10 = arith.constant 0 : index
    %10 = vector.load %arg6[%c0_8, %c0_9, %c0_10] : memref<1x8x256xf32, #tpu.memory_space<vmem>>, vector<1x8x256xf32>
    %11 = vector.shape_cast %10 : vector<1x8x256xf32> to vector<8x256xf32>
    %12 = vector.shape_cast %9 : vector<8x256xf32> to vector<1x8x256xf32>
    tpu.vector_store %arg6[%c0_8, %c0_9, %c0_10], %12 {strides = array<i32>} : memref<1x8x256xf32, #tpu.memory_space<vmem>>, vector<1x8x256xf32>,
    return
  }
  func.func @transform_0(%arg0: i32, %arg1: i32) -> (i32, i32) {
    %c0_i32 = arith.constant 0 : i32
    %c0_i32_0 = arith.constant 0 : i32
    %c0_i32_1 = arith.constant 0 : i32
    return %c0_i32, %c0_i32_0 : i32, i32
  }
  func.func @transform_1(%arg0: i32, %arg1: i32) -> (i32, i32) {
    %c0_i32 = arith.constant 0 : i32
    %c0_i32_0 = arith.constant 0 : i32
    %c0_i32_1 = arith.constant 0 : i32
    return %c0_i32, %c0_i32_0 : i32, i32
  }
  func.func @transform_2(%arg0: i32, %arg1: i32) -> (i32, i32) {
    %c0_i32 = arith.constant 0 : i32
    %c0_i32_0 = arith.constant 0 : i32
    %c0_i32_1 = arith.constant 0 : i32
    return %c0_i32, %c0_i32_0 : i32, i32
  }
  func.func @transform_3(%arg0: i32, %arg1: i32) -> (i32, i32, i32) {
    %c0_i32 = arith.constant 0 : i32
    %c0_i32_0 = arith.constant 0 : i32
    return %arg0, %c0_i32, %arg1 : i32, i32, i32
  }
  func.func @transform_4(%arg0: i32, %arg1: i32) -> (i32, i32, i32) {
    %c0_i32 = arith.constant 0 : i32
    %c0_i32_0 = arith.constant 0 : i32
    return %arg0, %c0_i32, %arg1 : i32, i32, i32
  }
}

module attributes {stable_mosaic.version = 11 : i64} {
  func.func @_upsample_kernel(%arg0: i32, %arg1: memref<32x16xf32, #tpu.memory_space<vmem>>, %arg2: memref<16x32xf32, #tpu.memory_space<vmem>>, %arg3: memref<1x16x16xf32, #tpu.memory_space<vmem>>, %arg4: memref<1x32x32xf32, #tpu.memory_space<vmem>>) attributes {dimension_semantics = [#tpu.dimension_semantics<parallel>], iteration_bounds = array<i64: 16>, scalar_prefetch = 0 : i64, scratch_operands = 0 : i64, tpu.core_type = #tpu.core_type<tc>, window_params = [{pipeline_mode = #tpu.pipeline_mode<synchronous>, transform_indices = @transform_0, window_bounds = array<i64: 32, 16>}, {pipeline_mode = #tpu.pipeline_mode<synchronous>, transform_indices = @transform_1, window_bounds = array<i64: 16, 32>}, {transform_indices = @transform_2, window_bounds = array<i64: 1, 16, 16>}, {transform_indices = @transform_3, window_bounds = array<i64: 1, 32, 32>}]} {
    %c0 = arith.constant 0 : index
    %c0_0 = arith.constant 0 : index
    %c0_1 = arith.constant 0 : index
    %0 = vector.load %arg3[%c0, %c0_0, %c0_1] : memref<1x16x16xf32, #tpu.memory_space<vmem>>, vector<1x16x16xf32>
    %1 = vector.shape_cast %0 : vector<1x16x16xf32> to vector<16x16xf32>
    %c0_2 = arith.constant 0 : index
    %c0_3 = arith.constant 0 : index
    %2 = vector.load %arg1[%c0_2, %c0_3] : memref<32x16xf32, #tpu.memory_space<vmem>>, vector<32x16xf32>
    %cst = arith.constant dense<0.000000e+00> : vector<32x16xf32>
    %3 = tpu.matmul %2, %1, %cst {dimension_numbers = #tpu.dot_dimension_numbers<[1], [0], [0], [1], [0, 0, 1, 1], [], []>} : vector<32x16xf32>, vector<16x16xf32>, vector<32x16xf32> -> vector<32x16xf32>
    %c0_4 = arith.constant 0 : index
    %c0_5 = arith.constant 0 : index
    %4 = vector.load %arg2[%c0_4, %c0_5] : memref<16x32xf32, #tpu.memory_space<vmem>>, vector<16x32xf32>
    %cst_6 = arith.constant dense<0.000000e+00> : vector<32x32xf32>
    %5 = tpu.matmul %3, %4, %cst_6 {dimension_numbers = #tpu.dot_dimension_numbers<[1], [0], [0], [1], [0, 0, 1, 1], [], []>} : vector<32x16xf32>, vector<16x32xf32>, vector<32x32xf32> -> vector<32x32xf32>
    %c0_7 = arith.constant 0 : index
    %c0_8 = arith.constant 0 : index
    %c0_9 = arith.constant 0 : index
    %6 = vector.load %arg4[%c0_7, %c0_8, %c0_9] : memref<1x32x32xf32, #tpu.memory_space<vmem>>, vector<1x32x32xf32>
    %7 = vector.shape_cast %6 : vector<1x32x32xf32> to vector<32x32xf32>
    %8 = vector.shape_cast %5 : vector<32x32xf32> to vector<1x32x32xf32>
    tpu.vector_store %arg4[%c0_7, %c0_8, %c0_9], %8 {strides = array<i32>} : memref<1x32x32xf32, #tpu.memory_space<vmem>>, vector<1x32x32xf32>,
    return
  }
  func.func @transform_0(%arg0: i32) -> (i32, i32) {
    %c0_i32 = arith.constant 0 : i32
    %c0_i32_0 = arith.constant 0 : i32
    %c0_i32_1 = arith.constant 0 : i32
    return %c0_i32, %c0_i32_0 : i32, i32
  }
  func.func @transform_1(%arg0: i32) -> (i32, i32) {
    %c0_i32 = arith.constant 0 : i32
    %c0_i32_0 = arith.constant 0 : i32
    %c0_i32_1 = arith.constant 0 : i32
    return %c0_i32, %c0_i32_0 : i32, i32
  }
  func.func @transform_2(%arg0: i32) -> (i32, i32, i32) {
    %c0_i32 = arith.constant 0 : i32
    %c0_i32_0 = arith.constant 0 : i32
    %c0_i32_1 = arith.constant 0 : i32
    return %arg0, %c0_i32, %c0_i32_0 : i32, i32, i32
  }
  func.func @transform_3(%arg0: i32) -> (i32, i32, i32) {
    %c0_i32 = arith.constant 0 : i32
    %c0_i32_0 = arith.constant 0 : i32
    %c0_i32_1 = arith.constant 0 : i32
    return %arg0, %c0_i32, %c0_i32_0 : i32, i32, i32
  }
}

module attributes {stable_mosaic.version = 11 : i64} {
  func.func @kernel(%arg0: i32, %arg1: i32, %arg2: memref<8x72xf32, #tpu.memory_space<vmem>>, %arg3: memref<8x1xf32, #tpu.memory_space<vmem>>, %arg4: memref<8x1xf32, #tpu.memory_space<vmem>>, %arg5: memref<1x72x512xf32, #tpu.memory_space<vmem>>, %arg6: memref<1x8x512xf32, #tpu.memory_space<vmem>>) attributes {dimension_semantics = [#tpu.dimension_semantics<parallel>, #tpu.dimension_semantics<parallel>], iteration_bounds = array<i64: 2, 2>, scalar_prefetch = 0 : i64, scratch_operands = 0 : i64, tpu.core_type = #tpu.core_type<tc>, window_params = [{pipeline_mode = #tpu.pipeline_mode<synchronous>, transform_indices = @transform_0, window_bounds = array<i64: 8, 72>}, {pipeline_mode = #tpu.pipeline_mode<synchronous>, transform_indices = @transform_1, window_bounds = array<i64: 8, 1>}, {pipeline_mode = #tpu.pipeline_mode<synchronous>, transform_indices = @transform_2, window_bounds = array<i64: 8, 1>}, {transform_indices = @transform_3, window_bounds = array<i64: 1, 72, 512>}, {transform_indices = @transform_4, window_bounds = array<i64: 1, 8, 512>}]} {
    %c0 = arith.constant 0 : index
    %c0_0 = arith.constant 0 : index
    %0 = vector.load %arg2[%c0, %c0_0] : memref<8x72xf32, #tpu.memory_space<vmem>>, vector<8x72xf32>
    %c0_1 = arith.constant 0 : index
    %c0_2 = arith.constant 0 : index
    %c0_3 = arith.constant 0 : index
    %1 = vector.load %arg5[%c0_1, %c0_2, %c0_3] : memref<1x72x512xf32, #tpu.memory_space<vmem>>, vector<1x72x512xf32>
    %2 = vector.shape_cast %1 : vector<1x72x512xf32> to vector<72x512xf32>
    %cst = arith.constant dense<0.000000e+00> : vector<8x512xf32>
    %3 = tpu.matmul %0, %2, %cst {dimension_numbers = #tpu.dot_dimension_numbers<[1], [0], [0], [1], [0, 0, 1, 1], [], []>} : vector<8x72xf32>, vector<72x512xf32>, vector<8x512xf32> -> vector<8x512xf32>
    %c0_4 = arith.constant 0 : index
    %c0_5 = arith.constant 0 : index
    %4 = vector.load %arg3[%c0_4, %c0_5] : memref<8x1xf32, #tpu.memory_space<vmem>>, vector<8x1xf32>
    %5 = vector.broadcast %4 : vector<8x1xf32> to vector<8x512xf32>
    %6 = arith.mulf %3, %5 : vector<8x512xf32>
    %c0_6 = arith.constant 0 : index
    %c0_7 = arith.constant 0 : index
    %7 = vector.load %arg4[%c0_6, %c0_7] : memref<8x1xf32, #tpu.memory_space<vmem>>, vector<8x1xf32>
    %8 = vector.broadcast %7 : vector<8x1xf32> to vector<8x512xf32>
    %9 = arith.addf %6, %8 : vector<8x512xf32>
    %c0_8 = arith.constant 0 : index
    %c0_9 = arith.constant 0 : index
    %c0_10 = arith.constant 0 : index
    %10 = vector.load %arg6[%c0_8, %c0_9, %c0_10] : memref<1x8x512xf32, #tpu.memory_space<vmem>>, vector<1x8x512xf32>
    %11 = vector.shape_cast %10 : vector<1x8x512xf32> to vector<8x512xf32>
    %12 = vector.shape_cast %9 : vector<8x512xf32> to vector<1x8x512xf32>
    tpu.vector_store %arg6[%c0_8, %c0_9, %c0_10], %12 {strides = array<i32>} : memref<1x8x512xf32, #tpu.memory_space<vmem>>, vector<1x8x512xf32>,
    return
  }
  func.func @transform_0(%arg0: i32, %arg1: i32) -> (i32, i32) {
    %c0_i32 = arith.constant 0 : i32
    %c0_i32_0 = arith.constant 0 : i32
    %c0_i32_1 = arith.constant 0 : i32
    return %c0_i32, %c0_i32_0 : i32, i32
  }
  func.func @transform_1(%arg0: i32, %arg1: i32) -> (i32, i32) {
    %c0_i32 = arith.constant 0 : i32
    %c0_i32_0 = arith.constant 0 : i32
    %c0_i32_1 = arith.constant 0 : i32
    return %c0_i32, %c0_i32_0 : i32, i32
  }
  func.func @transform_2(%arg0: i32, %arg1: i32) -> (i32, i32) {
    %c0_i32 = arith.constant 0 : i32
    %c0_i32_0 = arith.constant 0 : i32
    %c0_i32_1 = arith.constant 0 : i32
    return %c0_i32, %c0_i32_0 : i32, i32
  }
  func.func @transform_3(%arg0: i32, %arg1: i32) -> (i32, i32, i32) {
    %c0_i32 = arith.constant 0 : i32
    %c0_i32_0 = arith.constant 0 : i32
    return %arg0, %c0_i32, %arg1 : i32, i32, i32
  }
  func.func @transform_4(%arg0: i32, %arg1: i32) -> (i32, i32, i32) {
    %c0_i32 = arith.constant 0 : i32
    %c0_i32_0 = arith.constant 0 : i32
    return %arg0, %c0_i32, %arg1 : i32, i32, i32
  }
}

module attributes {stable_mosaic.version = 11 : i64} {
  func.func @_upsample_kernel(%arg0: i32, %arg1: memref<32x16xf32, #tpu.memory_space<vmem>>, %arg2: memref<16x32xf32, #tpu.memory_space<vmem>>, %arg3: memref<1x16x16xf32, #tpu.memory_space<vmem>>, %arg4: memref<1x32x32xf32, #tpu.memory_space<vmem>>) attributes {dimension_semantics = [#tpu.dimension_semantics<parallel>], iteration_bounds = array<i64: 8>, scalar_prefetch = 0 : i64, scratch_operands = 0 : i64, tpu.core_type = #tpu.core_type<tc>, window_params = [{pipeline_mode = #tpu.pipeline_mode<synchronous>, transform_indices = @transform_0, window_bounds = array<i64: 32, 16>}, {pipeline_mode = #tpu.pipeline_mode<synchronous>, transform_indices = @transform_1, window_bounds = array<i64: 16, 32>}, {transform_indices = @transform_2, window_bounds = array<i64: 1, 16, 16>}, {transform_indices = @transform_3, window_bounds = array<i64: 1, 32, 32>}]} {
    %c0 = arith.constant 0 : index
    %c0_0 = arith.constant 0 : index
    %c0_1 = arith.constant 0 : index
    %0 = vector.load %arg3[%c0, %c0_0, %c0_1] : memref<1x16x16xf32, #tpu.memory_space<vmem>>, vector<1x16x16xf32>
    %1 = vector.shape_cast %0 : vector<1x16x16xf32> to vector<16x16xf32>
    %c0_2 = arith.constant 0 : index
    %c0_3 = arith.constant 0 : index
    %2 = vector.load %arg1[%c0_2, %c0_3] : memref<32x16xf32, #tpu.memory_space<vmem>>, vector<32x16xf32>
    %cst = arith.constant dense<0.000000e+00> : vector<32x16xf32>
    %3 = tpu.matmul %2, %1, %cst {dimension_numbers = #tpu.dot_dimension_numbers<[1], [0], [0], [1], [0, 0, 1, 1], [], []>} : vector<32x16xf32>, vector<16x16xf32>, vector<32x16xf32> -> vector<32x16xf32>
    %c0_4 = arith.constant 0 : index
    %c0_5 = arith.constant 0 : index
    %4 = vector.load %arg2[%c0_4, %c0_5] : memref<16x32xf32, #tpu.memory_space<vmem>>, vector<16x32xf32>
    %cst_6 = arith.constant dense<0.000000e+00> : vector<32x32xf32>
    %5 = tpu.matmul %3, %4, %cst_6 {dimension_numbers = #tpu.dot_dimension_numbers<[1], [0], [0], [1], [0, 0, 1, 1], [], []>} : vector<32x16xf32>, vector<16x32xf32>, vector<32x32xf32> -> vector<32x32xf32>
    %c0_7 = arith.constant 0 : index
    %c0_8 = arith.constant 0 : index
    %c0_9 = arith.constant 0 : index
    %6 = vector.load %arg4[%c0_7, %c0_8, %c0_9] : memref<1x32x32xf32, #tpu.memory_space<vmem>>, vector<1x32x32xf32>
    %7 = vector.shape_cast %6 : vector<1x32x32xf32> to vector<32x32xf32>
    %8 = vector.shape_cast %5 : vector<32x32xf32> to vector<1x32x32xf32>
    tpu.vector_store %arg4[%c0_7, %c0_8, %c0_9], %8 {strides = array<i32>} : memref<1x32x32xf32, #tpu.memory_space<vmem>>, vector<1x32x32xf32>,
    return
  }
  func.func @transform_0(%arg0: i32) -> (i32, i32) {
    %c0_i32 = arith.constant 0 : i32
    %c0_i32_0 = arith.constant 0 : i32
    %c0_i32_1 = arith.constant 0 : i32
    return %c0_i32, %c0_i32_0 : i32, i32
  }
  func.func @transform_1(%arg0: i32) -> (i32, i32) {
    %c0_i32 = arith.constant 0 : i32
    %c0_i32_0 = arith.constant 0 : i32
    %c0_i32_1 = arith.constant 0 : i32
    return %c0_i32, %c0_i32_0 : i32, i32
  }
  func.func @transform_2(%arg0: i32) -> (i32, i32, i32) {
    %c0_i32 = arith.constant 0 : i32
    %c0_i32_0 = arith.constant 0 : i32
    %c0_i32_1 = arith.constant 0 : i32
    return %arg0, %c0_i32, %c0_i32_0 : i32, i32, i32
  }
  func.func @transform_3(%arg0: i32) -> (i32, i32, i32) {
    %c0_i32 = arith.constant 0 : i32
    %c0_i32_0 = arith.constant 0 : i32
    %c0_i32_1 = arith.constant 0 : i32
    return %arg0, %c0_i32, %c0_i32_0 : i32, i32, i32
  }
}

module attributes {stable_mosaic.version = 11 : i64} {
  func.func @kernel(%arg0: i32, %arg1: i32, %arg2: memref<4x36xf32, #tpu.memory_space<vmem>>, %arg3: memref<4x1xf32, #tpu.memory_space<vmem>>, %arg4: memref<4x1xf32, #tpu.memory_space<vmem>>, %arg5: memref<1x36x512xf32, #tpu.memory_space<vmem>>, %arg6: memref<1x4x512xf32, #tpu.memory_space<vmem>>, %arg7: memref<1x4x512xf32, #tpu.memory_space<vmem>>, %arg8: memref<1x4x512xf32, #tpu.memory_space<vmem>>) attributes {dimension_semantics = [#tpu.dimension_semantics<parallel>, #tpu.dimension_semantics<parallel>], iteration_bounds = array<i64: 2, 2>, scalar_prefetch = 0 : i64, scratch_operands = 0 : i64, tpu.core_type = #tpu.core_type<tc>, window_params = [{pipeline_mode = #tpu.pipeline_mode<synchronous>, transform_indices = @transform_0, window_bounds = array<i64: 4, 36>}, {pipeline_mode = #tpu.pipeline_mode<synchronous>, transform_indices = @transform_1, window_bounds = array<i64: 4, 1>}, {pipeline_mode = #tpu.pipeline_mode<synchronous>, transform_indices = @transform_2, window_bounds = array<i64: 4, 1>}, {transform_indices = @transform_3, window_bounds = array<i64: 1, 36, 512>}, {transform_indices = @transform_4, window_bounds = array<i64: 1, 4, 512>}, {transform_indices = @transform_5, window_bounds = array<i64: 1, 4, 512>}, {transform_indices = @transform_6, window_bounds = array<i64: 1, 4, 512>}]} {
    %c0 = arith.constant 0 : index
    %c0_0 = arith.constant 0 : index
    %0 = vector.load %arg2[%c0, %c0_0] : memref<4x36xf32, #tpu.memory_space<vmem>>, vector<4x36xf32>
    %c0_1 = arith.constant 0 : index
    %c0_2 = arith.constant 0 : index
    %c0_3 = arith.constant 0 : index
    %1 = vector.load %arg5[%c0_1, %c0_2, %c0_3] : memref<1x36x512xf32, #tpu.memory_space<vmem>>, vector<1x36x512xf32>
    %2 = vector.shape_cast %1 : vector<1x36x512xf32> to vector<36x512xf32>
    %cst = arith.constant dense<0.000000e+00> : vector<4x512xf32>
    %3 = tpu.matmul %0, %2, %cst {dimension_numbers = #tpu.dot_dimension_numbers<[1], [0], [0], [1], [0, 0, 1, 1], [], []>} : vector<4x36xf32>, vector<36x512xf32>, vector<4x512xf32> -> vector<4x512xf32>
    %c0_4 = arith.constant 0 : index
    %c0_5 = arith.constant 0 : index
    %4 = vector.load %arg3[%c0_4, %c0_5] : memref<4x1xf32, #tpu.memory_space<vmem>>, vector<4x1xf32>
    %5 = vector.broadcast %4 : vector<4x1xf32> to vector<4x512xf32>
    %6 = arith.mulf %3, %5 : vector<4x512xf32>
    %c0_6 = arith.constant 0 : index
    %c0_7 = arith.constant 0 : index
    %7 = vector.load %arg4[%c0_6, %c0_7] : memref<4x1xf32, #tpu.memory_space<vmem>>, vector<4x1xf32>
    %8 = vector.broadcast %7 : vector<4x1xf32> to vector<4x512xf32>
    %9 = arith.addf %6, %8 : vector<4x512xf32>
    %c0_8 = arith.constant 0 : index
    %c0_9 = arith.constant 0 : index
    %c0_10 = arith.constant 0 : index
    %10 = vector.load %arg6[%c0_8, %c0_9, %c0_10] : memref<1x4x512xf32, #tpu.memory_space<vmem>>, vector<1x4x512xf32>
    %11 = vector.shape_cast %10 : vector<1x4x512xf32> to vector<4x512xf32>
    %12 = arith.mulf %9, %11 : vector<4x512xf32>
    %c0_11 = arith.constant 0 : index
    %c0_12 = arith.constant 0 : index
    %c0_13 = arith.constant 0 : index
    %13 = vector.load %arg7[%c0_11, %c0_12, %c0_13] : memref<1x4x512xf32, #tpu.memory_space<vmem>>, vector<1x4x512xf32>
    %14 = vector.shape_cast %13 : vector<1x4x512xf32> to vector<4x512xf32>
    %15 = arith.mulf %12, %14 : vector<4x512xf32>
    %c0_14 = arith.constant 0 : index
    %c0_15 = arith.constant 0 : index
    %c0_16 = arith.constant 0 : index
    %16 = vector.load %arg8[%c0_14, %c0_15, %c0_16] : memref<1x4x512xf32, #tpu.memory_space<vmem>>, vector<1x4x512xf32>
    %17 = vector.shape_cast %16 : vector<1x4x512xf32> to vector<4x512xf32>
    %18 = vector.shape_cast %15 : vector<4x512xf32> to vector<1x4x512xf32>
    tpu.vector_store %arg8[%c0_14, %c0_15, %c0_16], %18 {strides = array<i32>} : memref<1x4x512xf32, #tpu.memory_space<vmem>>, vector<1x4x512xf32>,
    return
  }
  func.func @transform_0(%arg0: i32, %arg1: i32) -> (i32, i32) {
    %c0_i32 = arith.constant 0 : i32
    %c0_i32_0 = arith.constant 0 : i32
    %c0_i32_1 = arith.constant 0 : i32
    return %c0_i32, %c0_i32_0 : i32, i32
  }
  func.func @transform_1(%arg0: i32, %arg1: i32) -> (i32, i32) {
    %c0_i32 = arith.constant 0 : i32
    %c0_i32_0 = arith.constant 0 : i32
    %c0_i32_1 = arith.constant 0 : i32
    return %c0_i32, %c0_i32_0 : i32, i32
  }
  func.func @transform_2(%arg0: i32, %arg1: i32) -> (i32, i32) {
    %c0_i32 = arith.constant 0 : i32
    %c0_i32_0 = arith.constant 0 : i32
    %c0_i32_1 = arith.constant 0 : i32
    return %c0_i32, %c0_i32_0 : i32, i32
  }
  func.func @transform_3(%arg0: i32, %arg1: i32) -> (i32, i32, i32) {
    %c0_i32 = arith.constant 0 : i32
    %c0_i32_0 = arith.constant 0 : i32
    return %arg0, %c0_i32, %arg1 : i32, i32, i32
  }
  func.func @transform_4(%arg0: i32, %arg1: i32) -> (i32, i32, i32) {
    %c0_i32 = arith.constant 0 : i32
    %c0_i32_0 = arith.constant 0 : i32
    return %arg0, %c0_i32, %arg1 : i32, i32, i32
  }
  func.func @transform_5(%arg0: i32, %arg1: i32) -> (i32, i32, i32) {
    %c0_i32 = arith.constant 0 : i32
    %c0_i32_0 = arith.constant 0 : i32
    return %arg0, %c0_i32, %arg1 : i32, i32, i32
  }
  func.func @transform_6(%arg0: i32, %arg1: i32) -> (i32, i32, i32) {
    %c0_i32 = arith.constant 0 : i32
    %c0_i32_0 = arith.constant 0 : i32
    return %arg0, %c0_i32, %arg1 : i32, i32, i32
  }
}

module attributes {stable_mosaic.version = 11 : i64} {
  func.func @kernel(%arg0: i32, %arg1: i32, %arg2: memref<4x36xf32, #tpu.memory_space<vmem>>, %arg3: memref<4x1xf32, #tpu.memory_space<vmem>>, %arg4: memref<4x1xf32, #tpu.memory_space<vmem>>, %arg5: memref<1x36x512xf32, #tpu.memory_space<vmem>>, %arg6: memref<1x4x512xf32, #tpu.memory_space<vmem>>) attributes {dimension_semantics = [#tpu.dimension_semantics<parallel>, #tpu.dimension_semantics<parallel>], iteration_bounds = array<i64: 2, 2>, scalar_prefetch = 0 : i64, scratch_operands = 0 : i64, tpu.core_type = #tpu.core_type<tc>, window_params = [{pipeline_mode = #tpu.pipeline_mode<synchronous>, transform_indices = @transform_0, window_bounds = array<i64: 4, 36>}, {pipeline_mode = #tpu.pipeline_mode<synchronous>, transform_indices = @transform_1, window_bounds = array<i64: 4, 1>}, {pipeline_mode = #tpu.pipeline_mode<synchronous>, transform_indices = @transform_2, window_bounds = array<i64: 4, 1>}, {transform_indices = @transform_3, window_bounds = array<i64: 1, 36, 512>}, {transform_indices = @transform_4, window_bounds = array<i64: 1, 4, 512>}]} {
    %c0 = arith.constant 0 : index
    %c0_0 = arith.constant 0 : index
    %0 = vector.load %arg2[%c0, %c0_0] : memref<4x36xf32, #tpu.memory_space<vmem>>, vector<4x36xf32>
    %c0_1 = arith.constant 0 : index
    %c0_2 = arith.constant 0 : index
    %c0_3 = arith.constant 0 : index
    %1 = vector.load %arg5[%c0_1, %c0_2, %c0_3] : memref<1x36x512xf32, #tpu.memory_space<vmem>>, vector<1x36x512xf32>
    %2 = vector.shape_cast %1 : vector<1x36x512xf32> to vector<36x512xf32>
    %cst = arith.constant dense<0.000000e+00> : vector<4x512xf32>
    %3 = tpu.matmul %0, %2, %cst {dimension_numbers = #tpu.dot_dimension_numbers<[1], [0], [0], [1], [0, 0, 1, 1], [], []>} : vector<4x36xf32>, vector<36x512xf32>, vector<4x512xf32> -> vector<4x512xf32>
    %c0_4 = arith.constant 0 : index
    %c0_5 = arith.constant 0 : index
    %4 = vector.load %arg3[%c0_4, %c0_5] : memref<4x1xf32, #tpu.memory_space<vmem>>, vector<4x1xf32>
    %5 = vector.broadcast %4 : vector<4x1xf32> to vector<4x512xf32>
    %6 = arith.mulf %3, %5 : vector<4x512xf32>
    %c0_6 = arith.constant 0 : index
    %c0_7 = arith.constant 0 : index
    %7 = vector.load %arg4[%c0_6, %c0_7] : memref<4x1xf32, #tpu.memory_space<vmem>>, vector<4x1xf32>
    %8 = vector.broadcast %7 : vector<4x1xf32> to vector<4x512xf32>
    %9 = arith.addf %6, %8 : vector<4x512xf32>
    %c0_8 = arith.constant 0 : index
    %c0_9 = arith.constant 0 : index
    %c0_10 = arith.constant 0 : index
    %10 = vector.load %arg6[%c0_8, %c0_9, %c0_10] : memref<1x4x512xf32, #tpu.memory_space<vmem>>, vector<1x4x512xf32>
    %11 = vector.shape_cast %10 : vector<1x4x512xf32> to vector<4x512xf32>
    %12 = vector.shape_cast %9 : vector<4x512xf32> to vector<1x4x512xf32>
    tpu.vector_store %arg6[%c0_8, %c0_9, %c0_10], %12 {strides = array<i32>} : memref<1x4x512xf32, #tpu.memory_space<vmem>>, vector<1x4x512xf32>,
    return
  }
  func.func @transform_0(%arg0: i32, %arg1: i32) -> (i32, i32) {
    %c0_i32 = arith.constant 0 : i32
    %c0_i32_0 = arith.constant 0 : i32
    %c0_i32_1 = arith.constant 0 : i32
    return %c0_i32, %c0_i32_0 : i32, i32
  }
  func.func @transform_1(%arg0: i32, %arg1: i32) -> (i32, i32) {
    %c0_i32 = arith.constant 0 : i32
    %c0_i32_0 = arith.constant 0 : i32
    %c0_i32_1 = arith.constant 0 : i32
    return %c0_i32, %c0_i32_0 : i32, i32
  }
  func.func @transform_2(%arg0: i32, %arg1: i32) -> (i32, i32) {
    %c0_i32 = arith.constant 0 : i32
    %c0_i32_0 = arith.constant 0 : i32
    %c0_i32_1 = arith.constant 0 : i32
    return %c0_i32, %c0_i32_0 : i32, i32
  }
  func.func @transform_3(%arg0: i32, %arg1: i32) -> (i32, i32, i32) {
    %c0_i32 = arith.constant 0 : i32
    %c0_i32_0 = arith.constant 0 : i32
    return %arg0, %c0_i32, %arg1 : i32, i32, i32
  }
  func.func @transform_4(%arg0: i32, %arg1: i32) -> (i32, i32, i32) {
    %c0_i32 = arith.constant 0 : i32
    %c0_i32_0 = arith.constant 0 : i32
    return %arg0, %c0_i32, %arg1 : i32, i32, i32
  }
}

module attributes {stable_mosaic.version = 11 : i64} {
  func.func @kernel(%arg0: i32, %arg1: i32, %arg2: memref<12x108xf32, #tpu.memory_space<vmem>>, %arg3: memref<12x1xf32, #tpu.memory_space<vmem>>, %arg4: memref<12x1xf32, #tpu.memory_space<vmem>>, %arg5: memref<1x108x512xf32, #tpu.memory_space<vmem>>, %arg6: memref<1x12x512xf32, #tpu.memory_space<vmem>>) attributes {dimension_semantics = [#tpu.dimension_semantics<parallel>, #tpu.dimension_semantics<parallel>], iteration_bounds = array<i64: 2, 2>, scalar_prefetch = 0 : i64, scratch_operands = 0 : i64, tpu.core_type = #tpu.core_type<tc>, window_params = [{pipeline_mode = #tpu.pipeline_mode<synchronous>, transform_indices = @transform_0, window_bounds = array<i64: 12, 108>}, {pipeline_mode = #tpu.pipeline_mode<synchronous>, transform_indices = @transform_1, window_bounds = array<i64: 12, 1>}, {pipeline_mode = #tpu.pipeline_mode<synchronous>, transform_indices = @transform_2, window_bounds = array<i64: 12, 1>}, {transform_indices = @transform_3, window_bounds = array<i64: 1, 108, 512>}, {transform_indices = @transform_4, window_bounds = array<i64: 1, 12, 512>}]} {
    %c0 = arith.constant 0 : index
    %c0_0 = arith.constant 0 : index
    %0 = vector.load %arg2[%c0, %c0_0] : memref<12x108xf32, #tpu.memory_space<vmem>>, vector<12x108xf32>
    %c0_1 = arith.constant 0 : index
    %c0_2 = arith.constant 0 : index
    %c0_3 = arith.constant 0 : index
    %1 = vector.load %arg5[%c0_1, %c0_2, %c0_3] : memref<1x108x512xf32, #tpu.memory_space<vmem>>, vector<1x108x512xf32>
    %2 = vector.shape_cast %1 : vector<1x108x512xf32> to vector<108x512xf32>
    %cst = arith.constant dense<0.000000e+00> : vector<12x512xf32>
    %3 = tpu.matmul %0, %2, %cst {dimension_numbers = #tpu.dot_dimension_numbers<[1], [0], [0], [1], [0, 0, 1, 1], [], []>} : vector<12x108xf32>, vector<108x512xf32>, vector<12x512xf32> -> vector<12x512xf32>
    %c0_4 = arith.constant 0 : index
    %c0_5 = arith.constant 0 : index
    %4 = vector.load %arg3[%c0_4, %c0_5] : memref<12x1xf32, #tpu.memory_space<vmem>>, vector<12x1xf32>
    %5 = vector.broadcast %4 : vector<12x1xf32> to vector<12x512xf32>
    %6 = arith.mulf %3, %5 : vector<12x512xf32>
    %c0_6 = arith.constant 0 : index
    %c0_7 = arith.constant 0 : index
    %7 = vector.load %arg4[%c0_6, %c0_7] : memref<12x1xf32, #tpu.memory_space<vmem>>, vector<12x1xf32>
    %8 = vector.broadcast %7 : vector<12x1xf32> to vector<12x512xf32>
    %9 = arith.addf %6, %8 : vector<12x512xf32>
    %c0_8 = arith.constant 0 : index
    %c0_9 = arith.constant 0 : index
    %c0_10 = arith.constant 0 : index
    %10 = vector.load %arg6[%c0_8, %c0_9, %c0_10] : memref<1x12x512xf32, #tpu.memory_space<vmem>>, vector<1x12x512xf32>
    %11 = vector.shape_cast %10 : vector<1x12x512xf32> to vector<12x512xf32>
    %12 = vector.shape_cast %9 : vector<12x512xf32> to vector<1x12x512xf32>
    tpu.vector_store %arg6[%c0_8, %c0_9, %c0_10], %12 {strides = array<i32>} : memref<1x12x512xf32, #tpu.memory_space<vmem>>, vector<1x12x512xf32>,
    return
  }
  func.func @transform_0(%arg0: i32, %arg1: i32) -> (i32, i32) {
    %c0_i32 = arith.constant 0 : i32
    %c0_i32_0 = arith.constant 0 : i32
    %c0_i32_1 = arith.constant 0 : i32
    return %c0_i32, %c0_i32_0 : i32, i32
  }
  func.func @transform_1(%arg0: i32, %arg1: i32) -> (i32, i32) {
    %c0_i32 = arith.constant 0 : i32
    %c0_i32_0 = arith.constant 0 : i32
    %c0_i32_1 = arith.constant 0 : i32
    return %c0_i32, %c0_i32_0 : i32, i32
  }
  func.func @transform_2(%arg0: i32, %arg1: i32) -> (i32, i32) {
    %c0_i32 = arith.constant 0 : i32
    %c0_i32_0 = arith.constant 0 : i32
    %c0_i32_1 = arith.constant 0 : i32
    return %c0_i32, %c0_i32_0 : i32, i32
  }
  func.func @transform_3(%arg0: i32, %arg1: i32) -> (i32, i32, i32) {
    %c0_i32 = arith.constant 0 : i32
    %c0_i32_0 = arith.constant 0 : i32
    return %arg0, %c0_i32, %arg1 : i32, i32, i32
  }
  func.func @transform_4(%arg0: i32, %arg1: i32) -> (i32, i32, i32) {
    %c0_i32 = arith.constant 0 : i32
    %c0_i32_0 = arith.constant 0 : i32
    return %arg0, %c0_i32, %arg1 : i32, i32, i32
  }
}

module attributes {stable_mosaic.version = 11 : i64} {
  func.func @kernel(%arg0: i32, %arg1: i32, %arg2: memref<1x12xf32, #tpu.memory_space<vmem>>, %arg3: memref<1x1xf32, #tpu.memory_space<vmem>>, %arg4: memref<1x1xf32, #tpu.memory_space<vmem>>, %arg5: memref<1x12x512xf32, #tpu.memory_space<vmem>>, %arg6: memref<1x1x512xf32, #tpu.memory_space<vmem>>) attributes {dimension_semantics = [#tpu.dimension_semantics<parallel>, #tpu.dimension_semantics<parallel>], iteration_bounds = array<i64: 2, 2>, scalar_prefetch = 0 : i64, scratch_operands = 0 : i64, tpu.core_type = #tpu.core_type<tc>, window_params = [{pipeline_mode = #tpu.pipeline_mode<synchronous>, transform_indices = @transform_0, window_bounds = array<i64: 1, 12>}, {pipeline_mode = #tpu.pipeline_mode<synchronous>, transform_indices = @transform_1, window_bounds = array<i64: 1, 1>}, {pipeline_mode = #tpu.pipeline_mode<synchronous>, transform_indices = @transform_2, window_bounds = array<i64: 1, 1>}, {transform_indices = @transform_3, window_bounds = array<i64: 1, 12, 512>}, {transform_indices = @transform_4, window_bounds = array<i64: 1, 1, 512>}]} {
    %c0 = arith.constant 0 : index
    %c0_0 = arith.constant 0 : index
    %0 = vector.load %arg2[%c0, %c0_0] : memref<1x12xf32, #tpu.memory_space<vmem>>, vector<1x12xf32>
    %c0_1 = arith.constant 0 : index
    %c0_2 = arith.constant 0 : index
    %c0_3 = arith.constant 0 : index
    %1 = vector.load %arg5[%c0_1, %c0_2, %c0_3] : memref<1x12x512xf32, #tpu.memory_space<vmem>>, vector<1x12x512xf32>
    %2 = vector.shape_cast %1 : vector<1x12x512xf32> to vector<12x512xf32>
    %cst = arith.constant dense<0.000000e+00> : vector<1x512xf32>
    %3 = tpu.matmul %0, %2, %cst {dimension_numbers = #tpu.dot_dimension_numbers<[1], [0], [0], [1], [0, 0, 1, 1], [], []>} : vector<1x12xf32>, vector<12x512xf32>, vector<1x512xf32> -> vector<1x512xf32>
    %c0_4 = arith.constant 0 : index
    %c0_5 = arith.constant 0 : index
    %4 = vector.load %arg3[%c0_4, %c0_5] : memref<1x1xf32, #tpu.memory_space<vmem>>, vector<1x1xf32>
    %5 = vector.broadcast %4 : vector<1x1xf32> to vector<1x512xf32>
    %6 = arith.mulf %3, %5 : vector<1x512xf32>
    %c0_6 = arith.constant 0 : index
    %c0_7 = arith.constant 0 : index
    %7 = vector.load %arg4[%c0_6, %c0_7] : memref<1x1xf32, #tpu.memory_space<vmem>>, vector<1x1xf32>
    %8 = vector.broadcast %7 : vector<1x1xf32> to vector<1x512xf32>
    %9 = arith.addf %6, %8 : vector<1x512xf32>
    %c0_8 = arith.constant 0 : index
    %c0_9 = arith.constant 0 : index
    %c0_10 = arith.constant 0 : index
    %10 = vector.load %arg6[%c0_8, %c0_9, %c0_10] : memref<1x1x512xf32, #tpu.memory_space<vmem>>, vector<1x1x512xf32>
    %11 = vector.shape_cast %10 : vector<1x1x512xf32> to vector<1x512xf32>
    %12 = vector.shape_cast %9 : vector<1x512xf32> to vector<1x1x512xf32>
    tpu.vector_store %arg6[%c0_8, %c0_9, %c0_10], %12 {strides = array<i32>} : memref<1x1x512xf32, #tpu.memory_space<vmem>>, vector<1x1x512xf32>,
    return
  }
  func.func @transform_0(%arg0: i32, %arg1: i32) -> (i32, i32) {
    %c0_i32 = arith.constant 0 : i32
    %c0_i32_0 = arith.constant 0 : i32
    %c0_i32_1 = arith.constant 0 : i32
    return %c0_i32, %c0_i32_0 : i32, i32
  }
  func.func @transform_1(%arg0: i32, %arg1: i32) -> (i32, i32) {
    %c0_i32 = arith.constant 0 : i32
    %c0_i32_0 = arith.constant 0 : i32
    %c0_i32_1 = arith.constant 0 : i32
    return %c0_i32, %c0_i32_0 : i32, i32
  }
  func.func @transform_2(%arg0: i32, %arg1: i32) -> (i32, i32) {
    %c0_i32 = arith.constant 0 : i32
    %c0_i32_0 = arith.constant 0 : i32
    %c0_i32_1 = arith.constant 0 : i32
    return %c0_i32, %c0_i32_0 : i32, i32
  }
  func.func @transform_3(%arg0: i32, %arg1: i32) -> (i32, i32, i32) {
    %c0_i32 = arith.constant 0 : i32
    %c0_i32_0 = arith.constant 0 : i32
    return %arg0, %c0_i32, %arg1 : i32, i32, i32
  }
  func.func @transform_4(%arg0: i32, %arg1: i32) -> (i32, i32, i32) {
    %c0_i32 = arith.constant 0 : i32
    %c0_i32_0 = arith.constant 0 : i32
    return %arg0, %c0_i32, %arg1 : i32, i32, i32
  }
}

</mosaic_0001>

<bundles_post_ra>
// kernel: aggregation_forward.13
= control target key start
LH: loop header
LB: loop body
LE: loop exit
PB: predicated region body
PF: predicated region fallthrough
CT: control target
= control target key end

     0   :  { %s460_s12 = smov 0   ;;  %s490_s0 = inlined_call_operand.vmem [shape: f32[16,8], index: 0, kind: input, shape index: {}]   ;;  %s491_s1 = inlined_call_operand.vmem [shape: f32[8,16], index: 1, kind: input, shape index: {}]   ;;  %s492_s2 = inlined_call_operand.vmem [shape: f32[8,8,8], index: 2, kind: input, shape index: {}]   ;;  %s493_s3 = inlined_call_operand.vmem [shape: f32[8,16,16], index: 3, kind: output, shape index: {}]  }
   0x1 LB: > { %s393_s13 = sadd.s32 4294967295, %s438_s12   ;;  %p397_p0 = scmp.ge.s32.totalorder %s438_s12, 1  ;;  %s438_s12 = sphi %s460_s12, %s13_s12  }
   0x2   : > { %p136_p1 = scmp.lt.s32.totalorder %s438_s12, 9 }
   0x4   : > { %p137_p2 = pnand %p397_p0, %p136_p1 }
   0x5   : > { %p159_p3 = scmp.lt.s32.totalorder (!%p137_p2), %s393_s13, 7  ;;  %v169_v0 = vld [vmem:[%s490_s0] sm:$0xff] (!%p137_p2)  ;;  %vm171_vm0 = vcmask (!%p137_p2), 64512   ;;  %v170_v2 = vld [vmem:[%s490_s0 + $0x8] sm:$0xff] (!%p137_p2)  ;;  %vm335_vm1 = vcmask (!%p137_p2), 130048  }
   0x6   : > { %140 = sbr.rel (%p137_p2) target bundleno = 447 (0x1bf), region = 32  ;;  %416 = vmatprep.mubr.msk.f32.mxu0 (!%p137_p2), %vm171_vm0, %v169_v0  ;;  %v253_v3 = vld [vmem:[%s491_s1] sm:$0xff] (!%p137_p2) }
   0x7   : > { %419 = vmatprep.subr.mxu1 (!%p137_p2), %v253_v3 }
   0x8   : > { %420 = vmatpush3.msra.mxu1 (!%p137_p2), %v253_v3 }
   0xd   : > { %s495_s13 = smov (!%p159_p3, %s393_s13), 7 }
   0xe   : > { %s398_s16 = sshll.u32 %s495_s13, 3  ;;  %s407_s24 = sshll.u32 %s495_s13, 4 }
   0xf   : > { %s162_s19 = scalar_lea.vmem %s492_s2, %s398_s16  ;;  %s167_s27 = scalar_lea.vmem %s493_s3, %s407_s24 }
  0x10   : > { %v168_v1 = vld [vmem:[%s162_s19] sm:$0xff] }
  0x11   : > { %414 = vmatprep.subr.mxu0 %v168_v1 }
  0x12   : > { %415 = vmatpush3.msra.mxu0 %v168_v1 }
  0x13   : > { %417 = vmatmul.mubr.msk.f32.vlgmr.msra.gmra.mrb[0].mxu0 %vm171_vm0, %v170_v2 }
  0xe6   : > { %v418_v4 = vpop.f32.mrb[0].mxu0 }
  0xe7   : > { %v244_v5 = vpop.f32.mrb[1].mxu0 }
  0xe8   : > { %421 = vmatprep.mubr.msk.f32.mxu1 %vm171_vm0, %v244_v5 }
  0xe9   : > { %422 = vmatmul.mubr.msk.f32.vlgmr.msra.gmra.mrb[0].mxu1 %vm171_vm0, %v418_v4 }
 0x1bc   : > { %v423_v6 = vpop.f32.mrb[0].mxu1 }
 0x1bd   : > { %337 = vst.msk [vmem:[%s167_s27 + $0x8] sm:$0xff] %vm335_vm1, %v423_v6  ;;  %v326_v7 = vpop.f32.mrb[1].mxu1 }
 0x1be   : > { %336 = vst.msk [vmem:[%s167_s27] sm:$0xff] %vm335_vm1, %v326_v7 }
 0x1bf PF: > { %s13_s12 = sadd.s32 1, %s438_s12  }
 0x1c0   : > { %p10_p4 = scmp.ge.s32.totalorder %s13_s12, 10  }
 0x1c2   :  { %12 = sbr.rel (!%p10_p4) target bundleno = 1 (0x1), region = 62 }

// kernel: aggregation_forward.14
= control target key start
LH: loop header
LB: loop body
LE: loop exit
PB: predicated region body
PF: predicated region fallthrough
CT: control target
= control target key end

     0   :  { %s635_s18 = smov 0   ;;  %s637_s19 = smov 0   ;;  %s684_s0 = inlined_call_operand.vmem [shape: f32[4,36], index: 0, kind: input, shape index: {}]   ;;  %s685_s1 = inlined_call_operand.vmem [shape: f32[4,1], index: 1, kind: input, shape index: {}]   ;;  %s686_s2 = inlined_call_operand.vmem [shape: f32[4,1], index: 2, kind: input, shape index: {}]   ;;  %s687_s3 = inlined_call_operand.vmem [shape: f32[2,36,256], index: 3, kind: input, shape index: {}]   ;;  %s688_s4 = inlined_call_operand.vmem [shape: f32[2,4,256], index: 4, kind: input, shape index: {}]   ;;  %s689_s5 = inlined_call_operand.vmem [shape: f32[2,4,256], index: 5, kind: output, shape index: {}]  }
   0x1   :  { %s639_s20 = smov 0  }
   0x2 LB: > { %s27_s21 = sadd.s32 1, %s597_s19  ;;  %p529_p0 = scmp.ge.s32.totalorder %s601_s20, 1  ;;  %s601_s20 = sphi %s639_s20, %s15_s20   ;;  %s597_s19 = sphi %s637_s19, %s691_s19   ;;  %s593_s18 = sphi %s635_s18, %s690_s18  }
   0x3   : > { %p29_p1 = scmp.ge.s32.totalorder %s27_s21, 2  ;;  %p225_p2 = scmp.lt.s32.totalorder %s601_s20, 3 }
   0x5   : > { %s693_s21 = smov (%p29_p1, %s27_s21), 0  ;;  %p226_p3 = pnand %p529_p0, %p225_p2 }
   0x6   : > { %p271_p4 = scmp.lt.s32.totalorder (!%p226_p3), %s593_s18, 1  ;;  %v603_v0 = vmov (!%p226_p3), 0.0   ;;  %v393_v1 = vld [vmem:[%s685_s1] sm:$0xf] (!%p226_p3)  ;;  %v604_v2 = vmov (!%p226_p3), 0   ;;  %vm315_vm0 = vcmask (!%p226_p3), 1043456  }
   0x7   : > { %229 = sbr.rel (%p226_p3) target bundleno = 253 (0xfd), region = 40  ;;  %386 = vmatprep.mubr.f32.mxu0 (!%p226_p3), %v603_v0  ;;  %577 = vset.pattern.permute.xlu0 (!%p226_p3), %v604_v2  ;;  %v401_v3 = vld [vmem:[%s686_s2] sm:$0xf] (!%p226_p3)  ;;  %vm311_vm1 = vcmask (!%p226_p3), 293888  }
   0x8   : > { %396 = vperm.xlu0 (!%p226_p3), %577, %v393_v1   ;;  %v300_v18 = vld [vmem:[%s684_s0] sm:$0xf] (!%p226_p3) }
   0xc   : > { %404 = vperm.xlu0 (!%p226_p3), %577, %v401_v3  }
   0xe   : > { %s695_s18 = smov (!%p271_p4, %s593_s18), 1 }
   0xf   : > { %s550_s24 = smul.u32 80, %s695_s18  ;;  %s540_s7 = sshll.u32 %s695_s18, 3 }
  0x10   : > { %s288_s10 = scalar_lea.vmem %s688_s4, %s540_s7  ;;  %s298_s13 = scalar_lea.vmem %s689_s5, %s540_s7 }
  0x11   : > { %s278_s29 = scalar_lea.vmem %s687_s3, %s550_s24  ;;  %v409_v20 = vld [vmem:[%s288_s10] sm:$0xff] }
  0x12   : > { %v302_v4 = vld [vmem:[%s278_s29 + $0x8] sm:$0xff]  ;;  %v304_v5 = vld [vmem:[%s278_s29 + $0x18] sm:$0xff]  ;;  %v301_v6 = vld [vmem:[%s278_s29] sm:$0xff]  ;;  %v411_v26 = vcombine.high %v409_v20, %v409_v20 }
  0x13   : > { %v542_v7 = vpack.c.bf16 %v304_v5, %v302_v4  ;;  %v303_v8 = vld [vmem:[%s278_s29 + $0x10] sm:$0xff]  ;;  %v306_v9 = vld [vmem:[%s278_s29 + $0x28] sm:$0xff]  ;;  %v308_v10 = vld [vmem:[%s278_s29 + $0x38] sm:$0xff] }
  0x14   : > { %v544_v11 = vpack.c.bf16 %v303_v8, %v301_v6  ;;  %v546_v12 = vpack.c.bf16 %v308_v10, %v306_v9  ;;  %v305_v13 = vld [vmem:[%s278_s29 + $0x20] sm:$0xff]  ;;  %v307_v14 = vld [vmem:[%s278_s29 + $0x30] sm:$0xff]  ;;  %v310_v16 = vld [vmem:[%s278_s29 + $0x48] sm:$0xf] }
  0x15   : > { %543 = vmatprep.subr.bf16.mxu0 %v542_v7  ;;  %v548_v15 = vpack.c.bf16 %v307_v14, %v305_v13  ;;  %v309_v17 = vld [vmem:[%s278_s29 + $0x40] sm:$0xf] }
  0x16   : > { %545 = vmatpush1.bf16.msra.mxu0 %v544_v11 }
  0x17   : > { %547 = vmatprep.subr.bf16.mxu0 %v546_v12 }
  0x1a   : > { %549 = vmatpush1.bf16.msra.mxu0 %v548_v15 }
  0x1b   : > { %535 = vmatprep.subr.msk.mxu0 %vm315_vm0, %v310_v16 }
  0x1e   : > { %536 = vmatpush1.msk.msra.mxu0 %vm315_vm0, %v309_v17 }
  0x1f   : > { %537 = vmatmul.mubr.msk.f32.vlgmr.msra.gmra.mrb[0].mxu0 %vm311_vm1, %v300_v18 }
  0x87   : > { %v397_v19 = vpop.permute.xlu0 %396 }
  0x8b   : > { %v405_v24 = vpop.permute.xlu0 %404 }
  0xf2   : > { %v388_v21 = vpop.f32.mrb[0].mxu0 }
  0xf3   : > { %v399_v22 = vmul.f32 %v397_v19, %v388_v21  ;;  %v390_v23 = vpop.f32.mrb[1].mxu0 }
  0xf4   : > { %v400_v25 = vmul.f32 %v397_v19, %v390_v23 }
  0xf5   : > { %v407_v27 = vadd.f32 %v405_v24, %v399_v22 }
  0xf6   : > { %v408_v28 = vadd.f32 %v405_v24, %v400_v25 }
  0xf7   : > { %v413_v29 = vmul.f32 %v409_v20, %v407_v27 }
  0xf8   : > { %v414_v30 = vmul.f32 %v411_v26, %v408_v28 }
  0xfa   : > { %v417_v31 = vcombine.low %v413_v29, %v414_v30 }
  0xfc   : > { %419 = vst [vmem:[%s298_s13] sm:$0xff] %v417_v31 }
  0xfd PF: > { %s15_s20 = sadd.s32 1, %s601_s20   ;;  %s690_s18 = smov %s597_s19 }
  0xfe   : > { %p12_p5 = scmp.ge.s32.totalorder %s15_s20, 4   ;;  %s691_s19 = smov %s693_s21 }
 0x100   :  { %14 = sbr.rel (!%p12_p5) target bundleno = 2 (0x2), region = 73 }

// kernel: aggregation_forward.19
= control target key start
LH: loop header
LB: loop body
LE: loop exit
PB: predicated region body
PF: predicated region fallthrough
CT: control target
= control target key end

     0   :  { %s539_s15 = smov 0   ;;  %s541_s16 = smov 0   ;;  %s585_s0 = inlined_call_operand.vmem [shape: f32[4,36], index: 0, kind: input, shape index: {}]   ;;  %s586_s1 = inlined_call_operand.vmem [shape: f32[4,1], index: 1, kind: input, shape index: {}]   ;;  %s587_s2 = inlined_call_operand.vmem [shape: f32[4,1], index: 2, kind: input, shape index: {}]   ;;  %s588_s3 = inlined_call_operand.vmem [shape: f32[2,36,256], index: 3, kind: input, shape index: {}]   ;;  %s589_s4 = inlined_call_operand.vmem [shape: f32[2,4,256], index: 4, kind: output, shape index: {}]  }
   0x1   :  { %s543_s17 = smov 0  }
   0x2 LB: > { %s26_s18 = sadd.s32 1, %s506_s16  ;;  %p442_p0 = scmp.ge.s32.totalorder %s510_s17, 1  ;;  %s510_s17 = sphi %s543_s17, %s14_s17   ;;  %s506_s16 = sphi %s541_s16, %s591_s16   ;;  %s502_s15 = sphi %s539_s15, %s590_s15  }
   0x3   : > { %p28_p1 = scmp.ge.s32.totalorder %s26_s18, 2  ;;  %p183_p2 = scmp.lt.s32.totalorder %s510_s17, 3 }
   0x5   : > { %s593_s18 = smov (%p28_p1, %s26_s18), 0  ;;  %p184_p3 = pnand %p442_p0, %p183_p2 }
   0x6   : > { %p218_p4 = scmp.lt.s32.totalorder (!%p184_p3), %s502_s15, 1  ;;  %v512_v0 = vmov (!%p184_p3), 0.0   ;;  %v330_v1 = vld [vmem:[%s586_s1] sm:$0xf] (!%p184_p3)  ;;  %v513_v2 = vmov (!%p184_p3), 0   ;;  %vm252_vm0 = vcmask (!%p184_p3), 1043456  }
   0x7   : > { %187 = sbr.rel (%p184_p3) target bundleno = 251 (0xfb), region = 36  ;;  %323 = vmatprep.mubr.f32.mxu0 (!%p184_p3), %v512_v0  ;;  %487 = vset.pattern.permute.xlu0 (!%p184_p3), %v513_v2  ;;  %v338_v3 = vld [vmem:[%s587_s2] sm:$0xf] (!%p184_p3)  ;;  %vm248_vm1 = vcmask (!%p184_p3), 293888  }
   0x8   : > { %333 = vperm.xlu0 (!%p184_p3), %487, %v330_v1   ;;  %v237_v18 = vld [vmem:[%s585_s0] sm:$0xf] (!%p184_p3) }
   0xc   : > { %341 = vperm.xlu0 (!%p184_p3), %487, %v338_v3  }
   0xe   : > { %s595_s15 = smov (!%p218_p4, %s502_s15), 1 }
   0xf   : > { %s460_s21 = smul.u32 80, %s595_s15  ;;  %s451_s29 = sshll.u32 %s595_s15, 3 }
  0x10   : > { %s235_s6 = scalar_lea.vmem %s589_s4, %s451_s29 }
  0x11   : > { %s225_s26 = scalar_lea.vmem %s588_s3, %s460_s21 }
  0x12   : > { %v239_v4 = vld [vmem:[%s225_s26 + $0x8] sm:$0xff]  ;;  %v241_v5 = vld [vmem:[%s225_s26 + $0x18] sm:$0xff]  ;;  %v238_v6 = vld [vmem:[%s225_s26] sm:$0xff] }
  0x13   : > { %v452_v7 = vpack.c.bf16 %v241_v5, %v239_v4  ;;  %v240_v8 = vld [vmem:[%s225_s26 + $0x10] sm:$0xff]  ;;  %v243_v9 = vld [vmem:[%s225_s26 + $0x28] sm:$0xff]  ;;  %v245_v10 = vld [vmem:[%s225_s26 + $0x38] sm:$0xff] }
  0x14   : > { %v454_v11 = vpack.c.bf16 %v240_v8, %v238_v6  ;;  %v456_v12 = vpack.c.bf16 %v245_v10, %v243_v9  ;;  %v242_v13 = vld [vmem:[%s225_s26 + $0x20] sm:$0xff]  ;;  %v244_v14 = vld [vmem:[%s225_s26 + $0x30] sm:$0xff]  ;;  %v247_v16 = vld [vmem:[%s225_s26 + $0x48] sm:$0xf] }
  0x15   : > { %453 = vmatprep.subr.bf16.mxu0 %v452_v7  ;;  %v458_v15 = vpack.c.bf16 %v244_v14, %v242_v13  ;;  %v246_v17 = vld [vmem:[%s225_s26 + $0x40] sm:$0xf] }
  0x16   : > { %455 = vmatpush1.bf16.msra.mxu0 %v454_v11 }
  0x17   : > { %457 = vmatprep.subr.bf16.mxu0 %v456_v12 }
  0x1a   : > { %459 = vmatpush1.bf16.msra.mxu0 %v458_v15 }
  0x1b   : > { %446 = vmatprep.subr.msk.mxu0 %vm252_vm0, %v247_v16 }
  0x1e   : > { %447 = vmatpush1.msk.msra.mxu0 %vm252_vm0, %v246_v17 }
  0x1f   : > { %448 = vmatmul.mubr.msk.f32.vlgmr.msra.gmra.mrb[0].mxu0 %vm248_vm1, %v237_v18 }
  0x87   : > { %v334_v19 = vpop.permute.xlu0 %333 }
  0x8b   : > { %v342_v23 = vpop.permute.xlu0 %341 }
  0xf2   : > { %v325_v20 = vpop.f32.mrb[0].mxu0 }
  0xf3   : > { %v336_v21 = vmul.f32 %v334_v19, %v325_v20  ;;  %v327_v22 = vpop.f32.mrb[1].mxu0 }
  0xf4   : > { %v337_v24 = vmul.f32 %v334_v19, %v327_v22 }
  0xf5   : > { %v344_v25 = vadd.f32 %v342_v23, %v336_v21 }
  0xf6   : > { %v345_v26 = vadd.f32 %v342_v23, %v337_v24 }
  0xf8   : > { %v348_v27 = vcombine.low %v344_v25, %v345_v26 }
  0xfa   : > { %350 = vst [vmem:[%s235_s6] sm:$0xff] %v348_v27 }
  0xfb PF: > { %s14_s17 = sadd.s32 1, %s510_s17   ;;  %s590_s15 = smov %s506_s16 }
  0xfc   : > { %p11_p5 = scmp.ge.s32.totalorder %s14_s17, 4   ;;  %s591_s16 = smov %s593_s18 }
  0xfe   :  { %13 = sbr.rel (!%p11_p5) target bundleno = 2 (0x2), region = 66 }

// kernel: aggregation_forward.20
= control target key start
LH: loop header
LB: loop body
LE: loop exit
PB: predicated region body
PF: predicated region fallthrough
CT: control target
= control target key end

     0   :  { %s543_s15 = smov 0   ;;  %s545_s16 = smov 0   ;;  %s609_s0 = inlined_call_operand.vmem [shape: f32[8,72], index: 0, kind: input, shape index: {}]   ;;  %s610_s1 = inlined_call_operand.vmem [shape: f32[8,1], index: 1, kind: input, shape index: {}]   ;;  %s611_s2 = inlined_call_operand.vmem [shape: f32[8,1], index: 2, kind: input, shape index: {}]   ;;  %s612_s3 = inlined_call_operand.vmem [shape: f32[2,72,256], index: 3, kind: input, shape index: {}]   ;;  %s613_s4 = inlined_call_operand.vmem [shape: f32[2,8,256], index: 4, kind: output, shape index: {}]  }
   0x1   :  { %s547_s17 = smov 0  }
   0x2 LB: > { %s26_s18 = sadd.s32 1, %s510_s16  ;;  %p440_p0 = scmp.ge.s32.totalorder %s514_s17, 1  ;;  %s514_s17 = sphi %s547_s17, %s14_s17   ;;  %s510_s16 = sphi %s545_s16, %s615_s16   ;;  %s506_s15 = sphi %s543_s15, %s614_s15  }
   0x3   : > { %p28_p1 = scmp.ge.s32.totalorder %s26_s18, 2  ;;  %p183_p2 = scmp.lt.s32.totalorder %s514_s17, 3 }
   0x5   : > { %s617_s18 = smov (%p28_p1, %s26_s18), 0  ;;  %p184_p3 = pnand %p440_p0, %p183_p2 }
   0x6   : > { %p218_p4 = scmp.lt.s32.totalorder (!%p184_p3), %s506_s15, 1  ;;  %v331_v0 = vld [vmem:[%s610_s1] sm:$0xff] (!%p184_p3)  ;;  %v516_v1 = vmov (!%p184_p3), 0.0   ;;  %v517_v2 = vmov (!%p184_p3), 0   ;;  %vm256_vm0 = vcmask (!%p184_p3), 588800  }
   0x7   : > { %187 = sbr.rel (%p184_p3) target bundleno = 257 (0x101), region = 36  ;;  %324 = vmatprep.mubr.f32.mxu0 (!%p184_p3), %v516_v1  ;;  %491 = vset.pattern.permute.xlu0 (!%p184_p3), %v517_v2  ;;  %v339_v3 = vld [vmem:[%s611_s2] sm:$0xff] (!%p184_p3) }
   0x8   : > { %334 = vperm.xlu0 (!%p184_p3), %491, %v331_v0   ;;  %v237_v30 = vld [vmem:[%s609_s0] sm:$0xff] (!%p184_p3) }
   0xc   : > { %342 = vperm.xlu0 (!%p184_p3), %491, %v339_v3  }
   0xe   : > { %s619_s15 = smov (!%p218_p4, %s506_s15), 1 }
   0xf   : > { %s464_s23 = smul.u32 144, %s619_s15  ;;  %s447_s29 = sshll.u32 %s619_s15, 4 }
  0x10   : > { %s235_s6 = scalar_lea.vmem %s613_s4, %s447_s29 }
  0x11   : > { %s573_s26 = scalar_lea.vmem %s612_s3, %s464_s23 }
  0x12   : > { %v239_v4 = vld [vmem:[%s573_s26 + $0x8] sm:$0xff]  ;;  %v241_v5 = vld [vmem:[%s573_s26 + $0x18] sm:$0xff]  ;;  %v238_v6 = vld [vmem:[%s573_s26] sm:$0xff] }
  0x13   : > { %v448_v7 = vpack.c.bf16 %v241_v5, %v239_v4  ;;  %v240_v8 = vld [vmem:[%s573_s26 + $0x10] sm:$0xff]  ;;  %v243_v9 = vld [vmem:[%s573_s26 + $0x28] sm:$0xff]  ;;  %v245_v10 = vld [vmem:[%s573_s26 + $0x38] sm:$0xff] }
  0x14   : > { %v450_v11 = vpack.c.bf16 %v240_v8, %v238_v6  ;;  %v452_v12 = vpack.c.bf16 %v245_v10, %v243_v9  ;;  %v242_v13 = vld [vmem:[%s573_s26 + $0x20] sm:$0xff]  ;;  %v244_v14 = vld [vmem:[%s573_s26 + $0x30] sm:$0xff]  ;;  %v247_v15 = vld [vmem:[%s573_s26 + $0x48] sm:$0xff] }
  0x15   : > { %449 = vmatprep.subr.bf16.mxu0 %v448_v7  ;;  %v249_v16 = vld [vmem:[%s573_s26 + $0x58] sm:$0xff]  ;;  %v454_v17 = vpack.c.bf16 %v244_v14, %v242_v13  ;;  %v246_v19 = vld [vmem:[%s573_s26 + $0x40] sm:$0xff]  ;;  %v248_v20 = vld [vmem:[%s573_s26 + $0x50] sm:$0xff] }
  0x16   : > { %451 = vmatpush1.bf16.msra.mxu0 %v450_v11  ;;  %v456_v18 = vpack.c.bf16 %v249_v16, %v247_v15  ;;  %v251_v21 = vld [vmem:[%s573_s26 + $0x68] sm:$0xff]  ;;  %v253_v22 = vld [vmem:[%s573_s26 + $0x78] sm:$0xff]  ;;  %v458_v23 = vpack.c.bf16 %v248_v20, %v246_v19  ;;  %v250_v25 = vld [vmem:[%s573_s26 + $0x60] sm:$0xff] }
  0x17   : > { %453 = vmatprep.subr.bf16.mxu0 %v452_v12  ;;  %v460_v24 = vpack.c.bf16 %v253_v22, %v251_v21  ;;  %v252_v26 = vld [vmem:[%s573_s26 + $0x70] sm:$0xff]  ;;  %v255_v28 = vld [vmem:[%s573_s26 + $0x88] sm:$0xff]  ;;  %v254_v29 = vld [vmem:[%s573_s26 + $0x80] sm:$0xff] }
  0x18   : > { %v462_v27 = vpack.c.bf16 %v252_v26, %v250_v25 }
  0x1a   : > { %455 = vmatpush1.bf16.msra.mxu0 %v454_v17 }
  0x1b   : > { %457 = vmatprep.subr.bf16.mxu0 %v456_v18 }
  0x1e   : > { %459 = vmatpush1.bf16.msra.mxu0 %v458_v23 }
  0x1f   : > { %461 = vmatprep.subr.bf16.mxu0 %v460_v24 }
  0x22   : > { %463 = vmatpush1.bf16.msra.mxu0 %v462_v27 }
  0x23   : > { %276 = vmatprep.subr.mxu0 %v255_v28 }
  0x26   : > { %277 = vmatpush1.msra.mxu0 %v254_v29 }
  0x27   : > { %444 = vmatmul.mubr.msk.f32.vlgmr.msra.gmra.mrb[0].mxu0 %vm256_vm0, %v237_v30 }
  0x87   : > { %v335_v31 = vpop.permute.xlu0 %334 }
  0x8b   : > { %v343_v35 = vpop.permute.xlu0 %342 }
  0xfa   : > { %v326_v32 = vpop.f32.mrb[0].mxu0 }
  0xfb   : > { %v337_v33 = vmul.f32 %v335_v31, %v326_v32  ;;  %v328_v34 = vpop.f32.mrb[1].mxu0 }
  0xfc   : > { %v338_v36 = vmul.f32 %v335_v31, %v328_v34 }
  0xfd   : > { %v345_v37 = vadd.f32 %v343_v35, %v337_v33 }
  0xfe   : > { %v346_v38 = vadd.f32 %v343_v35, %v338_v36 }
  0xff   : > { %347 = vst [vmem:[%s235_s6] sm:$0xff] %v345_v37 }
 0x100   : > { %348 = vst [vmem:[%s235_s6 + $0x8] sm:$0xff] %v346_v38 }
 0x101 PF: > { %s14_s17 = sadd.s32 1, %s514_s17   ;;  %s614_s15 = smov %s510_s16 }
 0x102   : > { %p11_p5 = scmp.ge.s32.totalorder %s14_s17, 4   ;;  %s615_s16 = smov %s617_s18 }
 0x104   :  { %13 = sbr.rel (!%p11_p5) target bundleno = 2 (0x2), region = 66 }

// kernel: aggregation_forward.21
= control target key start
LH: loop header
LB: loop body
LE: loop exit
PB: predicated region body
PF: predicated region fallthrough
CT: control target
= control target key end

     0   :  { %s531_s12 = smov 0   ;;  %s574_s0 = inlined_call_operand.vmem [shape: f32[32,16], index: 0, kind: input, shape index: {}]   ;;  %s575_s1 = inlined_call_operand.vmem [shape: f32[16,32], index: 1, kind: input, shape index: {}]   ;;  %s576_s2 = inlined_call_operand.vmem [shape: f32[16,16,16], index: 2, kind: input, shape index: {}]   ;;  %s577_s3 = inlined_call_operand.vmem [shape: f32[16,32,32], index: 3, kind: output, shape index: {}]  }
   0x1 LB: > { %s434_s13 = sadd.s32 4294967295, %s509_s12   ;;  %p438_p0 = scmp.ge.s32.totalorder %s509_s12, 1  ;;  %s509_s12 = sphi %s531_s12, %s13_s12  }
   0x2   : > { %p137_p1 = scmp.lt.s32.totalorder %s509_s12, 17 }
   0x4   : > { %p138_p2 = pnand %p438_p0, %p137_p1 }
   0x5   : > { %p161_p3 = scmp.lt.s32.totalorder (!%p138_p2), %s434_s13, 15  ;;  %v173_v0 = vld [vmem:[%s574_s0] sm:$0xff] (!%p138_p2)  ;;  %vm177_vm0 = vcmask (!%p138_p2), 130048   ;;  %v276_v2 = vld [vmem:[%s575_s1 + $0x8] sm:$0xff] (!%p138_p2)  ;;  %v175_v8 = vld [vmem:[%s574_s0 + $0x10] sm:$0xff] (!%p138_p2)  ;;  %vm374_vm1 = vcmask (!%p138_p2), 261120  }
   0x6   : > { %141 = sbr.rel (%p138_p2) target bundleno = 455 (0x1c7), region = 32  ;;  %471 = vmatprep.mubr.msk.f32.mxu0 (!%p138_p2), %vm177_vm0, %v173_v0  ;;  %v275_v1 = vld [vmem:[%s575_s1] sm:$0xff] (!%p138_p2)  ;;  %v174_v7 = vld [vmem:[%s574_s0 + $0x8] sm:$0xff] (!%p138_p2)  ;;  %v176_v9 = vld [vmem:[%s574_s0 + $0x18] sm:$0xff] (!%p138_p2) }
   0x7   : > { %v491_v3 = vpack.c.bf16 (!%p138_p2), %v276_v2, %v275_v1 }
   0x9   : > { %492 = vmatprep.subr.bf16.mxu1 (!%p138_p2), %v491_v3 }
   0xa   : > { %494 = vmatpush3.bf16.msra.mxu1 (!%p138_p2), %v491_v3 }
   0xd   : > { %s579_s13 = smov (!%p161_p3, %s434_s13), 15 }
   0xe   : > { %s453_s20 = sshll.u32 %s579_s13, 4  ;;  %s454_s30 = sshll.u32 %s579_s13, 5 }
   0xf   : > { %s165_s23 = scalar_lea.vmem %s576_s2, %s453_s20  ;;  %s170_s6 = scalar_lea.vmem %s577_s3, %s454_s30 }
  0x10   : > { %v171_v4 = vld [vmem:[%s165_s23] sm:$0xff]  ;;  %v172_v5 = vld [vmem:[%s165_s23 + $0x8] sm:$0xff] }
  0x11   : > { %v487_v6 = vpack.c.bf16 %v172_v5, %v171_v4 }
  0x13   : > { %488 = vmatprep.subr.bf16.mxu0 %v487_v6 }
  0x14   : > { %490 = vmatpush3.bf16.msra.mxu0 %v487_v6 }
  0x17   : > { %472 = vmatmul.mubr.msk.f32.vlgmr.msra.gmra.mrb[0].mxu0 %vm177_vm0, %v174_v7 }
  0x18   : > { %474 = vmatprep.mubr.msk.f32.mxu0 %vm177_vm0, %v175_v8 }
  0x1b   : > { %475 = vmatmul.mubr.msk.f32.gmra.mrb[2].mxu0 %vm177_vm0, %v176_v9 }
  0xea   : > { %v473_v10 = vpop.f32.mrb[0].mxu0 }
  0xeb   : > { %v256_v11 = vpop.f32.mrb[1].mxu0 }
  0xec   : > { %481 = vmatprep.mubr.msk.f32.mxu1 %vm177_vm0, %v256_v11 }
  0xed   : > { %482 = vmatmul.mubr.msk.f32.vlgmr.msra.gmra.mrb[0].mxu1 %vm177_vm0, %v473_v10 }
  0xee   : > { %v476_v12 = vpop.f32.mrb[2].mxu0 }
  0xef   : > { %v266_v13 = vpop.f32.mrb[3].mxu0 }
  0xf0   : > { %484 = vmatprep.mubr.msk.f32.mxu1 %vm177_vm0, %v266_v13 }
  0xf1   : > { %485 = vmatmul.mubr.msk.f32.gmra.mrb[2].mxu1 %vm177_vm0, %v476_v12 }
 0x1c0   : > { %v483_v14 = vpop.f32.mrb[0].mxu1 }
 0x1c1   : > { %376 = vst.msk [vmem:[%s170_s6 + $0x8] sm:$0xff] %vm374_vm1, %v483_v14  ;;  %v355_v15 = vpop.f32.mrb[1].mxu1 }
 0x1c2   : > { %375 = vst.msk [vmem:[%s170_s6] sm:$0xff] %vm374_vm1, %v355_v15 }
 0x1c4   : > { %v486_v16 = vpop.f32.mrb[2].mxu1 }
 0x1c5   : > { %378 = vst.msk [vmem:[%s170_s6 + $0x18] sm:$0xff] %vm374_vm1, %v486_v16  ;;  %v365_v17 = vpop.f32.mrb[3].mxu1 }
 0x1c6   : > { %377 = vst.msk [vmem:[%s170_s6 + $0x10] sm:$0xff] %vm374_vm1, %v365_v17 }
 0x1c7 PF: > { %s13_s12 = sadd.s32 1, %s509_s12  }
 0x1c8   : > { %p10_p4 = scmp.ge.s32.totalorder %s13_s12, 18  }
 0x1ca   :  { %12 = sbr.rel (!%p10_p4) target bundleno = 1 (0x1), region = 62 }

// kernel: aggregation_forward.22
= control target key start
LH: loop header
LB: loop body
LE: loop exit
PB: predicated region body
PF: predicated region fallthrough
CT: control target
= control target key end

     0   :  { %s807_s15 = smov 0   ;;  %s809_s16 = smov 0   ;;  %s1020_s0 = inlined_call_operand.vmem [shape: f32[8,72], index: 0, kind: input, shape index: {}]   ;;  %s1021_s1 = inlined_call_operand.vmem [shape: f32[8,1], index: 1, kind: input, shape index: {}]   ;;  %s1022_s2 = inlined_call_operand.vmem [shape: f32[8,1], index: 2, kind: input, shape index: {}]   ;;  %s1023_s3 = inlined_call_operand.vmem [shape: f32[2,72,1024], index: 3, kind: input, shape index: {}]   ;;  %s1024_s4 = inlined_call_operand.vmem [shape: f32[2,8,1024], index: 4, kind: output, shape index: {}]  }
   0x1   :  { %s811_s17 = smov 0   ;;  %s813_s18 = smov 0  }
   0x2   :  { %s815_s19 = smov 0   ;;  %s817_s20 = smov 0  }
   0x3   :  { %s819_s21 = smov 0  }
   0x4 LB: > { %s23_s22 = sadd.s32 1, %s770_s19  ;;  %s26_s23 = sadd.s32 1, %s774_s20  ;;  %s778_s21 = sphi %s819_s21, %s14_s21   ;;  %s774_s20 = sphi %s817_s20, %s1030_s20   ;;  %s770_s19 = sphi %s815_s19, %s1029_s19   ;;  %s766_s18 = sphi %s813_s18, %s1028_s18   ;;  %s762_s17 = sphi %s811_s17, %s1027_s17   ;;  %s758_s16 = sphi %s809_s16, %s1026_s16   ;;  %s754_s15 = sphi %s807_s15, %s1025_s15  }
   0x5   : > { %p24_p0 = scmp.ge.s32.totalorder %s23_s22, 2  ;;  %p105_p1 = scmp.ne.s32.totalorder %s758_s16, %s754_s15 }
   0x6   : > { %p106_p2 = scmp.eq.s32.totalorder %s778_s21, 0  ;;  %s98_s27 = sadd.s32 1, %s758_s16 }
   0x7   : > { %s1032_s22 = smov (%p24_p0, %s23_s22), 0  ;;  %s1034_s23 = smov (!%p24_p0, %s26_s23), %s774_s20 }
   0x8   : > { %p107_p3 = por %p106_p2, %p105_p1  ;;  %p28_p4 = scmp.ge.s32.totalorder %s1034_s23, 2 }
   0x9   : > { %s94_s24 = ssub.s32 %s770_s19, %s1032_s22  ;;  %p619_p6 = scmp.ge.s32.totalorder %s778_s21, 4 }
   0xa   : > { %s1036_s23 = smov (%p28_p4, %s1034_s23), 0 }
   0xb   : > { %s93_s25 = ssub.s32 %s774_s20, %s1036_s23  ;;  %168 = sbr.rel (%p619_p6) target bundleno = 44 (0x2c), region = 28 }
   0xc   : > { %s95_s26 = sor.u32 %s94_s24, %s93_s25 }
   0xd   : > { %p96_p5 = scmp.eq.s32.totalorder %s95_s26, 0 }
   0xf   : > { %s858_s28 = scalar_select %p96_p5, %s758_s16, %s98_s27  }
  0x12   : > { %171 = sbr.rel (!%p107_p3) target bundleno = 44 (0x2c), region = 32  ;;  %s173_s29 = sand.u32 (%p107_p3), 1, %s758_s16  }
  0x13   : > { %s662_s30 = smul.u32 (%p107_p3), 288, %s173_s29  ;;  %s620_s5 = sshll.u32 (%p107_p3), %s770_s19, 2 }
  0x14   : > { %s663_s6 = smul.u32 (%p107_p3), 72, %s774_s20 }
  0x15   : > { %s872_s12 = scalar_lea.vmem (%p107_p3), [#allocation2], %s662_s30 }
  0x16   : > { %s178_s7 = sadd.s32 (%p107_p3), %s663_s6, %s620_s5 }
  0x17   : > { %s621_s8 = sshll.u32 (%p107_p3), %s178_s7, 3 }
  0x18   : > { %s867_s11 = scalar_lea.vmem (%p107_p3), %s1023_s3, %s621_s8 }
  0x19   : > { %v193_v0 = vld [vmem:[%s867_s11] sm:$0xff]  ;;  %v195_v1 = vld [vmem:[%s867_s11 + $0x8] sm:$0xff]  ;;  %v197_v2 = vld [vmem:[%s867_s11 + $0x10] sm:$0xff] }
  0x1a   : > { %194 = vst [vmem:[%s872_s12] sm:$0xff] %v193_v0  ;;  %196 = vst [vmem:[%s872_s12 + $0x8] sm:$0xff] %v195_v1  ;;  %v199_v3 = vld [vmem:[%s867_s11 + $0x18] sm:$0xff]  ;;  %v201_v4 = vld [vmem:[%s867_s11 + $0x40] sm:$0xff] }
  0x1b   : > { %198 = vst [vmem:[%s872_s12 + $0x10] sm:$0xff] %v197_v2  ;;  %v203_v5 = vld [vmem:[%s867_s11 + $0x48] sm:$0xff]  ;;  %200 = vst [vmem:[%s872_s12 + $0x18] sm:$0xff] %v199_v3  ;;  %v205_v6 = vld [vmem:[%s867_s11 + $0x50] sm:$0xff] }
  0x1c   : > { %202 = vst [vmem:[%s872_s12 + $0x20] sm:$0xff] %v201_v4  ;;  %204 = vst [vmem:[%s872_s12 + $0x28] sm:$0xff] %v203_v5  ;;  %v207_v7 = vld [vmem:[%s867_s11 + $0x58] sm:$0xff]  ;;  %v209_v8 = vld [vmem:[%s867_s11 + $0x80] sm:$0xff] }
  0x1d   : > { %206 = vst [vmem:[%s872_s12 + $0x30] sm:$0xff] %v205_v6  ;;  %208 = vst [vmem:[%s872_s12 + $0x38] sm:$0xff] %v207_v7  ;;  %v211_v9 = vld [vmem:[%s867_s11 + $0x88] sm:$0xff]  ;;  %v213_v10 = vld [vmem:[%s867_s11 + $0x90] sm:$0xff] }
  0x1e   : > { %210 = vst [vmem:[%s872_s12 + $0x40] sm:$0xff] %v209_v8  ;;  %v215_v11 = vld [vmem:[%s867_s11 + $0x98] sm:$0xff]  ;;  %212 = vst [vmem:[%s872_s12 + $0x48] sm:$0xff] %v211_v9  ;;  %v217_v12 = vld [vmem:[%s867_s11 + $0xc0] sm:$0xff] }
  0x1f   : > { %214 = vst [vmem:[%s872_s12 + $0x50] sm:$0xff] %v213_v10  ;;  %216 = vst [vmem:[%s872_s12 + $0x58] sm:$0xff] %v215_v11  ;;  %v219_v13 = vld [vmem:[%s867_s11 + $0xc8] sm:$0xff]  ;;  %v221_v14 = vld [vmem:[%s867_s11 + $0xd0] sm:$0xff] }
  0x20   : > { %218 = vst [vmem:[%s872_s12 + $0x60] sm:$0xff] %v217_v12  ;;  %220 = vst [vmem:[%s872_s12 + $0x68] sm:$0xff] %v219_v13  ;;  %v223_v15 = vld [vmem:[%s867_s11 + $0xd8] sm:$0xff]  ;;  %v225_v16 = vld [vmem:[%s867_s11 + $0x100] sm:$0xff] }
  0x21   : > { %222 = vst [vmem:[%s872_s12 + $0x70] sm:$0xff] %v221_v14  ;;  %v227_v17 = vld [vmem:[%s867_s11 + $0x108] sm:$0xff]  ;;  %224 = vst [vmem:[%s872_s12 + $0x78] sm:$0xff] %v223_v15  ;;  %v229_v18 = vld [vmem:[%s867_s11 + $0x110] sm:$0xff] }
  0x22   : > { %226 = vst [vmem:[%s872_s12 + $0x80] sm:$0xff] %v225_v16  ;;  %228 = vst [vmem:[%s872_s12 + $0x88] sm:$0xff] %v227_v17  ;;  %v231_v19 = vld [vmem:[%s867_s11 + $0x118] sm:$0xff]  ;;  %v233_v20 = vld [vmem:[%s867_s11 + $0x140] sm:$0xff] }
  0x23   : > { %230 = vst [vmem:[%s872_s12 + $0x90] sm:$0xff] %v229_v18  ;;  %232 = vst [vmem:[%s872_s12 + $0x98] sm:$0xff] %v231_v19  ;;  %v235_v21 = vld [vmem:[%s867_s11 + $0x148] sm:$0xff]  ;;  %v237_v22 = vld [vmem:[%s867_s11 + $0x150] sm:$0xff] }
  0x24   : > { %234 = vst [vmem:[%s872_s12 + $0xa0] sm:$0xff] %v233_v20  ;;  %v239_v23 = vld [vmem:[%s867_s11 + $0x158] sm:$0xff]  ;;  %236 = vst [vmem:[%s872_s12 + $0xa8] sm:$0xff] %v235_v21  ;;  %v241_v24 = vld [vmem:[%s867_s11 + $0x180] sm:$0xff] }
  0x25   : > { %238 = vst [vmem:[%s872_s12 + $0xb0] sm:$0xff] %v237_v22  ;;  %240 = vst [vmem:[%s872_s12 + $0xb8] sm:$0xff] %v239_v23  ;;  %v243_v25 = vld [vmem:[%s867_s11 + $0x188] sm:$0xff]  ;;  %v245_v26 = vld [vmem:[%s867_s11 + $0x190] sm:$0xff] }
  0x26   : > { %242 = vst [vmem:[%s872_s12 + $0xc0] sm:$0xff] %v241_v24  ;;  %244 = vst [vmem:[%s872_s12 + $0xc8] sm:$0xff] %v243_v25  ;;  %v247_v27 = vld [vmem:[%s867_s11 + $0x198] sm:$0xff]  ;;  %v249_v28 = vld [vmem:[%s867_s11 + $0x1c0] sm:$0xff] }
  0x27   : > { %246 = vst [vmem:[%s872_s12 + $0xd0] sm:$0xff] %v245_v26  ;;  %v251_v29 = vld [vmem:[%s867_s11 + $0x1c8] sm:$0xff]  ;;  %248 = vst [vmem:[%s872_s12 + $0xd8] sm:$0xff] %v247_v27  ;;  %v253_v30 = vld [vmem:[%s867_s11 + $0x1d0] sm:$0xff] }
  0x28   : > { %250 = vst [vmem:[%s872_s12 + $0xe0] sm:$0xff] %v249_v28  ;;  %252 = vst [vmem:[%s872_s12 + $0xe8] sm:$0xff] %v251_v29  ;;  %v255_v31 = vld [vmem:[%s867_s11 + $0x1d8] sm:$0xff]  ;;  %v257_v32 = vld [vmem:[%s867_s11 + $0x200] sm:$0xff] }
  0x29   : > { %254 = vst [vmem:[%s872_s12 + $0xf0] sm:$0xff] %v253_v30  ;;  %256 = vst [vmem:[%s872_s12 + $0xf8] sm:$0xff] %v255_v31  ;;  %v259_v33 = vld [vmem:[%s867_s11 + $0x208] sm:$0xff]  ;;  %v261_v34 = vld [vmem:[%s867_s11 + $0x210] sm:$0xff] }
  0x2a   : > { %258 = vst [vmem:[%s872_s12 + $0x100] sm:$0xff] %v257_v32  ;;  %v263_v35 = vld [vmem:[%s867_s11 + $0x218] sm:$0xff]  ;;  %260 = vst [vmem:[%s872_s12 + $0x108] sm:$0xff] %v259_v33 }
  0x2b   : > { %262 = vst [vmem:[%s872_s12 + $0x110] sm:$0xff] %v261_v34  ;;  %264 = vst [vmem:[%s872_s12 + $0x118] sm:$0xff] %v263_v35 }
  0x2c PF: > { %p622_p7 = scmp.ge.s32.totalorder %s778_s21, 1  ;;  %p269_p8 = scmp.lt.s32.totalorder %s778_s21, 5 }
  0x2e   : > { %p270_p9 = pnand %p622_p7, %p269_p8 }
  0x2f   : > { %s276_s13 = sand.u32 (!%p270_p9), 1, %s754_s15   ;;  %v499_v36 = vld [vmem:[%s1021_s1] sm:$0xff] (!%p270_p9)  ;;  %v780_v37 = vmov (!%p270_p9), 0.0   ;;  %v781_v38 = vmov (!%p270_p9), 0   ;;  %vm353_vm0 = vcmask (!%p270_p9), 588800   ;;  %s623_s5 = sshll.u32 (!%p270_p9), %s762_s17, 2 }
  0x30   : > { %273 = sbr.rel (%p270_p9) target bundleno = 293 (0x125), region = 55  ;;  %421 = vmatprep.mubr.f32.mxu0 (!%p270_p9), %v780_v37  ;;  %492 = vmatprep.mubr.f32.mxu1 (!%p270_p9), %v780_v37  ;;  %v509_v39 = vld [vmem:[%s1022_s2] sm:$0xff] (!%p270_p9)  ;;  %p307_p10 = scmp.lt.s32.totalorder (!%p270_p9), %s766_s18, 1 }
  0x31   : > { %s664_s25 = smul.u32 (!%p270_p9), 288, %s276_s13  ;;  %723 = vset.pattern.permute.xlu0 (!%p270_p9), %v781_v38  ;;  %v316_v28 = vld [vmem:[%s1020_s0] sm:$0xff] (!%p270_p9)  ;;  %p309_p11 = scmp.lt.s32.totalorder (!%p270_p9), %s623_s5, 7 }
  0x32   : > { %502 = vperm.xlu0 (!%p270_p9), %723, %v499_v36  }
  0x33   : > { %s952_s29 = scalar_lea.vmem (!%p270_p9), [#allocation2], %s664_s25 }
  0x34   : > { %v318_v40 = vld [vmem:[%s952_s29 + $0x8] sm:$0xff] (!%p270_p9)  ;;  %v320_v42 = vld [vmem:[%s952_s29 + $0x18] sm:$0xff] (!%p270_p9)  ;;  %v317_v45 = vld [vmem:[%s952_s29] sm:$0xff] (!%p270_p9) }
  0x35   : > { %v322_v41 = vld [vmem:[%s952_s29 + $0x28] sm:$0xff] (!%p270_p9)  ;;  %v324_v44 = vld [vmem:[%s952_s29 + $0x38] sm:$0xff] (!%p270_p9)  ;;  %v321_v46 = vld [vmem:[%s952_s29 + $0x20] sm:$0xff] (!%p270_p9) }
  0x36   : > { %v630_v43 = vpack.c.bf16 (!%p270_p9), %v322_v41, %v318_v40  ;;  %v646_v47 = vpack.c.bf16 (!%p270_p9), %v324_v44, %v320_v42  ;;  %v632_v48 = vpack.c.bf16 (!%p270_p9), %v321_v46, %v317_v45  ;;  %v319_v49 = vld [vmem:[%s952_s29 + $0x10] sm:$0xff] (!%p270_p9)  ;;  %v326_v51 = vld [vmem:[%s952_s29 + $0x48] sm:$0xff] (!%p270_p9)  ;;  %v328_v54 = vld [vmem:[%s952_s29 + $0x58] sm:$0xff] (!%p270_p9)  ;;  %512 = vperm.xlu0 (!%p270_p9), %723, %v509_v39  }
  0x37   : > { %v323_v50 = vld [vmem:[%s952_s29 + $0x30] sm:$0xff]  ;;  %v330_v53 = vld [vmem:[%s952_s29 + $0x68] sm:$0xff]  ;;  %v332_v55 = vld [vmem:[%s952_s29 + $0x78] sm:$0xff]  ;;  %s1038_s18 = smov (!%p307_p10, %s766_s18), 1  ;;  %s1040_s5 = smov (!%p309_p11, %s623_s5), 7 }
  0x38   : > { %631 = vmatprep.subr.bf16.mxu0 %v630_v43  ;;  %v648_v52 = vpack.c.bf16 %v323_v50, %v319_v49  ;;  %647 = vmatprep.subr.bf16.mxu1 %v646_v47  ;;  %v634_v56 = vpack.c.bf16 %v330_v53, %v326_v51  ;;  %v650_v57 = vpack.c.bf16 %v332_v55, %v328_v54  ;;  %v325_v58 = vld [vmem:[%s952_s29 + $0x40] sm:$0xff]  ;;  %v327_v60 = vld [vmem:[%s952_s29 + $0x50] sm:$0xff]  ;;  %v334_v63 = vld [vmem:[%s952_s29 + $0x88] sm:$0xff]  ;;  %s624_s6 = sshll.u32 %s1038_s18, 3 }
  0x39   : > { %633 = vmatpush1.bf16.msra.mxu0 %v632_v48  ;;  %v329_v59 = vld [vmem:[%s952_s29 + $0x60] sm:$0xff]  ;;  %v331_v62 = vld [vmem:[%s952_s29 + $0x70] sm:$0xff]  ;;  %v338_v0 = vld [vmem:[%s952_s29 + $0xa8] sm:$0xff]  ;;  %s312_s7 = sadd.s32 %s624_s6, %s1040_s5 }
  0x3a   : > { %649 = vmatpush1.bf16.msra.mxu1 %v648_v52  ;;  %v636_v61 = vpack.c.bf16 %v329_v59, %v325_v58  ;;  %635 = vmatprep.subr.bf16.mxu0 %v634_v56  ;;  %v652_v1 = vpack.c.bf16 %v331_v62, %v327_v60  ;;  %v638_v2 = vpack.c.bf16 %v338_v0, %v334_v63  ;;  %v336_v3 = vld [vmem:[%s952_s29 + $0x98] sm:$0xff]  ;;  %v333_v5 = vld [vmem:[%s952_s29 + $0x80] sm:$0xff]  ;;  %v335_v8 = vld [vmem:[%s952_s29 + $0x90] sm:$0xff]  ;;  %s625_s8 = sshll.u32 %s312_s7, 3 }
  0x3b   : > { %651 = vmatprep.subr.bf16.mxu1 %v650_v57  ;;  %v340_v4 = vld [vmem:[%s952_s29 + $0xb8] sm:$0xff]  ;;  %v337_v7 = vld [vmem:[%s952_s29 + $0xa0] sm:$0xff]  ;;  %v339_v9 = vld [vmem:[%s952_s29 + $0xb0] sm:$0xff]  ;;  %s314_s11 = scalar_lea.vmem %s1024_s4, %s625_s8 }
  0x3c   : > { %v654_v6 = vpack.c.bf16 %v340_v4, %v336_v3  ;;  %v640_v10 = vpack.c.bf16 %v337_v7, %v333_v5  ;;  %v342_v11 = vld [vmem:[%s952_s29 + $0xc8] sm:$0xff]  ;;  %v344_v13 = vld [vmem:[%s952_s29 + $0xd8] sm:$0xff]  ;;  %v656_v14 = vpack.c.bf16 %v339_v9, %v335_v8  ;;  %v341_v17 = vld [vmem:[%s952_s29 + $0xc0] sm:$0xff] }
  0x3d   : > { %637 = vmatpush1.bf16.msra.mxu0 %v636_v61  ;;  %v346_v12 = vld [vmem:[%s952_s29 + $0xe8] sm:$0xff]  ;;  %v348_v16 = vld [vmem:[%s952_s29 + $0xf8] sm:$0xff]  ;;  %v345_v18 = vld [vmem:[%s952_s29 + $0xe0] sm:$0xff] }
  0x3e   : > { %653 = vmatpush1.bf16.msra.mxu1 %v652_v1  ;;  %639 = vmatprep.subr.bf16.mxu0 %v638_v2  ;;  %v642_v15 = vpack.c.bf16 %v346_v12, %v342_v11  ;;  %v658_v19 = vpack.c.bf16 %v348_v16, %v344_v13  ;;  %v343_v20 = vld [vmem:[%s952_s29 + $0xd0] sm:$0xff]  ;;  %v644_v22 = vpack.c.bf16 %v345_v18, %v341_v17  ;;  %v350_v24 = vld [vmem:[%s952_s29 + $0x108] sm:$0xff]  ;;  %v352_v25 = vld [vmem:[%s952_s29 + $0x118] sm:$0xff] }
  0x3f   : > { %655 = vmatprep.subr.bf16.mxu1 %v654_v6  ;;  %v347_v21 = vld [vmem:[%s952_s29 + $0xf0] sm:$0xff]  ;;  %v349_v26 = vld [vmem:[%s952_s29 + $0x100] sm:$0xff] }
  0x40   : > { %v660_v23 = vpack.c.bf16 %v347_v21, %v343_v20  ;;  %v351_v27 = vld [vmem:[%s952_s29 + $0x110] sm:$0xff] }
  0x41   : > { %641 = vmatpush1.bf16.msra.mxu0 %v640_v10 }
  0x42   : > { %657 = vmatpush1.bf16.msra.mxu1 %v656_v14  ;;  %643 = vmatprep.subr.bf16.mxu0 %v642_v15 }
  0x43   : > { %659 = vmatprep.subr.bf16.mxu1 %v658_v19 }
  0x45   : > { %645 = vmatpush1.bf16.msra.mxu0 %v644_v22 }
  0x46   : > { %661 = vmatpush1.bf16.msra.mxu1 %v660_v23  ;;  %373 = vmatprep.subr.mxu0 %v350_v24 }
  0x47   : > { %444 = vmatprep.subr.mxu1 %v352_v25 }
  0x49   : > { %374 = vmatpush1.msra.mxu0 %v349_v26 }
  0x4a   : > { %445 = vmatpush1.msra.mxu1 %v351_v27  ;;  %626 = vmatmul.mubr.msk.f32.vlgmr.msra.gmra.mrb[0].mxu0 %vm353_vm0, %v316_v28 }
  0x4b   : > { %627 = vmatmul.mubr.msk.f32.vlgmr.msra.gmra.mrb[0].mxu1 %vm353_vm0, %v316_v28 }
  0xb1   : > { %v503_v29 = vpop.permute.xlu0 %502 }
  0xb5   : > { %v513_v34 = vpop.permute.xlu0 %512 }
 0x11d   : > { %v423_v30 = vpop.f32.mrb[0].mxu0 }
 0x11e   : > { %v505_v31 = vmul.f32 %v503_v29, %v423_v30  ;;  %v494_v32 = vpop.f32.mrb[0].mxu1  ;;  %v425_v33 = vpop.f32.mrb[1].mxu0 }
 0x11f   : > { %v507_v35 = vmul.f32 %v503_v29, %v494_v32  ;;  %v506_v36 = vmul.f32 %v503_v29, %v425_v33  ;;  %v496_v37 = vpop.f32.mrb[1].mxu1 }
 0x120   : > { %v515_v38 = vadd.f32 %v513_v34, %v505_v31  ;;  %v508_v39 = vmul.f32 %v503_v29, %v496_v37 }
 0x121   : > { %v517_v40 = vadd.f32 %v513_v34, %v507_v35  ;;  %v516_v41 = vadd.f32 %v513_v34, %v506_v36 }
 0x122   : > { %519 = vst [vmem:[%s314_s11] sm:$0xff] %v515_v38  ;;  %v518_v42 = vadd.f32 %v513_v34, %v508_v39 }
 0x123   : > { %521 = vst [vmem:[%s314_s11 + $0x10] sm:$0xff] %v517_v40  ;;  %520 = vst [vmem:[%s314_s11 + $0x8] sm:$0xff] %v516_v41 }
 0x124   : > { %522 = vst [vmem:[%s314_s11 + $0x18] sm:$0xff] %v518_v42 }
 0x125 PF: > { %s14_s21 = sadd.s32 1, %s778_s21   ;;  %s1025_s15 = smov %s758_s16 }
 0x126   : > { %p11_p12 = scmp.ge.s32.totalorder %s14_s21, 6   ;;  %s1026_s16 = smov %s858_s28 }
 0x127   : > { %s1027_s17 = smov %s770_s19  ;;  %s1028_s18 = smov %s774_s20 }
 0x128   : > { %s1029_s19 = smov %s1032_s22  ;;  %s1030_s20 = smov %s1036_s23 }
 0x129   :  { %13 = sbr.rel (!%p11_p12) target bundleno = 4 (0x4), region = 94 }

// kernel: aggregation_forward.17
= control target key start
LH: loop header
LB: loop body
LE: loop exit
PB: predicated region body
PF: predicated region fallthrough
CT: control target
= control target key end

     0   :  { %s531_s12 = smov 0   ;;  %s574_s0 = inlined_call_operand.vmem [shape: f32[32,16], index: 0, kind: input, shape index: {}]   ;;  %s575_s1 = inlined_call_operand.vmem [shape: f32[16,32], index: 1, kind: input, shape index: {}]   ;;  %s576_s2 = inlined_call_operand.vmem [shape: f32[8,16,16], index: 2, kind: input, shape index: {}]   ;;  %s577_s3 = inlined_call_operand.vmem [shape: f32[8,32,32], index: 3, kind: output, shape index: {}]  }
   0x1 LB: > { %s434_s13 = sadd.s32 4294967295, %s509_s12   ;;  %p438_p0 = scmp.ge.s32.totalorder %s509_s12, 1  ;;  %s509_s12 = sphi %s531_s12, %s13_s12  }
   0x2   : > { %p137_p1 = scmp.lt.s32.totalorder %s509_s12, 9 }
   0x4   : > { %p138_p2 = pnand %p438_p0, %p137_p1 }
   0x5   : > { %p161_p3 = scmp.lt.s32.totalorder (!%p138_p2), %s434_s13, 7  ;;  %v173_v0 = vld [vmem:[%s574_s0] sm:$0xff] (!%p138_p2)  ;;  %vm177_vm0 = vcmask (!%p138_p2), 130048   ;;  %v276_v2 = vld [vmem:[%s575_s1 + $0x8] sm:$0xff] (!%p138_p2)  ;;  %v175_v8 = vld [vmem:[%s574_s0 + $0x10] sm:$0xff] (!%p138_p2)  ;;  %vm374_vm1 = vcmask (!%p138_p2), 261120  }
   0x6   : > { %141 = sbr.rel (%p138_p2) target bundleno = 455 (0x1c7), region = 32  ;;  %471 = vmatprep.mubr.msk.f32.mxu0 (!%p138_p2), %vm177_vm0, %v173_v0  ;;  %v275_v1 = vld [vmem:[%s575_s1] sm:$0xff] (!%p138_p2)  ;;  %v174_v7 = vld [vmem:[%s574_s0 + $0x8] sm:$0xff] (!%p138_p2)  ;;  %v176_v9 = vld [vmem:[%s574_s0 + $0x18] sm:$0xff] (!%p138_p2) }
   0x7   : > { %v491_v3 = vpack.c.bf16 (!%p138_p2), %v276_v2, %v275_v1 }
   0x9   : > { %492 = vmatprep.subr.bf16.mxu1 (!%p138_p2), %v491_v3 }
   0xa   : > { %494 = vmatpush3.bf16.msra.mxu1 (!%p138_p2), %v491_v3 }
   0xd   : > { %s579_s13 = smov (!%p161_p3, %s434_s13), 7 }
   0xe   : > { %s453_s20 = sshll.u32 %s579_s13, 4  ;;  %s454_s30 = sshll.u32 %s579_s13, 5 }
   0xf   : > { %s165_s23 = scalar_lea.vmem %s576_s2, %s453_s20  ;;  %s170_s6 = scalar_lea.vmem %s577_s3, %s454_s30 }
  0x10   : > { %v171_v4 = vld [vmem:[%s165_s23] sm:$0xff]  ;;  %v172_v5 = vld [vmem:[%s165_s23 + $0x8] sm:$0xff] }
  0x11   : > { %v487_v6 = vpack.c.bf16 %v172_v5, %v171_v4 }
  0x13   : > { %488 = vmatprep.subr.bf16.mxu0 %v487_v6 }
  0x14   : > { %490 = vmatpush3.bf16.msra.mxu0 %v487_v6 }
  0x17   : > { %472 = vmatmul.mubr.msk.f32.vlgmr.msra.gmra.mrb[0].mxu0 %vm177_vm0, %v174_v7 }
  0x18   : > { %474 = vmatprep.mubr.msk.f32.mxu0 %vm177_vm0, %v175_v8 }
  0x1b   : > { %475 = vmatmul.mubr.msk.f32.gmra.mrb[2].mxu0 %vm177_vm0, %v176_v9 }
  0xea   : > { %v473_v10 = vpop.f32.mrb[0].mxu0 }
  0xeb   : > { %v256_v11 = vpop.f32.mrb[1].mxu0 }
  0xec   : > { %481 = vmatprep.mubr.msk.f32.mxu1 %vm177_vm0, %v256_v11 }
  0xed   : > { %482 = vmatmul.mubr.msk.f32.vlgmr.msra.gmra.mrb[0].mxu1 %vm177_vm0, %v473_v10 }
  0xee   : > { %v476_v12 = vpop.f32.mrb[2].mxu0 }
  0xef   : > { %v266_v13 = vpop.f32.mrb[3].mxu0 }
  0xf0   : > { %484 = vmatprep.mubr.msk.f32.mxu1 %vm177_vm0, %v266_v13 }
  0xf1   : > { %485 = vmatmul.mubr.msk.f32.gmra.mrb[2].mxu1 %vm177_vm0, %v476_v12 }
 0x1c0   : > { %v483_v14 = vpop.f32.mrb[0].mxu1 }
 0x1c1   : > { %376 = vst.msk [vmem:[%s170_s6 + $0x8] sm:$0xff] %vm374_vm1, %v483_v14  ;;  %v355_v15 = vpop.f32.mrb[1].mxu1 }
 0x1c2   : > { %375 = vst.msk [vmem:[%s170_s6] sm:$0xff] %vm374_vm1, %v355_v15 }
 0x1c4   : > { %v486_v16 = vpop.f32.mrb[2].mxu1 }
 0x1c5   : > { %378 = vst.msk [vmem:[%s170_s6 + $0x18] sm:$0xff] %vm374_vm1, %v486_v16  ;;  %v365_v17 = vpop.f32.mrb[3].mxu1 }
 0x1c6   : > { %377 = vst.msk [vmem:[%s170_s6 + $0x10] sm:$0xff] %vm374_vm1, %v365_v17 }
 0x1c7 PF: > { %s13_s12 = sadd.s32 1, %s509_s12  }
 0x1c8   : > { %p10_p4 = scmp.ge.s32.totalorder %s13_s12, 10  }
 0x1ca   :  { %12 = sbr.rel (!%p10_p4) target bundleno = 1 (0x1), region = 62 }

// kernel: aggregation_forward.18
= control target key start
LH: loop header
LB: loop body
LE: loop exit
PB: predicated region body
PF: predicated region fallthrough
CT: control target
= control target key end

     0   :  { %s972_s21 = smov 0   ;;  %s974_s22 = smov 0   ;;  %s1148_s0 = inlined_call_operand.vmem [shape: f32[4,36], index: 0, kind: input, shape index: {}]   ;;  %s1149_s1 = inlined_call_operand.vmem [shape: f32[4,1], index: 1, kind: input, shape index: {}]   ;;  %s1150_s2 = inlined_call_operand.vmem [shape: f32[4,1], index: 2, kind: input, shape index: {}]   ;;  %s1151_s3 = inlined_call_operand.vmem [shape: f32[2,36,1024], index: 3, kind: input, shape index: {}]   ;;  %s1152_s4 = inlined_call_operand.vmem [shape: f32[2,4,1024], index: 4, kind: input, shape index: {}]   ;;  %s1153_s5 = inlined_call_operand.vmem [shape: f32[2,4,1024], index: 5, kind: input, shape index: {}]   ;;  %s1154_s6 = inlined_call_operand.vmem [shape: f32[2,4,1024], index: 6, kind: output, shape index: {}]  }
   0x1   :  { %s976_s23 = smov 0   ;;  %s978_s24 = smov 0  }
   0x2   :  { %s980_s25 = smov 0   ;;  %s982_s26 = smov 0  }
   0x3   :  { %s984_s27 = smov 0  }
   0x4 LB: > { %s25_s28 = sadd.s32 1, %s925_s25  ;;  %s28_s29 = sadd.s32 1, %s929_s26  ;;  %s933_s27 = sphi %s984_s27, %s16_s27   ;;  %s929_s26 = sphi %s982_s26, %s1160_s26   ;;  %s925_s25 = sphi %s980_s25, %s1159_s25   ;;  %s921_s24 = sphi %s978_s24, %s1158_s24   ;;  %s917_s23 = sphi %s976_s23, %s1157_s23   ;;  %s913_s22 = sphi %s974_s22, %s1156_s22   ;;  %s909_s21 = sphi %s972_s21, %s1155_s21  }
   0x5   : > { %p26_p0 = scmp.ge.s32.totalorder %s25_s28, 2  ;;  %p107_p1 = scmp.ne.s32.totalorder %s913_s22, %s909_s21 }
   0x6   : > { %p108_p2 = scmp.eq.s32.totalorder %s933_s27, 0  ;;  %s100_s9 = sadd.s32 1, %s913_s22 }
   0x7   : > { %s1162_s28 = smov (%p26_p0, %s25_s28), 0  ;;  %s1164_s29 = smov (!%p26_p0, %s28_s29), %s929_s26 }
   0x8   : > { %p109_p3 = por %p108_p2, %p107_p1  ;;  %p30_p4 = scmp.ge.s32.totalorder %s1164_s29, 2 }
   0x9   : > { %s96_s30 = ssub.s32 %s925_s25, %s1162_s28  ;;  %p776_p6 = scmp.ge.s32.totalorder %s933_s27, 4 }
   0xa   : > { %s1166_s29 = smov (%p30_p4, %s1164_s29), 0 }
   0xb   : > { %s95_s7 = ssub.s32 %s929_s26, %s1166_s29  ;;  %226 = sbr.rel (%p776_p6) target bundleno = 36 (0x24), region = 28 }
   0xc   : > { %s97_s8 = sor.u32 %s96_s30, %s95_s7 }
   0xd   : > { %p98_p5 = scmp.eq.s32.totalorder %s97_s8, 0 }
   0xf   : > { %s1023_s10 = scalar_select %p98_p5, %s913_s22, %s100_s9  }
  0x12   : > { %229 = sbr.rel (!%p109_p3) target bundleno = 36 (0x24), region = 32  ;;  %s231_s11 = sand.u32 (%p109_p3), 1, %s913_s22  }
  0x13   : > { %s813_s12 = smul.u32 (%p109_p3), 160, %s231_s11  ;;  %s777_s13 = sshll.u32 (%p109_p3), %s925_s25, 2 }
  0x14   : > { %s814_s14 = smul.u32 (%p109_p3), 40, %s929_s26 }
  0x15   : > { %s1037_s20 = scalar_lea.vmem (%p109_p3), [#allocation2], %s813_s12 }
  0x16   : > { %s236_s15 = sadd.s32 (%p109_p3), %s814_s14, %s777_s13 }
  0x17   : > { %s778_s16 = sshll.u32 (%p109_p3), %s236_s15, 3 }
  0x18   : > { %s1032_s19 = scalar_lea.vmem (%p109_p3), %s1151_s3, %s778_s16 }
  0x19   : > { %v251_v0 = vld [vmem:[%s1032_s19] sm:$0xff]  ;;  %v253_v1 = vld [vmem:[%s1032_s19 + $0x8] sm:$0xff]  ;;  %v255_v2 = vld [vmem:[%s1032_s19 + $0x10] sm:$0xff] }
  0x1a   : > { %252 = vst [vmem:[%s1037_s20] sm:$0xff] %v251_v0  ;;  %254 = vst [vmem:[%s1037_s20 + $0x8] sm:$0xff] %v253_v1  ;;  %v257_v3 = vld [vmem:[%s1032_s19 + $0x18] sm:$0xff]  ;;  %v259_v4 = vld [vmem:[%s1032_s19 + $0x40] sm:$0xff] }
  0x1b   : > { %256 = vst [vmem:[%s1037_s20 + $0x10] sm:$0xff] %v255_v2  ;;  %v261_v5 = vld [vmem:[%s1032_s19 + $0x48] sm:$0xff]  ;;  %258 = vst [vmem:[%s1037_s20 + $0x18] sm:$0xff] %v257_v3  ;;  %v263_v6 = vld [vmem:[%s1032_s19 + $0x50] sm:$0xff] }
  0x1c   : > { %260 = vst [vmem:[%s1037_s20 + $0x20] sm:$0xff] %v259_v4  ;;  %262 = vst [vmem:[%s1037_s20 + $0x28] sm:$0xff] %v261_v5  ;;  %v265_v7 = vld [vmem:[%s1032_s19 + $0x58] sm:$0xff]  ;;  %v267_v8 = vld [vmem:[%s1032_s19 + $0x80] sm:$0xff] }
  0x1d   : > { %264 = vst [vmem:[%s1037_s20 + $0x30] sm:$0xff] %v263_v6  ;;  %266 = vst [vmem:[%s1037_s20 + $0x38] sm:$0xff] %v265_v7  ;;  %v269_v9 = vld [vmem:[%s1032_s19 + $0x88] sm:$0xff]  ;;  %v271_v10 = vld [vmem:[%s1032_s19 + $0x90] sm:$0xff] }
  0x1e   : > { %268 = vst [vmem:[%s1037_s20 + $0x40] sm:$0xff] %v267_v8  ;;  %v273_v11 = vld [vmem:[%s1032_s19 + $0x98] sm:$0xff]  ;;  %270 = vst [vmem:[%s1037_s20 + $0x48] sm:$0xff] %v269_v9  ;;  %v275_v12 = vld [vmem:[%s1032_s19 + $0xc0] sm:$0xff] }
  0x1f   : > { %272 = vst [vmem:[%s1037_s20 + $0x50] sm:$0xff] %v271_v10  ;;  %274 = vst [vmem:[%s1037_s20 + $0x58] sm:$0xff] %v273_v11  ;;  %v277_v13 = vld [vmem:[%s1032_s19 + $0xc8] sm:$0xff]  ;;  %v279_v14 = vld [vmem:[%s1032_s19 + $0xd0] sm:$0xff] }
  0x20   : > { %276 = vst [vmem:[%s1037_s20 + $0x60] sm:$0xff] %v275_v12  ;;  %278 = vst [vmem:[%s1037_s20 + $0x68] sm:$0xff] %v277_v13  ;;  %v281_v15 = vld [vmem:[%s1032_s19 + $0xd8] sm:$0xff]  ;;  %v283_v16 = vld [vmem:[%s1032_s19 + $0x100] sm:$0xff] }
  0x21   : > { %280 = vst [vmem:[%s1037_s20 + $0x70] sm:$0xff] %v279_v14  ;;  %v285_v17 = vld [vmem:[%s1032_s19 + $0x108] sm:$0xff]  ;;  %282 = vst [vmem:[%s1037_s20 + $0x78] sm:$0xff] %v281_v15  ;;  %v287_v18 = vld [vmem:[%s1032_s19 + $0x110] sm:$0xff] }
  0x22   : > { %284 = vst [vmem:[%s1037_s20 + $0x80] sm:$0xff] %v283_v16  ;;  %286 = vst [vmem:[%s1037_s20 + $0x88] sm:$0xff] %v285_v17  ;;  %v289_v19 = vld [vmem:[%s1032_s19 + $0x118] sm:$0xff] }
  0x23   : > { %288 = vst [vmem:[%s1037_s20 + $0x90] sm:$0xff] %v287_v18  ;;  %290 = vst [vmem:[%s1037_s20 + $0x98] sm:$0xff] %v289_v19 }
  0x24 PF: > { %p779_p7 = scmp.ge.s32.totalorder %s933_s27, 1  ;;  %p321_p8 = scmp.lt.s32.totalorder %s933_s27, 5 }
  0x26   : > { %p322_p9 = pnand %p779_p7, %p321_p8 }
  0x27   : > { %s328_s30 = sand.u32 (!%p322_p9), 1, %s909_s21   ;;  %v935_v20 = vmov (!%p322_p9), 0.0   ;;  %v590_v21 = vld [vmem:[%s1149_s1] sm:$0xf] (!%p322_p9)  ;;  %v936_v22 = vmov (!%p322_p9), 0   ;;  %vm435_vm0 = vcmask (!%p322_p9), 1043456  }
  0x28   : > { %325 = sbr.rel (%p322_p9) target bundleno = 283 (0x11b), region = 63  ;;  %512 = vmatprep.mubr.f32.mxu0 (!%p322_p9), %v935_v20  ;;  %583 = vmatprep.mubr.f32.mxu1 (!%p322_p9), %v935_v20  ;;  %v600_v23 = vld [vmem:[%s1150_s2] sm:$0xf] (!%p322_p9)  ;;  %vm431_vm1 = vcmask (!%p322_p9), 293888   ;;  %s780_s15 = sshll.u32 (!%p322_p9), %s917_s23, 2 }
  0x29   : > { %s815_s7 = smul.u32 (!%p322_p9), 160, %s328_s30  ;;  %874 = vset.pattern.permute.xlu0 (!%p322_p9), %v936_v22  ;;  %v410_v52 = vld [vmem:[%s1148_s0] sm:$0xf] (!%p322_p9)  ;;  %p381_p10 = scmp.lt.s32.totalorder (!%p322_p9), %s921_s24, 1 }
  0x2a   : > { %593 = vperm.xlu0 (!%p322_p9), %874, %v590_v21   ;;  %p383_p11 = scmp.lt.s32.totalorder (!%p322_p9), %s780_s15, 7 }
  0x2b   : > { %s1085_s13 = scalar_lea.vmem (!%p322_p9), [#allocation2], %s815_s7 }
  0x2c   : > { %v412_v24 = vld [vmem:[%s1085_s13 + $0x8] sm:$0xff] (!%p322_p9)  ;;  %v414_v26 = vld [vmem:[%s1085_s13 + $0x18] sm:$0xff] (!%p322_p9)  ;;  %v411_v29 = vld [vmem:[%s1085_s13] sm:$0xff] (!%p322_p9) }
  0x2d   : > { %v416_v25 = vld [vmem:[%s1085_s13 + $0x28] sm:$0xff] (!%p322_p9)  ;;  %v418_v28 = vld [vmem:[%s1085_s13 + $0x38] sm:$0xff] (!%p322_p9)  ;;  %v415_v30 = vld [vmem:[%s1085_s13 + $0x20] sm:$0xff] (!%p322_p9) }
  0x2e   : > { %v797_v27 = vpack.c.bf16 (!%p322_p9), %v416_v25, %v412_v24  ;;  %v805_v31 = vpack.c.bf16 (!%p322_p9), %v418_v28, %v414_v26  ;;  %v799_v32 = vpack.c.bf16 (!%p322_p9), %v415_v30, %v411_v29  ;;  %v413_v33 = vld [vmem:[%s1085_s13 + $0x10] sm:$0xff] (!%p322_p9)  ;;  %v420_v35 = vld [vmem:[%s1085_s13 + $0x48] sm:$0xff] (!%p322_p9)  ;;  %v422_v38 = vld [vmem:[%s1085_s13 + $0x58] sm:$0xff] (!%p322_p9)  ;;  %603 = vperm.xlu0 (!%p322_p9), %874, %v600_v23  }
  0x2f   : > { %v417_v34 = vld [vmem:[%s1085_s13 + $0x30] sm:$0xff]  ;;  %v424_v37 = vld [vmem:[%s1085_s13 + $0x68] sm:$0xff]  ;;  %v426_v39 = vld [vmem:[%s1085_s13 + $0x78] sm:$0xff]  ;;  %s1168_s24 = smov (!%p381_p10, %s921_s24), 1  ;;  %s1170_s15 = smov (!%p383_p11, %s780_s15), 7 }
  0x30   : > { %798 = vmatprep.subr.bf16.mxu0 %v797_v27  ;;  %v807_v36 = vpack.c.bf16 %v417_v34, %v413_v33  ;;  %806 = vmatprep.subr.bf16.mxu1 %v805_v31  ;;  %v801_v40 = vpack.c.bf16 %v424_v37, %v420_v35  ;;  %v809_v41 = vpack.c.bf16 %v426_v39, %v422_v38  ;;  %v419_v42 = vld [vmem:[%s1085_s13 + $0x40] sm:$0xff]  ;;  %v421_v44 = vld [vmem:[%s1085_s13 + $0x50] sm:$0xff]  ;;  %v428_v48 = vld [vmem:[%s1085_s13 + $0x88] sm:$0xf]  ;;  %s781_s16 = sshll.u32 %s1168_s24, 3 }
  0x31   : > { %800 = vmatpush1.bf16.msra.mxu0 %v799_v32  ;;  %v423_v43 = vld [vmem:[%s1085_s13 + $0x60] sm:$0xff]  ;;  %v425_v46 = vld [vmem:[%s1085_s13 + $0x70] sm:$0xff]  ;;  %v430_v49 = vld [vmem:[%s1085_s13 + $0x98] sm:$0xf]  ;;  %s386_s17 = sadd.s32 %s781_s16, %s1170_s15 }
  0x32   : > { %808 = vmatpush1.bf16.msra.mxu1 %v807_v36  ;;  %v803_v45 = vpack.c.bf16 %v423_v43, %v419_v42  ;;  %802 = vmatprep.subr.bf16.mxu0 %v801_v40  ;;  %v811_v47 = vpack.c.bf16 %v425_v46, %v421_v44  ;;  %v427_v50 = vld [vmem:[%s1085_s13 + $0x80] sm:$0xf]  ;;  %v429_v51 = vld [vmem:[%s1085_s13 + $0x90] sm:$0xf]  ;;  %s1113_s18 = sshll.u32 %s386_s17, 2 }
  0x33   : > { %810 = vmatprep.subr.bf16.mxu1 %v809_v41  ;;  %s388_s30 = scalar_lea.vmem %s1152_s4, %s1113_s18  ;;  %s398_s9 = scalar_lea.vmem %s1153_s5, %s1113_s18 }
  0x34   : > { %v610_v54 = vld [vmem:[%s388_s30] sm:$0xff]  ;;  %v611_v56 = vld [vmem:[%s388_s30 + $0x8] sm:$0xff]  ;;  %s408_s11 = scalar_lea.vmem %s1154_s6, %s1113_s18 }
  0x35   : > { %804 = vmatpush1.bf16.msra.mxu0 %v803_v45  ;;  %v622_v58 = vld [vmem:[%s398_s9] sm:$0xff]  ;;  %v623_v63 = vld [vmem:[%s398_s9 + $0x8] sm:$0xff]  ;;  %v614_v1 = vcombine.high %v610_v54, %v610_v54  ;;  %v615_v5 = vcombine.high %v611_v56, %v611_v56 }
  0x36   : > { %812 = vmatpush1.bf16.msra.mxu1 %v811_v47  ;;  %789 = vmatprep.subr.msk.mxu0 %vm435_vm0, %v428_v48  ;;  %v626_v8 = vcombine.high %v622_v58, %v622_v58  ;;  %v627_v11 = vcombine.high %v623_v63, %v623_v63 }
  0x37   : > { %792 = vmatprep.subr.msk.mxu1 %vm435_vm0, %v430_v49 }
  0x39   : > { %790 = vmatpush1.msk.msra.mxu0 %vm435_vm0, %v427_v50 }
  0x3a   : > { %793 = vmatpush1.msk.msra.mxu1 %vm435_vm0, %v429_v51  ;;  %791 = vmatmul.mubr.msk.f32.vlgmr.msra.gmra.mrb[0].mxu0 %vm431_vm1, %v410_v52 }
  0x3b   : > { %794 = vmatmul.mubr.msk.f32.vlgmr.msra.gmra.mrb[0].mxu1 %vm431_vm1, %v410_v52 }
  0xa9   : > { %v594_v53 = vpop.permute.xlu0 %593 }
  0xad   : > { %v604_v61 = vpop.permute.xlu0 %603 }
 0x10d   : > { %v514_v55 = vpop.f32.mrb[0].mxu0 }
 0x10e   : > { %v596_v57 = vmul.f32 %v594_v53, %v514_v55  ;;  %v585_v59 = vpop.f32.mrb[0].mxu1  ;;  %v516_v60 = vpop.f32.mrb[1].mxu0 }
 0x10f   : > { %v598_v62 = vmul.f32 %v594_v53, %v585_v59  ;;  %v597_v0 = vmul.f32 %v594_v53, %v516_v60  ;;  %v587_v2 = vpop.f32.mrb[1].mxu1 }
 0x110   : > { %v606_v3 = vadd.f32 %v604_v61, %v596_v57  ;;  %v599_v4 = vmul.f32 %v594_v53, %v587_v2 }
 0x111   : > { %v608_v6 = vadd.f32 %v604_v61, %v598_v62  ;;  %v607_v7 = vadd.f32 %v604_v61, %v597_v0 }
 0x112   : > { %v618_v9 = vmul.f32 %v610_v54, %v606_v3  ;;  %v609_v10 = vadd.f32 %v604_v61, %v599_v4 }
 0x113   : > { %v620_v12 = vmul.f32 %v611_v56, %v608_v6  ;;  %v619_v13 = vmul.f32 %v614_v1, %v607_v7 }
 0x114   : > { %v630_v14 = vmul.f32 %v622_v58, %v618_v9  ;;  %v621_v15 = vmul.f32 %v615_v5, %v609_v10 }
 0x115   : > { %v632_v16 = vmul.f32 %v623_v63, %v620_v12  ;;  %v631_v17 = vmul.f32 %v626_v8, %v619_v13 }
 0x116   : > { %v633_v18 = vmul.f32 %v627_v11, %v621_v15 }
 0x117   : > { %v638_v19 = vcombine.low %v630_v14, %v631_v17 }
 0x118   : > { %v639_v20 = vcombine.low %v632_v16, %v633_v18 }
 0x119   : > { %642 = vst [vmem:[%s408_s11] sm:$0xff] %v638_v19 }
 0x11a   : > { %643 = vst [vmem:[%s408_s11 + $0x8] sm:$0xff] %v639_v20 }
 0x11b PF: > { %s16_s27 = sadd.s32 1, %s933_s27   ;;  %s1155_s21 = smov %s913_s22 }
 0x11c   : > { %p13_p12 = scmp.ge.s32.totalorder %s16_s27, 6   ;;  %s1156_s22 = smov %s1023_s10 }
 0x11d   : > { %s1157_s23 = smov %s925_s25  ;;  %s1158_s24 = smov %s929_s26 }
 0x11e   : > { %s1159_s25 = smov %s1162_s28  ;;  %s1160_s26 = smov %s1166_s29 }
 0x11f   :  { %15 = sbr.rel (!%p13_p12) target bundleno = 4 (0x4), region = 108 }

// kernel: aggregation_forward.16
= control target key start
LH: loop header
LB: loop body
LE: loop exit
PB: predicated region body
PF: predicated region fallthrough
CT: control target
= control target key end

     0   :  { %s766_s15 = smov 0   ;;  %s768_s16 = smov 0   ;;  %s931_s0 = inlined_call_operand.vmem [shape: f32[4,36], index: 0, kind: input, shape index: {}]   ;;  %s932_s1 = inlined_call_operand.vmem [shape: f32[4,1], index: 1, kind: input, shape index: {}]   ;;  %s933_s2 = inlined_call_operand.vmem [shape: f32[4,1], index: 2, kind: input, shape index: {}]   ;;  %s934_s3 = inlined_call_operand.vmem [shape: f32[2,36,1024], index: 3, kind: input, shape index: {}]   ;;  %s935_s4 = inlined_call_operand.vmem [shape: f32[2,4,1024], index: 4, kind: output, shape index: {}]  }
   0x1   :  { %s770_s17 = smov 0   ;;  %s772_s18 = smov 0  }
   0x2   :  { %s774_s19 = smov 0   ;;  %s776_s20 = smov 0  }
   0x3   :  { %s778_s21 = smov 0  }
   0x4 LB: > { %s23_s22 = sadd.s32 1, %s729_s19  ;;  %s26_s23 = sadd.s32 1, %s733_s20  ;;  %s737_s21 = sphi %s778_s21, %s14_s21   ;;  %s733_s20 = sphi %s776_s20, %s941_s20   ;;  %s729_s19 = sphi %s774_s19, %s940_s19   ;;  %s725_s18 = sphi %s772_s18, %s939_s18   ;;  %s721_s17 = sphi %s770_s17, %s938_s17   ;;  %s717_s16 = sphi %s768_s16, %s937_s16   ;;  %s713_s15 = sphi %s766_s15, %s936_s15  }
   0x5   : > { %p24_p0 = scmp.ge.s32.totalorder %s23_s22, 2  ;;  %p105_p1 = scmp.ne.s32.totalorder %s717_s16, %s713_s15 }
   0x6   : > { %p106_p2 = scmp.eq.s32.totalorder %s737_s21, 0  ;;  %s98_s27 = sadd.s32 1, %s717_s16 }
   0x7   : > { %s943_s22 = smov (%p24_p0, %s23_s22), 0  ;;  %s945_s23 = smov (!%p24_p0, %s26_s23), %s733_s20 }
   0x8   : > { %p107_p3 = por %p106_p2, %p105_p1  ;;  %p28_p4 = scmp.ge.s32.totalorder %s945_s23, 2 }
   0x9   : > { %s94_s24 = ssub.s32 %s729_s19, %s943_s22  ;;  %p590_p6 = scmp.ge.s32.totalorder %s737_s21, 4 }
   0xa   : > { %s947_s23 = smov (%p28_p4, %s945_s23), 0 }
   0xb   : > { %s93_s25 = ssub.s32 %s733_s20, %s947_s23  ;;  %168 = sbr.rel (%p590_p6) target bundleno = 36 (0x24), region = 28 }
   0xc   : > { %s95_s26 = sor.u32 %s94_s24, %s93_s25 }
   0xd   : > { %p96_p5 = scmp.eq.s32.totalorder %s95_s26, 0 }
   0xf   : > { %s817_s28 = scalar_select %p96_p5, %s717_s16, %s98_s27  }
  0x12   : > { %171 = sbr.rel (!%p107_p3) target bundleno = 36 (0x24), region = 32  ;;  %s173_s29 = sand.u32 (%p107_p3), 1, %s717_s16  }
  0x13   : > { %s621_s30 = smul.u32 (%p107_p3), 160, %s173_s29  ;;  %s591_s5 = sshll.u32 (%p107_p3), %s729_s19, 2 }
  0x14   : > { %s622_s6 = smul.u32 (%p107_p3), 40, %s733_s20 }
  0x15   : > { %s831_s12 = scalar_lea.vmem (%p107_p3), [#allocation2], %s621_s30 }
  0x16   : > { %s178_s7 = sadd.s32 (%p107_p3), %s622_s6, %s591_s5 }
  0x17   : > { %s592_s8 = sshll.u32 (%p107_p3), %s178_s7, 3 }
  0x18   : > { %s826_s11 = scalar_lea.vmem (%p107_p3), %s934_s3, %s592_s8 }
  0x19   : > { %v193_v0 = vld [vmem:[%s826_s11] sm:$0xff]  ;;  %v195_v1 = vld [vmem:[%s826_s11 + $0x8] sm:$0xff]  ;;  %v197_v2 = vld [vmem:[%s826_s11 + $0x10] sm:$0xff] }
  0x1a   : > { %194 = vst [vmem:[%s831_s12] sm:$0xff] %v193_v0  ;;  %196 = vst [vmem:[%s831_s12 + $0x8] sm:$0xff] %v195_v1  ;;  %v199_v3 = vld [vmem:[%s826_s11 + $0x18] sm:$0xff]  ;;  %v201_v4 = vld [vmem:[%s826_s11 + $0x40] sm:$0xff] }
  0x1b   : > { %198 = vst [vmem:[%s831_s12 + $0x10] sm:$0xff] %v197_v2  ;;  %v203_v5 = vld [vmem:[%s826_s11 + $0x48] sm:$0xff]  ;;  %200 = vst [vmem:[%s831_s12 + $0x18] sm:$0xff] %v199_v3  ;;  %v205_v6 = vld [vmem:[%s826_s11 + $0x50] sm:$0xff] }
  0x1c   : > { %202 = vst [vmem:[%s831_s12 + $0x20] sm:$0xff] %v201_v4  ;;  %204 = vst [vmem:[%s831_s12 + $0x28] sm:$0xff] %v203_v5  ;;  %v207_v7 = vld [vmem:[%s826_s11 + $0x58] sm:$0xff]  ;;  %v209_v8 = vld [vmem:[%s826_s11 + $0x80] sm:$0xff] }
  0x1d   : > { %206 = vst [vmem:[%s831_s12 + $0x30] sm:$0xff] %v205_v6  ;;  %208 = vst [vmem:[%s831_s12 + $0x38] sm:$0xff] %v207_v7  ;;  %v211_v9 = vld [vmem:[%s826_s11 + $0x88] sm:$0xff]  ;;  %v213_v10 = vld [vmem:[%s826_s11 + $0x90] sm:$0xff] }
  0x1e   : > { %210 = vst [vmem:[%s831_s12 + $0x40] sm:$0xff] %v209_v8  ;;  %v215_v11 = vld [vmem:[%s826_s11 + $0x98] sm:$0xff]  ;;  %212 = vst [vmem:[%s831_s12 + $0x48] sm:$0xff] %v211_v9  ;;  %v217_v12 = vld [vmem:[%s826_s11 + $0xc0] sm:$0xff] }
  0x1f   : > { %214 = vst [vmem:[%s831_s12 + $0x50] sm:$0xff] %v213_v10  ;;  %216 = vst [vmem:[%s831_s12 + $0x58] sm:$0xff] %v215_v11  ;;  %v219_v13 = vld [vmem:[%s826_s11 + $0xc8] sm:$0xff]  ;;  %v221_v14 = vld [vmem:[%s826_s11 + $0xd0] sm:$0xff] }
  0x20   : > { %218 = vst [vmem:[%s831_s12 + $0x60] sm:$0xff] %v217_v12  ;;  %220 = vst [vmem:[%s831_s12 + $0x68] sm:$0xff] %v219_v13  ;;  %v223_v15 = vld [vmem:[%s826_s11 + $0xd8] sm:$0xff]  ;;  %v225_v16 = vld [vmem:[%s826_s11 + $0x100] sm:$0xff] }
  0x21   : > { %222 = vst [vmem:[%s831_s12 + $0x70] sm:$0xff] %v221_v14  ;;  %v227_v17 = vld [vmem:[%s826_s11 + $0x108] sm:$0xff]  ;;  %224 = vst [vmem:[%s831_s12 + $0x78] sm:$0xff] %v223_v15  ;;  %v229_v18 = vld [vmem:[%s826_s11 + $0x110] sm:$0xff] }
  0x22   : > { %226 = vst [vmem:[%s831_s12 + $0x80] sm:$0xff] %v225_v16  ;;  %228 = vst [vmem:[%s831_s12 + $0x88] sm:$0xff] %v227_v17  ;;  %v231_v19 = vld [vmem:[%s826_s11 + $0x118] sm:$0xff] }
  0x23   : > { %230 = vst [vmem:[%s831_s12 + $0x90] sm:$0xff] %v229_v18  ;;  %232 = vst [vmem:[%s831_s12 + $0x98] sm:$0xff] %v231_v19 }
  0x24 PF: > { %p593_p7 = scmp.ge.s32.totalorder %s737_s21, 1  ;;  %p237_p8 = scmp.lt.s32.totalorder %s737_s21, 5 }
  0x26   : > { %p238_p9 = pnand %p593_p7, %p237_p8 }
  0x27   : > { %s244_s13 = sand.u32 (!%p238_p9), 1, %s713_s15   ;;  %v739_v20 = vmov (!%p238_p9), 0.0   ;;  %v464_v21 = vld [vmem:[%s932_s1] sm:$0xf] (!%p238_p9)  ;;  %v740_v22 = vmov (!%p238_p9), 0   ;;  %vm309_vm0 = vcmask (!%p238_p9), 1043456  }
  0x28   : > { %241 = sbr.rel (%p238_p9) target bundleno = 279 (0x117), region = 55  ;;  %386 = vmatprep.mubr.f32.mxu0 (!%p238_p9), %v739_v20  ;;  %457 = vmatprep.mubr.f32.mxu1 (!%p238_p9), %v739_v20  ;;  %v474_v23 = vld [vmem:[%s933_s2] sm:$0xf] (!%p238_p9)  ;;  %vm305_vm1 = vcmask (!%p238_p9), 293888   ;;  %s594_s5 = sshll.u32 (!%p238_p9), %s721_s17, 2 }
  0x29   : > { %s623_s14 = smul.u32 (!%p238_p9), 160, %s244_s13  ;;  %682 = vset.pattern.permute.xlu0 (!%p238_p9), %v740_v22  ;;  %v284_v52 = vld [vmem:[%s931_s0] sm:$0xf] (!%p238_p9)  ;;  %p275_p10 = scmp.lt.s32.totalorder (!%p238_p9), %s725_s18, 1 }
  0x2a   : > { %467 = vperm.xlu0 (!%p238_p9), %682, %v464_v21   ;;  %p277_p11 = scmp.lt.s32.totalorder (!%p238_p9), %s594_s5, 7 }
  0x2b   : > { %s879_s29 = scalar_lea.vmem (!%p238_p9), [#allocation2], %s623_s14 }
  0x2c   : > { %v286_v24 = vld [vmem:[%s879_s29 + $0x8] sm:$0xff] (!%p238_p9)  ;;  %v288_v26 = vld [vmem:[%s879_s29 + $0x18] sm:$0xff] (!%p238_p9)  ;;  %v285_v29 = vld [vmem:[%s879_s29] sm:$0xff] (!%p238_p9) }
  0x2d   : > { %v290_v25 = vld [vmem:[%s879_s29 + $0x28] sm:$0xff] (!%p238_p9)  ;;  %v292_v28 = vld [vmem:[%s879_s29 + $0x38] sm:$0xff] (!%p238_p9)  ;;  %v289_v30 = vld [vmem:[%s879_s29 + $0x20] sm:$0xff] (!%p238_p9) }
  0x2e   : > { %v605_v27 = vpack.c.bf16 (!%p238_p9), %v290_v25, %v286_v24  ;;  %v613_v31 = vpack.c.bf16 (!%p238_p9), %v292_v28, %v288_v26  ;;  %v607_v32 = vpack.c.bf16 (!%p238_p9), %v289_v30, %v285_v29  ;;  %v287_v33 = vld [vmem:[%s879_s29 + $0x10] sm:$0xff] (!%p238_p9)  ;;  %v294_v35 = vld [vmem:[%s879_s29 + $0x48] sm:$0xff] (!%p238_p9)  ;;  %v296_v38 = vld [vmem:[%s879_s29 + $0x58] sm:$0xff] (!%p238_p9)  ;;  %477 = vperm.xlu0 (!%p238_p9), %682, %v474_v23  }
  0x2f   : > { %v291_v34 = vld [vmem:[%s879_s29 + $0x30] sm:$0xff]  ;;  %v298_v37 = vld [vmem:[%s879_s29 + $0x68] sm:$0xff]  ;;  %v300_v39 = vld [vmem:[%s879_s29 + $0x78] sm:$0xff]  ;;  %s949_s18 = smov (!%p275_p10, %s725_s18), 1  ;;  %s951_s5 = smov (!%p277_p11, %s594_s5), 7 }
  0x30   : > { %606 = vmatprep.subr.bf16.mxu0 %v605_v27  ;;  %v615_v36 = vpack.c.bf16 %v291_v34, %v287_v33  ;;  %614 = vmatprep.subr.bf16.mxu1 %v613_v31  ;;  %v609_v40 = vpack.c.bf16 %v298_v37, %v294_v35  ;;  %v617_v41 = vpack.c.bf16 %v300_v39, %v296_v38  ;;  %v293_v42 = vld [vmem:[%s879_s29 + $0x40] sm:$0xff]  ;;  %v295_v44 = vld [vmem:[%s879_s29 + $0x50] sm:$0xff]  ;;  %v302_v48 = vld [vmem:[%s879_s29 + $0x88] sm:$0xf]  ;;  %s595_s6 = sshll.u32 %s949_s18, 3 }
  0x31   : > { %608 = vmatpush1.bf16.msra.mxu0 %v607_v32  ;;  %v297_v43 = vld [vmem:[%s879_s29 + $0x60] sm:$0xff]  ;;  %v299_v46 = vld [vmem:[%s879_s29 + $0x70] sm:$0xff]  ;;  %v304_v49 = vld [vmem:[%s879_s29 + $0x98] sm:$0xf]  ;;  %s280_s7 = sadd.s32 %s595_s6, %s951_s5 }
  0x32   : > { %616 = vmatpush1.bf16.msra.mxu1 %v615_v36  ;;  %v611_v45 = vpack.c.bf16 %v297_v43, %v293_v42  ;;  %610 = vmatprep.subr.bf16.mxu0 %v609_v40  ;;  %v619_v47 = vpack.c.bf16 %v299_v46, %v295_v44  ;;  %v301_v50 = vld [vmem:[%s879_s29 + $0x80] sm:$0xf]  ;;  %v303_v51 = vld [vmem:[%s879_s29 + $0x90] sm:$0xf]  ;;  %s596_s8 = sshll.u32 %s280_s7, 2 }
  0x33   : > { %618 = vmatprep.subr.bf16.mxu1 %v617_v41  ;;  %s282_s10 = scalar_lea.vmem %s935_s4, %s596_s8 }
  0x35   : > { %612 = vmatpush1.bf16.msra.mxu0 %v611_v45 }
  0x36   : > { %620 = vmatpush1.bf16.msra.mxu1 %v619_v47  ;;  %597 = vmatprep.subr.msk.mxu0 %vm309_vm0, %v302_v48 }
  0x37   : > { %600 = vmatprep.subr.msk.mxu1 %vm309_vm0, %v304_v49 }
  0x39   : > { %598 = vmatpush1.msk.msra.mxu0 %vm309_vm0, %v301_v50 }
  0x3a   : > { %601 = vmatpush1.msk.msra.mxu1 %vm309_vm0, %v303_v51  ;;  %599 = vmatmul.mubr.msk.f32.vlgmr.msra.gmra.mrb[0].mxu0 %vm305_vm1, %v284_v52 }
  0x3b   : > { %602 = vmatmul.mubr.msk.f32.vlgmr.msra.gmra.mrb[0].mxu1 %vm305_vm1, %v284_v52 }
  0xa9   : > { %v468_v53 = vpop.permute.xlu0 %467 }
  0xad   : > { %v478_v58 = vpop.permute.xlu0 %477 }
 0x10d   : > { %v388_v54 = vpop.f32.mrb[0].mxu0 }
 0x10e   : > { %v470_v55 = vmul.f32 %v468_v53, %v388_v54  ;;  %v459_v56 = vpop.f32.mrb[0].mxu1  ;;  %v390_v57 = vpop.f32.mrb[1].mxu0 }
 0x10f   : > { %v472_v59 = vmul.f32 %v468_v53, %v459_v56  ;;  %v471_v60 = vmul.f32 %v468_v53, %v390_v57  ;;  %v461_v61 = vpop.f32.mrb[1].mxu1 }
 0x110   : > { %v480_v62 = vadd.f32 %v478_v58, %v470_v55  ;;  %v473_v63 = vmul.f32 %v468_v53, %v461_v61 }
 0x111   : > { %v482_v0 = vadd.f32 %v478_v58, %v472_v59  ;;  %v481_v1 = vadd.f32 %v478_v58, %v471_v60 }
 0x112   : > { %v483_v2 = vadd.f32 %v478_v58, %v473_v63 }
 0x113   : > { %v488_v3 = vcombine.low %v480_v62, %v481_v1 }
 0x114   : > { %v489_v4 = vcombine.low %v482_v0, %v483_v2 }
 0x115   : > { %492 = vst [vmem:[%s282_s10] sm:$0xff] %v488_v3 }
 0x116   : > { %493 = vst [vmem:[%s282_s10 + $0x8] sm:$0xff] %v489_v4 }
 0x117 PF: > { %s14_s21 = sadd.s32 1, %s737_s21   ;;  %s936_s15 = smov %s717_s16 }
 0x118   : > { %p11_p12 = scmp.ge.s32.totalorder %s14_s21, 6   ;;  %s937_s16 = smov %s817_s28 }
 0x119   : > { %s938_s17 = smov %s729_s19  ;;  %s939_s18 = smov %s733_s20 }
 0x11a   : > { %s940_s19 = smov %s943_s22  ;;  %s941_s20 = smov %s947_s23 }
 0x11b   :  { %13 = sbr.rel (!%p11_p12) target bundleno = 4 (0x4), region = 94 }

// kernel: aggregation_forward.23
= control target key start
LH: loop header
LB: loop body
LE: loop exit
PB: predicated region body
PF: predicated region fallthrough
CT: control target
= control target key end

     0   :  { %s969_s15 = smov 0   ;;  %s971_s16 = smov 0   ;;  %s1283_s0 = inlined_call_operand.vmem [shape: f32[12,108], index: 0, kind: input, shape index: {}]   ;;  %s1284_s1 = inlined_call_operand.vmem [shape: f32[12,1], index: 1, kind: input, shape index: {}]   ;;  %s1285_s2 = inlined_call_operand.vmem [shape: f32[12,1], index: 2, kind: input, shape index: {}]   ;;  %s1286_s3 = inlined_call_operand.vmem [shape: f32[2,108,1024], index: 3, kind: input, shape index: {}]   ;;  %s1287_s4 = inlined_call_operand.vmem [shape: f32[2,12,1024], index: 4, kind: output, shape index: {}]  }
   0x1   :  { %s973_s17 = smov 0   ;;  %s975_s18 = smov 0  }
   0x2   :  { %s977_s19 = smov 0   ;;  %s979_s20 = smov 0  }
   0x3   :  { %s981_s21 = smov 0  }
   0x4 LB: > { %s23_s22 = sadd.s32 1, %s931_s19  ;;  %s26_s23 = sadd.s32 1, %s935_s20  ;;  %s939_s21 = sphi %s981_s21, %s14_s21   ;;  %s935_s20 = sphi %s979_s20, %s1294_s20   ;;  %s931_s19 = sphi %s977_s19, %s1293_s19   ;;  %s927_s18 = sphi %s975_s18, %s1292_s18   ;;  %s923_s17 = sphi %s973_s17, %s1291_s17   ;;  %s919_s16 = sphi %s971_s16, %s1290_s16   ;;  %s915_s15 = sphi %s969_s15, %s1289_s15  }
   0x5   : > { %p24_p0 = scmp.ge.s32.totalorder %s23_s22, 2  ;;  %s739_s24 = sadd.s32 4294967295, %s939_s21  }
   0x6   : > { %p105_p1 = scmp.ne.s32.totalorder %s919_s16, %s915_s15  ;;  %p106_p2 = scmp.eq.s32.totalorder %s939_s21, 0 }
   0x7   : > { %s1296_s22 = smov (%p24_p0, %s23_s22), 0  ;;  %s1298_s23 = smov (!%p24_p0, %s26_s23), %s935_s20 }
   0x8   : > { %p28_p3 = scmp.ge.s32.totalorder %s1298_s23, 2  ;;  %p137_p4 = scmp.eq.s32.totalorder %s739_s24, 3 }
   0x9   : > { %s94_s25 = ssub.s32 %s931_s19, %s1296_s22  ;;  %p107_p5 = por %p106_p2, %p105_p1 }
   0xa   : > { %s1300_s23 = smov (%p28_p3, %s1298_s23), 0  ;;  %p1017_p6 = por %p137_p4, %p105_p1 }
   0xb   : > { %s93_s27 = ssub.s32 %s935_s20, %s1300_s23  ;;  %s98_s29 = sadd.s32 1, %s919_s16 }
   0xc   : > { %s95_s28 = sor.u32 %s94_s25, %s93_s27  ;;  %p742_p8 = scmp.ge.s32.totalorder %s939_s21, 4 }
   0xd   : > { %p96_p7 = scmp.eq.s32.totalorder %s95_s28, 0 }
   0xe   : > { %168 = sbr.rel (%p742_p8) target bundleno = 57 (0x39), region = 28 }
   0xf   : > { %s1025_s30 = scalar_select %p96_p7, %s919_s16, %s98_s29  }
  0x15   : > { %171 = sbr.rel (!%p107_p5) target bundleno = 57 (0x39), region = 32  ;;  %s173_s5 = sand.u32 (%p107_p5), 1, %s919_s16  }
  0x16   : > { %s821_s6 = smul.u32 (%p107_p5), 448, %s173_s5  ;;  %s743_s7 = sshll.u32 (%p107_p5), %s931_s19, 2 }
  0x17   : > { %s822_s8 = smul.u32 (%p107_p5), 112, %s935_s20 }
  0x18   : > { %s1039_s14 = scalar_lea.vmem (%p107_p5), [#allocation2], %s821_s6 }
  0x19   : > { %s178_s9 = sadd.s32 (%p107_p5), %s822_s8, %s743_s7 }
  0x1a   : > { %s744_s10 = sshll.u32 (%p107_p5), %s178_s9, 3 }
  0x1b   : > { %s1034_s13 = scalar_lea.vmem (%p107_p5), %s1286_s3, %s744_s10 }
  0x1c   : > { %v193_v0 = vld [vmem:[%s1034_s13] sm:$0xff]  ;;  %v195_v1 = vld [vmem:[%s1034_s13 + $0x8] sm:$0xff]  ;;  %v197_v2 = vld [vmem:[%s1034_s13 + $0x10] sm:$0xff] }
  0x1d   : > { %194 = vst [vmem:[%s1039_s14] sm:$0xff] %v193_v0  ;;  %196 = vst [vmem:[%s1039_s14 + $0x8] sm:$0xff] %v195_v1  ;;  %v199_v3 = vld [vmem:[%s1034_s13 + $0x18] sm:$0xff]  ;;  %v201_v4 = vld [vmem:[%s1034_s13 + $0x40] sm:$0xff] }
  0x1e   : > { %198 = vst [vmem:[%s1039_s14 + $0x10] sm:$0xff] %v197_v2  ;;  %v203_v5 = vld [vmem:[%s1034_s13 + $0x48] sm:$0xff]  ;;  %200 = vst [vmem:[%s1039_s14 + $0x18] sm:$0xff] %v199_v3  ;;  %v205_v6 = vld [vmem:[%s1034_s13 + $0x50] sm:$0xff] }
  0x1f   : > { %202 = vst [vmem:[%s1039_s14 + $0x20] sm:$0xff] %v201_v4  ;;  %204 = vst [vmem:[%s1039_s14 + $0x28] sm:$0xff] %v203_v5  ;;  %v207_v7 = vld [vmem:[%s1034_s13 + $0x58] sm:$0xff]  ;;  %v209_v8 = vld [vmem:[%s1034_s13 + $0x80] sm:$0xff] }
  0x20   : > { %206 = vst [vmem:[%s1039_s14 + $0x30] sm:$0xff] %v205_v6  ;;  %208 = vst [vmem:[%s1039_s14 + $0x38] sm:$0xff] %v207_v7  ;;  %v211_v9 = vld [vmem:[%s1034_s13 + $0x88] sm:$0xff]  ;;  %v213_v10 = vld [vmem:[%s1034_s13 + $0x90] sm:$0xff] }
  0x21   : > { %210 = vst [vmem:[%s1039_s14 + $0x40] sm:$0xff] %v209_v8  ;;  %v215_v11 = vld [vmem:[%s1034_s13 + $0x98] sm:$0xff]  ;;  %212 = vst [vmem:[%s1039_s14 + $0x48] sm:$0xff] %v211_v9  ;;  %v217_v12 = vld [vmem:[%s1034_s13 + $0xc0] sm:$0xff] }
  0x22   : > { %214 = vst [vmem:[%s1039_s14 + $0x50] sm:$0xff] %v213_v10  ;;  %216 = vst [vmem:[%s1039_s14 + $0x58] sm:$0xff] %v215_v11  ;;  %v219_v13 = vld [vmem:[%s1034_s13 + $0xc8] sm:$0xff]  ;;  %v221_v14 = vld [vmem:[%s1034_s13 + $0xd0] sm:$0xff] }
  0x23   : > { %218 = vst [vmem:[%s1039_s14 + $0x60] sm:$0xff] %v217_v12  ;;  %220 = vst [vmem:[%s1039_s14 + $0x68] sm:$0xff] %v219_v13  ;;  %v223_v15 = vld [vmem:[%s1034_s13 + $0xd8] sm:$0xff]  ;;  %v225_v16 = vld [vmem:[%s1034_s13 + $0x100] sm:$0xff] }
  0x24   : > { %222 = vst [vmem:[%s1039_s14 + $0x70] sm:$0xff] %v221_v14  ;;  %v227_v17 = vld [vmem:[%s1034_s13 + $0x108] sm:$0xff]  ;;  %224 = vst [vmem:[%s1039_s14 + $0x78] sm:$0xff] %v223_v15  ;;  %v229_v18 = vld [vmem:[%s1034_s13 + $0x110] sm:$0xff] }
  0x25   : > { %226 = vst [vmem:[%s1039_s14 + $0x80] sm:$0xff] %v225_v16  ;;  %228 = vst [vmem:[%s1039_s14 + $0x88] sm:$0xff] %v227_v17  ;;  %v231_v19 = vld [vmem:[%s1034_s13 + $0x118] sm:$0xff]  ;;  %v233_v20 = vld [vmem:[%s1034_s13 + $0x140] sm:$0xff] }
  0x26   : > { %230 = vst [vmem:[%s1039_s14 + $0x90] sm:$0xff] %v229_v18  ;;  %232 = vst [vmem:[%s1039_s14 + $0x98] sm:$0xff] %v231_v19  ;;  %v235_v21 = vld [vmem:[%s1034_s13 + $0x148] sm:$0xff]  ;;  %v237_v22 = vld [vmem:[%s1034_s13 + $0x150] sm:$0xff] }
  0x27   : > { %234 = vst [vmem:[%s1039_s14 + $0xa0] sm:$0xff] %v233_v20  ;;  %v239_v23 = vld [vmem:[%s1034_s13 + $0x158] sm:$0xff]  ;;  %236 = vst [vmem:[%s1039_s14 + $0xa8] sm:$0xff] %v235_v21  ;;  %v241_v24 = vld [vmem:[%s1034_s13 + $0x180] sm:$0xff] }
  0x28   : > { %238 = vst [vmem:[%s1039_s14 + $0xb0] sm:$0xff] %v237_v22  ;;  %240 = vst [vmem:[%s1039_s14 + $0xb8] sm:$0xff] %v239_v23  ;;  %v243_v25 = vld [vmem:[%s1034_s13 + $0x188] sm:$0xff]  ;;  %v245_v26 = vld [vmem:[%s1034_s13 + $0x190] sm:$0xff] }
  0x29   : > { %242 = vst [vmem:[%s1039_s14 + $0xc0] sm:$0xff] %v241_v24  ;;  %244 = vst [vmem:[%s1039_s14 + $0xc8] sm:$0xff] %v243_v25  ;;  %v247_v27 = vld [vmem:[%s1034_s13 + $0x198] sm:$0xff]  ;;  %v249_v28 = vld [vmem:[%s1034_s13 + $0x1c0] sm:$0xff] }
  0x2a   : > { %246 = vst [vmem:[%s1039_s14 + $0xd0] sm:$0xff] %v245_v26  ;;  %v251_v29 = vld [vmem:[%s1034_s13 + $0x1c8] sm:$0xff]  ;;  %248 = vst [vmem:[%s1039_s14 + $0xd8] sm:$0xff] %v247_v27  ;;  %v253_v30 = vld [vmem:[%s1034_s13 + $0x1d0] sm:$0xff] }
  0x2b   : > { %250 = vst [vmem:[%s1039_s14 + $0xe0] sm:$0xff] %v249_v28  ;;  %252 = vst [vmem:[%s1039_s14 + $0xe8] sm:$0xff] %v251_v29  ;;  %v255_v31 = vld [vmem:[%s1034_s13 + $0x1d8] sm:$0xff]  ;;  %v257_v32 = vld [vmem:[%s1034_s13 + $0x200] sm:$0xff] }
  0x2c   : > { %254 = vst [vmem:[%s1039_s14 + $0xf0] sm:$0xff] %v253_v30  ;;  %256 = vst [vmem:[%s1039_s14 + $0xf8] sm:$0xff] %v255_v31  ;;  %v259_v33 = vld [vmem:[%s1034_s13 + $0x208] sm:$0xff]  ;;  %v261_v34 = vld [vmem:[%s1034_s13 + $0x210] sm:$0xff] }
  0x2d   : > { %258 = vst [vmem:[%s1039_s14 + $0x100] sm:$0xff] %v257_v32  ;;  %v263_v35 = vld [vmem:[%s1034_s13 + $0x218] sm:$0xff]  ;;  %260 = vst [vmem:[%s1039_s14 + $0x108] sm:$0xff] %v259_v33  ;;  %v265_v36 = vld [vmem:[%s1034_s13 + $0x240] sm:$0xff] }
  0x2e   : > { %262 = vst [vmem:[%s1039_s14 + $0x110] sm:$0xff] %v261_v34  ;;  %264 = vst [vmem:[%s1039_s14 + $0x118] sm:$0xff] %v263_v35  ;;  %v267_v37 = vld [vmem:[%s1034_s13 + $0x248] sm:$0xff]  ;;  %v269_v38 = vld [vmem:[%s1034_s13 + $0x250] sm:$0xff] }
  0x2f   : > { %266 = vst [vmem:[%s1039_s14 + $0x120] sm:$0xff] %v265_v36  ;;  %268 = vst [vmem:[%s1039_s14 + $0x128] sm:$0xff] %v267_v37  ;;  %v271_v39 = vld [vmem:[%s1034_s13 + $0x258] sm:$0xff]  ;;  %v273_v40 = vld [vmem:[%s1034_s13 + $0x280] sm:$0xff] }
  0x30   : > { %270 = vst [vmem:[%s1039_s14 + $0x130] sm:$0xff] %v269_v38  ;;  %v275_v41 = vld [vmem:[%s1034_s13 + $0x288] sm:$0xff]  ;;  %272 = vst [vmem:[%s1039_s14 + $0x138] sm:$0xff] %v271_v39  ;;  %v277_v42 = vld [vmem:[%s1034_s13 + $0x290] sm:$0xff] }
  0x31   : > { %274 = vst [vmem:[%s1039_s14 + $0x140] sm:$0xff] %v273_v40  ;;  %276 = vst [vmem:[%s1039_s14 + $0x148] sm:$0xff] %v275_v41  ;;  %v279_v43 = vld [vmem:[%s1034_s13 + $0x298] sm:$0xff]  ;;  %v281_v44 = vld [vmem:[%s1034_s13 + $0x2c0] sm:$0xff] }
  0x32   : > { %278 = vst [vmem:[%s1039_s14 + $0x150] sm:$0xff] %v277_v42  ;;  %280 = vst [vmem:[%s1039_s14 + $0x158] sm:$0xff] %v279_v43  ;;  %v283_v45 = vld [vmem:[%s1034_s13 + $0x2c8] sm:$0xff]  ;;  %v285_v46 = vld [vmem:[%s1034_s13 + $0x2d0] sm:$0xff] }
  0x33   : > { %282 = vst [vmem:[%s1039_s14 + $0x160] sm:$0xff] %v281_v44  ;;  %v287_v47 = vld [vmem:[%s1034_s13 + $0x2d8] sm:$0xff]  ;;  %284 = vst [vmem:[%s1039_s14 + $0x168] sm:$0xff] %v283_v45  ;;  %v289_v48 = vld [vmem:[%s1034_s13 + $0x300] sm:$0xff] }
  0x34   : > { %286 = vst [vmem:[%s1039_s14 + $0x170] sm:$0xff] %v285_v46  ;;  %288 = vst [vmem:[%s1039_s14 + $0x178] sm:$0xff] %v287_v47  ;;  %v291_v49 = vld [vmem:[%s1034_s13 + $0x308] sm:$0xff]  ;;  %v293_v50 = vld [vmem:[%s1034_s13 + $0x310] sm:$0xff] }
  0x35   : > { %290 = vst [vmem:[%s1039_s14 + $0x180] sm:$0xff] %v289_v48  ;;  %292 = vst [vmem:[%s1039_s14 + $0x188] sm:$0xff] %v291_v49  ;;  %v295_v51 = vld [vmem:[%s1034_s13 + $0x318] sm:$0xff]  ;;  %v297_v52 = vld [vmem:[%s1034_s13 + $0x340] sm:$0xff] }
  0x36   : > { %294 = vst [vmem:[%s1039_s14 + $0x190] sm:$0xff] %v293_v50  ;;  %v299_v53 = vld [vmem:[%s1034_s13 + $0x348] sm:$0xff]  ;;  %296 = vst [vmem:[%s1039_s14 + $0x198] sm:$0xff] %v295_v51  ;;  %v301_v54 = vld [vmem:[%s1034_s13 + $0x350] sm:$0xff] }
  0x37   : > { %298 = vst [vmem:[%s1039_s14 + $0x1a0] sm:$0xff] %v297_v52  ;;  %300 = vst [vmem:[%s1039_s14 + $0x1a8] sm:$0xff] %v299_v53  ;;  %v303_v55 = vld [vmem:[%s1034_s13 + $0x358] sm:$0xff] }
  0x38   : > { %302 = vst [vmem:[%s1039_s14 + $0x1b0] sm:$0xff] %v301_v54  ;;  %304 = vst [vmem:[%s1039_s14 + $0x1b8] sm:$0xff] %v303_v55 }
  0x39 PF: > { %p745_p9 = scmp.ge.s32.totalorder %s939_s21, 1  ;;  %p309_p10 = scmp.lt.s32.totalorder %s939_s21, 5 }
  0x3b   : > { %p310_p11 = pnand %p745_p9, %p309_p10 }
  0x3c   : > { %s316_s24 = sand.u32 (!%p310_p11), 1, %s915_s15   ;;  %v941_v56 = vmov (!%p310_p11), 0.0   ;;  %v574_v57 = vld [vmem:[%s1284_s1] sm:$0xff] (!%p310_p11)  ;;  %v942_v58 = vmov (!%p310_p11), 0   ;;  %v575_v60 = vld [vmem:[%s1284_s1 + $0x8] sm:$0xf] (!%p310_p11) }
  0x3d   : > { %313 = sbr.rel (%p310_p11) target bundleno = 328 (0x148), region = 55  ;;  %484 = vmatprep.mubr.f32.mxu0 (!%p310_p11), %v941_v56  ;;  %561 = vmatprep.mubr.f32.mxu1 (!%p310_p11), %v941_v56  ;;  %v594_v59 = vld [vmem:[%s1285_s2] sm:$0xff] (!%p310_p11)  ;;  %v595_v0 = vld [vmem:[%s1285_s2 + $0x8] sm:$0xf] (!%p310_p11)  ;;  %vm407_vm0 = vcmask (!%p310_p11), 1043456   ;;  %vm943_vm1 = vmmov (!%p310_p11), 1  }
  0x3e   : > { %s823_s25 = smul.u32 (!%p310_p11), 448, %s316_s24  ;;  %883 = vset.pattern.permute.xlu0 (!%p310_p11), %v942_v58  ;;  %884 = vset.pattern.permute.xlu1 (!%p310_p11), %v942_v58  ;;  %vm786_vm2 = vmpackc.low (!%p310_p11), %vm407_vm0, %vm943_vm1  ;;  %vm400_vm3 = vcmask (!%p310_p11), 883712  }
  0x3f   : > { %578 = vperm.xlu0 (!%p310_p11), %883, %v574_v57   ;;  %598 = vperm.xlu1 (!%p310_p11), %884, %v594_v59  }
  0x40   : > { %s1166_s8 = scalar_lea.vmem (!%p310_p11), [#allocation2], %s823_s25  ;;  %s746_s25 = sshll.u32 (!%p310_p11), %s316_s24, 6 }
  0x41   : > { %v345_v61 = vld [vmem:[%s1166_s8 + $0x8] sm:$0xff] (!%p310_p11)  ;;  %v347_v63 = vld [vmem:[%s1166_s8 + $0x18] sm:$0xff] (!%p310_p11)  ;;  %v344_v3 = vld [vmem:[%s1166_s8] sm:$0xff] (!%p310_p11)  ;;  %s1237_s27 = scalar_lea.vmem (!%p310_p11), [#allocation3], %s746_s25 }
  0x42   : > { %v349_v62 = vld [vmem:[%s1166_s8 + $0x28] sm:$0xff] (!%p310_p11)  ;;  %v351_v2 = vld [vmem:[%s1166_s8 + $0x38] sm:$0xff] (!%p310_p11)  ;;  %v348_v4 = vld [vmem:[%s1166_s8 + $0x20] sm:$0xff] (!%p310_p11) }
  0x43   : > { %v761_v1 = vpack.c.bf16 (!%p310_p11), %v349_v62, %v345_v61  ;;  %v791_v5 = vpack.c.bf16 (!%p310_p11), %v351_v2, %v347_v63  ;;  %v763_v6 = vpack.c.bf16 (!%p310_p11), %v348_v4, %v344_v3  ;;  %v346_v7 = vld [vmem:[%s1166_s8 + $0x10] sm:$0xff] (!%p310_p11)  ;;  %v353_v9 = vld [vmem:[%s1166_s8 + $0x48] sm:$0xff] (!%p310_p11)  ;;  %v355_v12 = vld [vmem:[%s1166_s8 + $0x58] sm:$0xff] (!%p310_p11)  ;;  %583 = vperm.xlu0 (!%p310_p11), %883, %v575_v60   ;;  %603 = vperm.xlu1 (!%p310_p11), %884, %v595_v0  }
  0x44   : > { %v350_v8 = vld [vmem:[%s1166_s8 + $0x30] sm:$0xff]  ;;  %v357_v11 = vld [vmem:[%s1166_s8 + $0x68] sm:$0xff]  ;;  %v359_v13 = vld [vmem:[%s1166_s8 + $0x78] sm:$0xff]  ;;  %s756_s15 = sshll.u32 (%p1017_p6), %s923_s17, 2  ;;  %s757_s24 = sshll.u32 (%p1017_p6), %s927_s18, 4 }
  0x45   : > { %762 = vmatprep.subr.bf16.mxu0 %v761_v1  ;;  %v793_v10 = vpack.c.bf16 %v350_v8, %v346_v7  ;;  %792 = vmatprep.subr.bf16.mxu1 %v791_v5  ;;  %v765_v14 = vpack.c.bf16 %v357_v11, %v353_v9  ;;  %v795_v15 = vpack.c.bf16 %v359_v13, %v355_v12  ;;  %v352_v16 = vld [vmem:[%s1166_s8 + $0x40] sm:$0xff]  ;;  %v354_v18 = vld [vmem:[%s1166_s8 + $0x50] sm:$0xff]  ;;  %v361_v21 = vld [vmem:[%s1166_s8 + $0x88] sm:$0xff]  ;;  %s631_s28 = sadd.s32 (%p1017_p6), %s757_s24, %s756_s15 }
  0x46   : > { %764 = vmatpush1.bf16.msra.mxu0 %v763_v6  ;;  %v356_v17 = vld [vmem:[%s1166_s8 + $0x60] sm:$0xff]  ;;  %v358_v20 = vld [vmem:[%s1166_s8 + $0x70] sm:$0xff]  ;;  %v365_v22 = vld [vmem:[%s1166_s8 + $0xa8] sm:$0xff]  ;;  %s758_s26 = sshll.u32 (%p1017_p6), %s631_s28, 3 }
  0x47   : > { %794 = vmatpush1.bf16.msra.mxu1 %v793_v10  ;;  %v767_v19 = vpack.c.bf16 %v356_v17, %v352_v16  ;;  %766 = vmatprep.subr.bf16.mxu0 %v765_v14  ;;  %v797_v23 = vpack.c.bf16 %v358_v20, %v354_v18  ;;  %v769_v24 = vpack.c.bf16 %v365_v22, %v361_v21  ;;  %v363_v25 = vld [vmem:[%s1166_s8 + $0x98] sm:$0xff]  ;;  %v360_v27 = vld [vmem:[%s1166_s8 + $0x80] sm:$0xff]  ;;  %v362_v30 = vld [vmem:[%s1166_s8 + $0x90] sm:$0xff]  ;;  %s633_s6 = scalar_lea.vmem (%p1017_p6), %s1287_s4, %s758_s26 }
  0x48   : > { %796 = vmatprep.subr.bf16.mxu1 %v795_v15  ;;  %v367_v26 = vld [vmem:[%s1166_s8 + $0xb8] sm:$0xff]  ;;  %v364_v29 = vld [vmem:[%s1166_s8 + $0xa0] sm:$0xff]  ;;  %v366_v31 = vld [vmem:[%s1166_s8 + $0xb0] sm:$0xff] }
  0x49   : > { %v799_v28 = vpack.c.bf16 %v367_v26, %v363_v25  ;;  %v771_v32 = vpack.c.bf16 %v364_v29, %v360_v27  ;;  %v369_v33 = vld [vmem:[%s1166_s8 + $0xc8] sm:$0xff]  ;;  %v371_v35 = vld [vmem:[%s1166_s8 + $0xd8] sm:$0xff]  ;;  %v801_v36 = vpack.c.bf16 %v366_v31, %v362_v30  ;;  %v368_v39 = vld [vmem:[%s1166_s8 + $0xc0] sm:$0xff] }
  0x4a   : > { %768 = vmatpush1.bf16.msra.mxu0 %v767_v19  ;;  %v373_v34 = vld [vmem:[%s1166_s8 + $0xe8] sm:$0xff]  ;;  %v375_v38 = vld [vmem:[%s1166_s8 + $0xf8] sm:$0xff]  ;;  %v372_v40 = vld [vmem:[%s1166_s8 + $0xe0] sm:$0xff] }
  0x4b   : > { %798 = vmatpush1.bf16.msra.mxu1 %v797_v23  ;;  %770 = vmatprep.subr.bf16.mxu0 %v769_v24  ;;  %v773_v37 = vpack.c.bf16 %v373_v34, %v369_v33  ;;  %v803_v41 = vpack.c.bf16 %v375_v38, %v371_v35  ;;  %v370_v42 = vld [vmem:[%s1166_s8 + $0xd0] sm:$0xff]  ;;  %v377_v44 = vld [vmem:[%s1166_s8 + $0x108] sm:$0xff]  ;;  %v379_v46 = vld [vmem:[%s1166_s8 + $0x118] sm:$0xff]  ;;  %v775_v48 = vpack.c.bf16 %v372_v40, %v368_v39 }
  0x4c   : > { %800 = vmatprep.subr.bf16.mxu1 %v799_v28  ;;  %v374_v43 = vld [vmem:[%s1166_s8 + $0xf0] sm:$0xff]  ;;  %v381_v45 = vld [vmem:[%s1166_s8 + $0x128] sm:$0xff]  ;;  %v383_v47 = vld [vmem:[%s1166_s8 + $0x138] sm:$0xff] }
  0x4d   : > { %v805_v49 = vpack.c.bf16 %v374_v43, %v370_v42  ;;  %v777_v50 = vpack.c.bf16 %v381_v45, %v377_v44  ;;  %v376_v51 = vld [vmem:[%s1166_s8 + $0x100] sm:$0xff]  ;;  %v378_v53 = vld [vmem:[%s1166_s8 + $0x110] sm:$0xff]  ;;  %v807_v54 = vpack.c.bf16 %v383_v47, %v379_v46  ;;  %v385_v57 = vld [vmem:[%s1166_s8 + $0x148] sm:$0xff] }
  0x4e   : > { %772 = vmatpush1.bf16.msra.mxu0 %v771_v32  ;;  %v380_v52 = vld [vmem:[%s1166_s8 + $0x120] sm:$0xff]  ;;  %v382_v55 = vld [vmem:[%s1166_s8 + $0x130] sm:$0xff]  ;;  %v389_v58 = vld [vmem:[%s1166_s8 + $0x168] sm:$0xff] }
  0x4f   : > { %802 = vmatpush1.bf16.msra.mxu1 %v801_v36  ;;  %774 = vmatprep.subr.bf16.mxu0 %v773_v37  ;;  %v387_v59 = vld [vmem:[%s1166_s8 + $0x158] sm:$0xff]  ;;  %v779_v61 = vpack.c.bf16 %v380_v52, %v376_v51  ;;  %v809_v62 = vpack.c.bf16 %v382_v55, %v378_v53  ;;  %v781_v63 = vpack.c.bf16 %v389_v58, %v385_v57  ;;  %v384_v0 = vld [vmem:[%s1166_s8 + $0x140] sm:$0xff]  ;;  %v386_v2 = vld [vmem:[%s1166_s8 + $0x150] sm:$0xff] }
  0x50   : > { %804 = vmatprep.subr.bf16.mxu1 %v803_v41  ;;  %v391_v60 = vld [vmem:[%s1166_s8 + $0x178] sm:$0xff]  ;;  %v388_v1 = vld [vmem:[%s1166_s8 + $0x160] sm:$0xff]  ;;  %v390_v4 = vld [vmem:[%s1166_s8 + $0x170] sm:$0xff] }
  0x51   : > { %v811_v3 = vpack.c.bf16 %v391_v60, %v387_v59  ;;  %v393_v5 = vld [vmem:[%s1166_s8 + $0x188] sm:$0xff]  ;;  %v395_v7 = vld [vmem:[%s1166_s8 + $0x198] sm:$0xff]  ;;  %v783_v9 = vpack.c.bf16 %v388_v1, %v384_v0  ;;  %v813_v10 = vpack.c.bf16 %v390_v4, %v386_v2  ;;  %v392_v12 = vld [vmem:[%s1166_s8 + $0x180] sm:$0xff] }
  0x52   : > { %776 = vmatpush1.bf16.msra.mxu0 %v775_v48  ;;  %v397_v6 = vld [vmem:[%s1166_s8 + $0x1a8] sm:$0xf]  ;;  %v399_v8 = vld [vmem:[%s1166_s8 + $0x1b8] sm:$0xf]  ;;  %v396_v13 = vld [vmem:[%s1166_s8 + $0x1a0] sm:$0xf] }
  0x53   : > { %806 = vmatpush1.bf16.msra.mxu1 %v805_v49  ;;  %778 = vmatprep.subr.bf16.mxu0 %v777_v50  ;;  %v785_v11 = vpack.c.bf16 %v397_v6, %v393_v5  ;;  %v815_v14 = vpack.c.bf16 %v399_v8, %v395_v7  ;;  %v394_v15 = vld [vmem:[%s1166_s8 + $0x190] sm:$0xff]  ;;  %v788_v17 = vpack.c.bf16 %v396_v13, %v392_v12  ;;  %v342_v19 = vld [vmem:[%s1283_s0] sm:$0xff]  ;;  %v343_v20 = vld [vmem:[%s1283_s0 + $0x8] sm:$0xf] }
  0x54   : > { %808 = vmatprep.subr.bf16.mxu1 %v807_v54  ;;  %v398_v16 = vld [vmem:[%s1166_s8 + $0x1b0] sm:$0xf] }
  0x55   : > { %v818_v18 = vpack.c.bf16 %v398_v16, %v394_v15 }
  0x56   : > { %780 = vmatpush1.bf16.msra.mxu0 %v779_v61 }
  0x57   : > { %810 = vmatpush1.bf16.msra.mxu1 %v809_v62  ;;  %782 = vmatprep.subr.bf16.mxu0 %v781_v63 }
  0x58   : > { %812 = vmatprep.subr.bf16.mxu1 %v811_v3 }
  0x5a   : > { %784 = vmatpush1.bf16.msra.mxu0 %v783_v9 }
  0x5b   : > { %814 = vmatpush1.bf16.msra.mxu1 %v813_v10  ;;  %787 = vmatprep.subr.msk.bf16.mxu0 %vm786_vm2, %v785_v11 }
  0x5c   : > { %817 = vmatprep.subr.msk.bf16.mxu1 %vm786_vm2, %v815_v14 }
  0x5e   : > { %790 = vmatpush1.bf16.msk.msra.mxu0 %vm786_vm2, %v788_v17 }
  0x5f   : > { %820 = vmatpush1.bf16.msk.msra.mxu1 %vm786_vm2, %v818_v18 }
  0x61   : > { %749 = vmatmul.mubr.msk.f32.vlgmr.msra.gmra.mrb[0].mxu0 %vm400_vm3, %v342_v19 }
  0x62   : > { %753 = vmatmul.mubr.msk.f32.vlgmr.msra.gmra.mrb[0].mxu1 %vm400_vm3, %v342_v19  ;;  %490 = vmatprep.mubr.f32.mxu0 %v941_v56 }
  0x63   : > { %567 = vmatprep.mubr.f32.mxu1 %v941_v56 }
  0x65   : > { %750 = vmatmul.mubr.msk.f32.gmra.mrb[2].mxu0 %vm400_vm3, %v343_v20 }
  0x66   : > { %754 = vmatmul.mubr.msk.f32.gmra.mrb[2].mxu1 %vm400_vm3, %v343_v20 }
  0xbe   : > { %v579_v21 = vpop.permute.xlu0 %578  ;;  %v599_v22 = vpop.permute.xlu1 %598 }
  0xc2   : > { %v584_v33 = vpop.permute.xlu0 %583  ;;  %v604_v39 = vpop.permute.xlu1 %603 }
 0x134   : > { %v486_v23 = vpop.f32.mrb[0].mxu0 }
 0x135   : > { %v586_v24 = vmul.f32 %v579_v21, %v486_v23  ;;  %v563_v25 = vpop.f32.mrb[0].mxu1  ;;  %v488_v26 = vpop.f32.mrb[1].mxu0 }
 0x136   : > { %v588_v27 = vmul.f32 %v579_v21, %v563_v25  ;;  %v587_v28 = vmul.f32 %v579_v21, %v488_v26  ;;  %v565_v29 = vpop.f32.mrb[1].mxu1 }
 0x137   : > { %v606_v30 = vadd.f32 %v599_v22, %v586_v24  ;;  %v589_v31 = vmul.f32 %v579_v21, %v565_v29 }
 0x138   : > { %v608_v32 = vadd.f32 %v599_v22, %v588_v27  ;;  %v607_v34 = vadd.f32 %v599_v22, %v587_v28  ;;  %v492_v35 = vpop.f32.mrb[2].mxu0 }
 0x139   : > { %614 = vst [vmem:[%s1237_s27] sm:$0xff] %v606_v30  ;;  %v609_v56 = vadd.f32 %v599_v22, %v589_v31  ;;  %v590_v36 = vmul.f32 %v584_v33, %v492_v35  ;;  %v569_v37 = vpop.f32.mrb[2].mxu1  ;;  %v494_v38 = vpop.f32.mrb[3].mxu0  ;;  %628 = sbr.rel (!%p1017_p6) target bundleno = 328 (0x148), region = 63 }
 0x13a   : > { %616 = vst [vmem:[%s1237_s27 + $0x10] sm:$0xff] %v608_v32  ;;  %615 = vst [vmem:[%s1237_s27 + $0x8] sm:$0xff] %v607_v34  ;;  %v592_v40 = vmul.f32 %v584_v33, %v569_v37  ;;  %v591_v41 = vmul.f32 %v584_v33, %v494_v38  ;;  %v571_v42 = vpop.f32.mrb[3].mxu1 }
 0x13b   : > { %617 = vst [vmem:[%s1237_s27 + $0x18] sm:$0xff] %v609_v56  ;;  %v610_v43 = vadd.f32 %v604_v39, %v590_v36  ;;  %v593_v44 = vmul.f32 %v584_v33, %v571_v42 }
 0x13c   : > { %v612_v45 = vadd.f32 %v604_v39, %v592_v40  ;;  %v611_v46 = vadd.f32 %v604_v39, %v591_v41 }
 0x13d   : > { %618 = vst [vmem:[%s1237_s27 + $0x20] sm:$0xf] %v610_v43  ;;  %v613_v47 = vadd.f32 %v604_v39, %v593_v44 }
 0x13e   : > { %620 = vst [vmem:[%s1237_s27 + $0x30] sm:$0xf] %v612_v45  ;;  %619 = vst [vmem:[%s1237_s27 + $0x28] sm:$0xf] %v611_v46 }
 0x13f   : > { %621 = vst [vmem:[%s1237_s27 + $0x38] sm:$0xf] %v613_v47 }
 0x140   : > { %v646_v48 = vld [vmem:[%s1237_s27] sm:$0xff] }
 0x141   : > { %v648_v49 = vld [vmem:[%s1237_s27 + $0x8] sm:$0xff]  ;;  %v650_v50 = vld [vmem:[%s1237_s27 + $0x10] sm:$0xff]  ;;  %647 = vst [vmem:[%s633_s6] sm:$0xff] %v646_v48 }
 0x142   : > { %v652_v51 = vld [vmem:[%s1237_s27 + $0x18] sm:$0xff]  ;;  %649 = vst [vmem:[%s633_s6 + $0x8] sm:$0xff] %v648_v49  ;;  %651 = vst [vmem:[%s633_s6 + $0x10] sm:$0xff] %v650_v50 }
 0x143   : > { %653 = vst [vmem:[%s633_s6 + $0x18] sm:$0xff] %v652_v51 }
 0x144   : > { %v654_v52 = vld [vmem:[%s1237_s27 + $0x20] sm:$0xff] }
 0x145   : > { %v656_v53 = vld [vmem:[%s1237_s27 + $0x28] sm:$0xff]  ;;  %v658_v54 = vld [vmem:[%s1237_s27 + $0x30] sm:$0xff]  ;;  %655 = vst [vmem:[%s633_s6 + $0x40] sm:$0xff] %v654_v52 }
 0x146   : > { %v660_v55 = vld [vmem:[%s1237_s27 + $0x38] sm:$0xff]  ;;  %657 = vst [vmem:[%s633_s6 + $0x48] sm:$0xff] %v656_v53  ;;  %659 = vst [vmem:[%s633_s6 + $0x50] sm:$0xff] %v658_v54 }
 0x147   : > { %661 = vst [vmem:[%s633_s6 + $0x58] sm:$0xff] %v660_v55 }
 0x148 PF: > { %s14_s21 = sadd.s32 1, %s939_s21   ;;  %s1289_s15 = smov %s919_s16 }
 0x149   : > { %p11_p12 = scmp.ge.s32.totalorder %s14_s21, 6   ;;  %s1290_s16 = smov %s1025_s30 }
 0x14a   : > { %s1291_s17 = smov %s931_s19  ;;  %s1292_s18 = smov %s935_s20 }
 0x14b   : > { %s1293_s19 = smov %s1296_s22  ;;  %s1294_s20 = smov %s1300_s23 }
 0x14c   :  { %13 = sbr.rel (!%p11_p12) target bundleno = 4 (0x4), region = 117 }

// kernel: aggregation_forward.25
= control target key start
LH: loop header
LB: loop body
LE: loop exit
PB: predicated region body
PF: predicated region fallthrough
CT: control target
= control target key end

     0   :  { %s868_s0 = inlined_call_operand.vmem [shape: f32[1,12], index: 0, kind: input, shape index: {}]   ;;  %s869_s1 = inlined_call_operand.<no memory space> [shape: f32[1,1], index: 1, kind: input, shape index: {}]   ;;  %s870_s3 = inlined_call_operand.vmem [shape: f32[2,12,1024], index: 3, kind: input, shape index: {}]   ;;  %s871_s4 = inlined_call_operand.vmem [shape: f32[2,1,1024], index: 4, kind: output, shape index: {}]   ;;  %s872_s2 = inlined_call_operand.<no memory space> [shape: f32[1,1], index: 2, kind: input, shape index: {}]  }
   0x1   :  { %v9_v0 = vstv %s869_s1  ;;  %v11_v1 = vstv %s872_s2 }
   0x2   :  { %10 = vst [vmem:[#allocation2] sm:$0x1] %v9_v0  ;;  %12 = vst [vmem:[#allocation3] sm:$0x1] %v11_v1 }
   0x3   :  { %s763_s19 = smov 0   ;;  %s765_s20 = smov 0  }
   0x4   :  { %s767_s21 = smov 0   ;;  %s769_s22 = smov 0  }
   0x5   :  { %s771_s23 = smov 0   ;;  %s773_s24 = smov 0  }
   0x6   :  { %s775_s25 = smov 0  }
   0x7 LB: > { %s27_s1 = sadd.s32 1, %s718_s23  ;;  %s30_s2 = sadd.s32 1, %s722_s24  ;;  %s726_s25 = sphi %s775_s25, %s18_s25   ;;  %s722_s24 = sphi %s773_s24, %s880_s24   ;;  %s718_s23 = sphi %s771_s23, %s879_s23   ;;  %s714_s22 = sphi %s769_s22, %s878_s22   ;;  %s710_s21 = sphi %s767_s21, %s877_s21   ;;  %s706_s20 = sphi %s765_s20, %s876_s20   ;;  %s702_s19 = sphi %s763_s19, %s875_s19  }
   0x8   : > { %p28_p0 = scmp.ge.s32.totalorder %s27_s1, 2  ;;  %p109_p1 = scmp.ne.s32.totalorder %s706_s20, %s702_s19 }
   0x9   : > { %p110_p2 = scmp.eq.s32.totalorder %s726_s25, 0  ;;  %s102_s29 = sadd.s32 1, %s706_s20 }
   0xa   : > { %s882_s1 = smov (%p28_p0, %s27_s1), 0  ;;  %s884_s2 = smov (!%p28_p0, %s30_s2), %s722_s24 }
   0xb   : > { %p111_p3 = por %p110_p2, %p109_p1  ;;  %p32_p4 = scmp.ge.s32.totalorder %s884_s2, 2 }
   0xc   : > { %s98_s26 = ssub.s32 %s718_s23, %s882_s1  ;;  %p582_p6 = scmp.ge.s32.totalorder %s726_s25, 4 }
   0xd   : > { %s886_s2 = smov (%p32_p4, %s884_s2), 0 }
   0xe   : > { %s97_s27 = ssub.s32 %s722_s24, %s886_s2  ;;  %172 = sbr.rel (%p582_p6) target bundleno = 32 (0x20), region = 28 }
   0xf   : > { %s99_s28 = sor.u32 %s98_s26, %s97_s27 }
  0x10   : > { %p100_p5 = scmp.eq.s32.totalorder %s99_s28, 0 }
  0x12   : > { %s814_s30 = scalar_select %p100_p5, %s706_s20, %s102_s29  }
  0x15   : > { %175 = sbr.rel (!%p111_p3) target bundleno = 32 (0x20), region = 32  ;;  %s177_s5 = sand.u32 (%p111_p3), 1, %s706_s20  }
  0x16   : > { %s584_s6 = sshll.u32 (%p111_p3), %s718_s23, 2  ;;  %s583_s7 = sshll.u32 (%p111_p3), %s177_s5, 6 }
  0x17   : > { %s585_s8 = sshll.u32 (%p111_p3), %s722_s24, 4  ;;  %s179_s14 = scalar_lea.vmem (%p111_p3), [#allocation4], %s583_s7 }
  0x18   : > { %s182_s9 = sadd.s32 (%p111_p3), %s585_s8, %s584_s6 }
  0x19   : > { %s586_s10 = sshll.u32 (%p111_p3), %s182_s9, 3 }
  0x1a   : > { %s184_s13 = scalar_lea.vmem (%p111_p3), %s870_s3, %s586_s10 }
  0x1b   : > { %v197_v2 = vld [vmem:[%s184_s13] sm:$0xff] (%p111_p3)  ;;  %v199_v3 = vld [vmem:[%s184_s13 + $0x8] sm:$0xff] (%p111_p3)  ;;  %v201_v4 = vld [vmem:[%s184_s13 + $0x10] sm:$0xff] (%p111_p3) }
  0x1c   : > { %198 = vst [vmem:[%s179_s14] sm:$0xff] %v197_v2  ;;  %200 = vst [vmem:[%s179_s14 + $0x8] sm:$0xff] %v199_v3  ;;  %v203_v5 = vld [vmem:[%s184_s13 + $0x18] sm:$0xff]  ;;  %v205_v6 = vld [vmem:[%s184_s13 + $0x40] sm:$0xff] }
  0x1d   : > { %202 = vst [vmem:[%s179_s14 + $0x10] sm:$0xff] %v201_v4  ;;  %v207_v7 = vld [vmem:[%s184_s13 + $0x48] sm:$0xff]  ;;  %204 = vst [vmem:[%s179_s14 + $0x18] sm:$0xff] %v203_v5  ;;  %v209_v8 = vld [vmem:[%s184_s13 + $0x50] sm:$0xff] }
  0x1e   : > { %206 = vst [vmem:[%s179_s14 + $0x20] sm:$0xff] %v205_v6  ;;  %208 = vst [vmem:[%s179_s14 + $0x28] sm:$0xff] %v207_v7  ;;  %v211_v9 = vld [vmem:[%s184_s13 + $0x58] sm:$0xff] }
  0x1f   : > { %210 = vst [vmem:[%s179_s14 + $0x30] sm:$0xff] %v209_v8  ;;  %212 = vst [vmem:[%s179_s14 + $0x38] sm:$0xff] %v211_v9 }
  0x20 PF: > { %p587_p7 = scmp.ge.s32.totalorder %s726_s25, 1  ;;  %p217_p8 = scmp.lt.s32.totalorder %s726_s25, 5 }
  0x22   : > { %p218_p9 = pnand %p587_p7, %p217_p8 }
  0x23   : > { %s224_s15 = sand.u32 (!%p218_p9), 1, %s702_s19   ;;  %vm275_vm0 = vcmask (!%p218_p9), 1043456   ;;  %v728_v10 = vmov (!%p218_p9), 0.0   ;;  %v430_v11 = vld [vmem:[#allocation2] sm:$0x1] (!%p218_p9)  ;;  %vm729_vm1 = vmmov (!%p218_p9), 1   ;;  %v436_v28 = vlaneseq (!%p218_p9) }
  0x24   : > { %221 = sbr.rel (%p218_p9) target bundleno = 273 (0x111), region = 55  ;;  %s588_s16 = sshll.u32 (!%p218_p9), %s224_s15, 6  ;;  %352 = vmatprep.mubr.f32.mxu0 (!%p218_p9), %v728_v10  ;;  %423 = vmatprep.mubr.f32.mxu1 (!%p218_p9), %v728_v10  ;;  %vm826_vm2 = vmpackc.low (!%p218_p9), %vm275_vm0, %vm729_vm1  ;;  %v730_v13 = vmov (!%p218_p9), 0   ;;  %v444_v25 = vld [vmem:[#allocation3] sm:$0x1] (!%p218_p9)  ;;  %vm271_vm3 = vcmask (!%p218_p9), 97280  }
  0x25   : > { %671 = vset.pattern.permute.xlu0 (!%p218_p9), %v730_v13  ;;  %s226_s17 = scalar_lea.vmem (!%p218_p9), [#allocation4], %s588_s16  ;;  %v262_v27 = vld [vmem:[%s868_s0] sm:$0x1] (!%p218_p9)  ;;  %v437_v29 = vshrl.u32 (!%p218_p9), %v436_v28, 7  ;;  %v731_v32 = vmov (!%p218_p9), 1966171168  }
  0x26   : > { %v264_v14 = vld [vmem:[%s226_s17 + $0x8] sm:$0xff] (!%p218_p9)  ;;  %v266_v16 = vld [vmem:[%s226_s17 + $0x18] sm:$0xff] (!%p218_p9)  ;;  %433 = vperm.xlu0 (!%p218_p9), %671, %v430_v11   ;;  %v263_v19 = vld [vmem:[%s226_s17] sm:$0xff] (!%p218_p9)  ;;  %v465_v33 = vunpack.c.l.s4 (!%p218_p9), %v731_v32  ;;  %s589_s26 = sshll.u32 (!%p218_p9), %s710_s21, 2  ;;  %p254_p10 = scmp.lt.s32.totalorder (!%p218_p9), %s714_s22, 1  ;;  %vm489_vm4 = vcmp.lt.s32.totalorder (!%p218_p9), %v436_v28, 512 }
  0x27   : > { %v268_v15 = vld [vmem:[%s226_s17 + $0x28] sm:$0xf] (!%p218_p9)  ;;  %v270_v18 = vld [vmem:[%s226_s17 + $0x38] sm:$0xf] (!%p218_p9)  ;;  %v267_v20 = vld [vmem:[%s226_s17 + $0x20] sm:$0xf] (!%p218_p9) }
  0x28   : > { %v599_v17 = vpack.c.bf16 (!%p218_p9), %v268_v15, %v264_v14  ;;  %v605_v21 = vpack.c.bf16 (!%p218_p9), %v270_v18, %v266_v16  ;;  %v602_v22 = vpack.c.bf16 (!%p218_p9), %v267_v20, %v263_v19  ;;  %v265_v23 = vld [vmem:[%s226_s17 + $0x10] sm:$0xff] (!%p218_p9)  ;;  %v438_v31 = vsub.s32 (!%p218_p9), 0, %v437_v29  ;;  %p256_p11 = scmp.lt.s32.totalorder (!%p218_p9), %s589_s26, 7 }
  0x29   : > { %v269_v24 = vld [vmem:[%s226_s17 + $0x30] sm:$0xf] (!%p218_p9)  ;;  %v466_v36 = vunpack.c.0.s8 (!%p218_p9), %v465_v33 }
  0x2a   : > { %601 = vmatprep.subr.msk.bf16.mxu0 (!%p218_p9), %vm826_vm2, %v599_v17  ;;  %v608_v26 = vpack.c.bf16 (!%p218_p9), %v269_v24, %v265_v23  ;;  %607 = vmatprep.subr.msk.bf16.mxu1 (!%p218_p9), %vm826_vm2, %v605_v21 }
  0x2b   : > { %604 = vmatpush1.bf16.msk.msra.mxu0 %vm826_vm2, %v602_v22  ;;  %447 = vperm.xlu0 %671, %v444_v25   ;;  %s888_s22 = smov (!%p254_p10, %s714_s22), 1  ;;  %v469_v47 = vsub.s32 %v466_v36, %v437_v29  ;;  %s890_s26 = smov (!%p256_p11, %s589_s26), 7 }
  0x2c   : > { %610 = vmatpush1.bf16.msk.msra.mxu1 %vm826_vm2, %v608_v26  ;;  %s590_s21 = sshll.u32 %s888_s22, 3 }
  0x2d   : > { %s259_s27 = sadd.s32 %s590_s21, %s890_s26 }
  0x2e   : > { %593 = vmatmul.mubr.msk.f32.vlgmr.msra.gmra.mrb[0].mxu0 %vm271_vm3, %v262_v27  ;;  %s260_s5 = scalar_lea.vmem %s871_s4, %s259_s27 }
  0x2f   : > { %596 = vmatmul.mubr.msk.f32.vlgmr.msra.gmra.mrb[0].mxu1 %vm271_vm3, %v262_v27 }
  0xa5   : > { %v434_v30 = vpop.permute.xlu0 %433 }
  0xa6   : > { %v439_v34 = vrot.slane %v434_v30, %v438_v31 }
  0xaa   : > { %v448_v35 = vpop.permute.xlu0 %447 }
  0xab   : > { %v453_v38 = vrot.slane %v448_v35, %v438_v31 }
 0x101   : > { %v354_v37 = vpop.f32.mrb[0].mxu0 }
 0x102   : > { %v440_v39 = vmul.f32 %v439_v34, %v354_v37  ;;  %v425_v40 = vpop.f32.mrb[0].mxu1  ;;  %v356_v41 = vpop.f32.mrb[1].mxu0 }
 0x103   : > { %v442_v42 = vmul.f32 %v439_v34, %v425_v40  ;;  %v441_v43 = vmul.f32 %v439_v34, %v356_v41  ;;  %v427_v44 = vpop.f32.mrb[1].mxu1 }
 0x104   : > { %v454_v45 = vadd.f32 %v453_v38, %v440_v39  ;;  %v443_v46 = vmul.f32 %v439_v34, %v427_v44 }
 0x105   : > { %v456_v48 = vadd.f32 %v453_v38, %v442_v42  ;;  %v455_v49 = vadd.f32 %v453_v38, %v441_v43 }
 0x106   : > { %v457_v50 = vadd.f32 %v453_v38, %v443_v46 }
 0x107   : > { %v462_v51 = vcombine.low %v454_v45, %v455_v49 }
 0x108   : > { %v463_v52 = vcombine.low %v456_v48, %v457_v50 }
 0x109   : > { %v470_v53 = vrot.slane %v462_v51, %v469_v47 }
 0x10a   : > { %v477_v54 = vrot.slane %v463_v52, %v469_v47 }
 0x10c   : > { %v478_v55 = vcombine.low %v470_v53, %v477_v54 }
 0x10e   : > { %v485_v56 = vrot.slane %v478_v55, %v469_v47 }
 0x110   : > { %491 = vst.msk [vmem:[%s260_s5] sm:$0xf] %vm489_vm4, %v485_v56 }
 0x111 PF: > { %s18_s25 = sadd.s32 1, %s726_s25   ;;  %s875_s19 = smov %s706_s20 }
 0x112   : > { %p15_p12 = scmp.ge.s32.totalorder %s18_s25, 6   ;;  %s876_s20 = smov %s814_s30 }
 0x113   : > { %s877_s21 = smov %s718_s23  ;;  %s878_s22 = smov %s722_s24 }
 0x114   : > { %s879_s23 = smov %s882_s1  ;;  %s880_s24 = smov %s886_s2 }
 0x115   :  { %17 = sbr.rel (!%p15_p12) target bundleno = 7 (0x7), region = 94 }

</bundles_post_ra>
